<compile_context>
chip_gen: v5e
topology: v5e:2x2
jax: 0.10.0
libtpu: 0.0.40
codegen_flags: <defaults>
</compile_context>

<pallas_src>
import hashlib

import numpy as np
import jax
import jax.numpy as jnp
from jax.experimental import pallas as pl
from jax.experimental.pallas import tpu as pltpu


N_BUCKETS = 512          # small synthetic stand-in for the 500000 default
EMB_SIZE = 32
TILE = 512               # output rows produced per grid step
LANE = 128


def token_hasher(name: str, n_buckets: int) -> int:
    """Deterministic stand-in for SourceCodeTools' token_hasher."""
    digest = hashlib.md5(name.encode("utf-8")).hexdigest()
    return int(digest, 16) % n_buckets


def _round_up(x: int, m: int) -> int:
    return (x + m - 1) // m * m


# ----------------------------- Pallas kernel ------------------------------- #
def _onehot_gather_kernel(idx_ref, tab_ref, out_ref):
    # idx_ref : VMEM (1, TILE)    int32 bucket indices for this tile (lane-dense)
    # tab_ref : VMEM (E, V_pad)   bf16 transposed table (vocab on the lane axis)
    # out_ref : VMEM (E, TILE)    bf16 gathered rows (output row on the lane axis)
    v_pad = tab_ref.shape[1]
    tile = out_ref.shape[1]
    idx = idx_ref[...]                                              # [1, TILE]
    # One-hot straight from the compare (bool -> bf16); vocab on the sublane
    # axis so the matmul contracts over it.  The padding index hits the
    # explicitly zeroed table row; OOB / negative indices match no column.
    vrow = jax.lax.broadcasted_iota(jnp.int32, (v_pad, tile), 0)    # [V_pad, TILE]
    onehot = (vrow == idx).astype(tab_ref.dtype)                    # [V_pad, TILE]
    # One MXU matmul gathers all TILE rows at once; N (= TILE) fills the MXU
    # width and f32 accumulation keeps the values exact (exactly one nonzero
    # product per output element), so the bf16 store is verbatim.
    out_ref[...] = jnp.dot(
        tab_ref[...], onehot, preferred_element_type=jnp.float32
    ).astype(out_ref.dtype)


def embedding_lookup(indices: jax.Array, table_t_padded: jax.Array,
                     pad_index: int) -> jax.Array:
    """Gather rows of the transposed embedding table on TPU.

    indices:        [N] int32 bucket indices (any N; padded internally to TILE)
    table_t_padded: [E, V_pad] bf16 table, vocab axis padded to a multiple of 128
    returns:        [N, E] float32
    """
    n = int(indices.shape[0])
    e, v_pad = table_t_padded.shape
    n_pad = _round_up(max(n, TILE), TILE)
    n_tiles = n_pad // TILE

    idx = jnp.pad(indices.astype(jnp.int32), (0, n_pad - n),
                  constant_values=pad_index)
    idx2d = idx.reshape(1, n_pad)                      # lane-dense index row

    # VMEM budget from the actual footprint (perf review) instead of 32 MiB:
    #   2x idx block (sublane-padded to 8) + table (+ possible 2nd buffer)
    #   + 2x out block + one-hot intermediate + f32 accumulator, 2x headroom.
    idx_bytes = 8 * TILE * 4
    tab_bytes = e * v_pad * 2
    out_bytes = e * TILE * 2
    onehot_bytes = v_pad * TILE * 2
    acc_bytes = e * TILE * 4
    footprint = 2 * idx_bytes + 2 * tab_bytes + 2 * out_bytes + onehot_bytes + acc_bytes
    vmem_limit = max(_round_up(2 * footprint, 1 << 20), 4 << 20)

    def run(single_buffer_table: bool):
        tab_kwargs = {"pipeline_mode": pl.Buffered(1)} if single_buffer_table else {}
        return pl.pallas_call(
            _onehot_gather_kernel,
            out_shape=jax.ShapeDtypeStruct((e, n_pad), table_t_padded.dtype),
            grid=(n_tiles,),
            in_specs=[
                pl.BlockSpec((1, TILE), lambda i: (0, i)),            # index row tile
                pl.BlockSpec((e, v_pad), lambda i: (0, 0), **tab_kwargs),  # whole table
            ],
            out_specs=pl.BlockSpec((e, TILE), lambda i: (0, i)),
            compiler_params=pltpu.CompilerParams(
                dimension_semantics=("parallel",),     # >=2 tiles -> 2 TCs on v7x
                vmem_limit_bytes=vmem_limit,
            ),
        )(idx2d, table_t_padded)

    try:
        out_t = run(single_buffer_table=True)
    except Exception:   # pl.Buffered(1) unsupported on this jax version -> default buffering
        out_t = run(single_buffer_table=False)

    # [E, n_pad] -> [N, E]; bf16 -> f32 cast of verbatim table rows is exact.
    return out_t.T[:n].astype(jnp.float32)


# --------------------------- NodeEmbedder in JAX --------------------------- #
class NodeEmbedderJax:
    """JAX/Pallas re-implementation of NodeEmbedder's forward path (global ids)."""

    def __init__(self, node_info_global, emb_size=EMB_SIZE,
                 n_buckets=N_BUCKETS, seed=0):
        self.emb_size = emb_size
        self.n_buckets = n_buckets
        # {global_graph_id: (type_backup, embeddable_name)}
        self.node_info_global = dict(node_info_global)

        # nn.Embedding default init N(0, 1); padding row (index n_buckets) zero.
        # Stored in bfloat16: halves footprint & HBM traffic; the kernel does no
        # arithmetic on the rows, so values pass through exactly.
        key = jax.random.PRNGKey(seed)
        v = n_buckets + 1
        w = jax.random.normal(key, (v, emb_size), dtype=jnp.float32)
        w = w.at[n_buckets].set(0.0)
        w = w.astype(jnp.bfloat16)
        self.buckets = w                                  # logical [V, E] table
        # Pad the vocab axis once to a lane-aligned multiple of 128 (padded rows
        # are zeros and are never indexed) and transpose to [E, V_pad] so the
        # kernel is lane-dense on the table, the one-hot and the output.
        v_pad = _round_up(v, LANE)
        self._table_t = jnp.pad(w, ((0, v_pad - v), (0, 0))).T   # [E, V_pad] bf16

    def _ids_to_bucket_indices(self, node_ids, masked=None):
        masked_set = set(masked) if masked is not None else None
        idxs = []
        for key in node_ids:
            key = int(key)
            if key not in self.node_info_global or (
                    masked_set is not None and key in masked_set):
                idxs.append(self.n_buckets)               # padding row -> zeros
            else:
                _real_type, name = self.node_info_global[key]
                idxs.append(token_hasher(name, self.n_buckets))
        return jnp.asarray(idxs, dtype=jnp.int32)

    def forward(self, node_ids, train_embeddings=True, masked=None):
        # TODO(synk): train_embeddings / sparse-gradient freezing is a
        # training-time concern; forward values are identical either way.
        idxs = self._ids_to_bucket_indices(np.asarray(node_ids).tolist(), masked)
        return embedding_lookup(idxs, self._table_t, pad_index=self.n_buckets)

    __call__ = forward


# ---------------------------------- main ----------------------------------- #
if __name__ == "__main__":
    # Synthetic "nodes" table: global ids 0..199 are embeddable with a name.
    node_info_global = {
        gid: ("function", f"node_name_{gid}") for gid in range(200)
    }
    embedder = NodeEmbedderJax(node_info_global, emb_size=EMB_SIZE,
                               n_buckets=N_BUCKETS, seed=0)

    # Deterministic example node ids: fixed prefix (known / masked / unknown)
    # plus random ids, some >= 200 -> unknown -> padding row (zeros).
    key = jax.random.PRNGKey(0)
    prefix = jnp.asarray([0, 1, 2, 3, 4, 5, 300, 301], dtype=jnp.int32)
    rand_ids = jax.random.randint(key, (992,), minval=0, maxval=400,
                                  dtype=jnp.int32)
    node_ids = jnp.concatenate([prefix, rand_ids])        # [1000]

    out = embedder(node_ids, train_embeddings=True, masked={3, 5})
    out = jax.block_until_ready(out)

    # Reference: plain gather on the same bucket indices (same bf16 table).
    idxs = embedder._ids_to_bucket_indices(np.asarray(node_ids).tolist(),
                                           masked={3, 5})
    ref = jnp.take(embedder.buckets, idxs, axis=0).astype(jnp.float32)
    np.testing.assert_allclose(np.asarray(out), np.asarray(ref), rtol=0, atol=0)

    assert out.shape == (1000, EMB_SIZE) and out.dtype == jnp.float32
    # masked id 3 (position 3) and unknown id 300 (position 6) -> zero vectors
    assert np.all(np.asarray(out)[3] == 0.0)
    assert np.all(np.asarray(out)[6] == 0.0)
    # known, unmasked id 0 (position 0) -> nonzero embedding
    assert np.any(np.asarray(out)[0] != 0.0)

    print("KERNEL_OK")
</pallas_src>

<mosaic_0001>
module attributes {stable_mosaic.version = 11 : i64} {
  func.func @_onehot_gather_kernel(%arg0: i32, %arg1: memref<1x512xi32, #tpu.memory_space<vmem>>, %arg2: memref<32x640xbf16, #tpu.memory_space<vmem>>, %arg3: memref<32x512xbf16, #tpu.memory_space<vmem>>) attributes {dimension_semantics = [#tpu.dimension_semantics<parallel>], iteration_bounds = array<i64: 2>, scalar_prefetch = 0 : i64, scratch_operands = 0 : i64, tpu.core_type = #tpu.core_type<tc>, window_params = [{transform_indices = @transform_0, window_bounds = array<i64: 1, 512>}, {pipeline_mode = #tpu.pipeline_mode<synchronous>, transform_indices = @transform_1, window_bounds = array<i64: 32, 640>}, {transform_indices = @transform_2, window_bounds = array<i64: 32, 512>}]} {
    %c0 = arith.constant 0 : index
    %c0_0 = arith.constant 0 : index
    %0 = vector.load %arg1[%c0, %c0_0] : memref<1x512xi32, #tpu.memory_space<vmem>>, vector<1x512xi32>
    %1 = tpu.iota {dimensions = array<i32: 0>} : vector<640x512xi32>
    %2 = vector.broadcast %0 : vector<1x512xi32> to vector<640x512xi32>
    %3 = arith.cmpi eq, %1, %2 : vector<640x512xi32>
    %4 = arith.extui %3 : vector<640x512xi1> to vector<640x512xi32>
    %5 = arith.sitofp %4 : vector<640x512xi32> to vector<640x512xf32>
    %6 = arith.truncf %5 : vector<640x512xf32> to vector<640x512xbf16>
    %c0_1 = arith.constant 0 : index
    %c0_2 = arith.constant 0 : index
    %7 = vector.load %arg2[%c0_1, %c0_2] : memref<32x640xbf16, #tpu.memory_space<vmem>>, vector<32x640xbf16>
    %cst = arith.constant dense<0.000000e+00> : vector<32x512xf32>
    %8 = tpu.matmul %7, %6, %cst {dimension_numbers = #tpu.dot_dimension_numbers<[1], [0], [0], [1], [0, 0, 1, 1], [], []>} : vector<32x640xbf16>, vector<640x512xbf16>, vector<32x512xf32> -> vector<32x512xf32>
    %9 = arith.truncf %8 : vector<32x512xf32> to vector<32x512xbf16>
    %c0_3 = arith.constant 0 : index
    %c0_4 = arith.constant 0 : index
    %10 = vector.load %arg3[%c0_3, %c0_4] : memref<32x512xbf16, #tpu.memory_space<vmem>>, vector<32x512xbf16>
    tpu.vector_store %arg3[%c0_3, %c0_4], %9 {strides = array<i32>} : memref<32x512xbf16, #tpu.memory_space<vmem>>, vector<32x512xbf16>,
    return
  }
  func.func @transform_0(%arg0: i32) -> (i32, i32) {
    %c0_i32 = arith.constant 0 : i32
    %c0_i32_0 = arith.constant 0 : i32
    return %c0_i32, %arg0 : i32, i32
  }
  func.func @transform_1(%arg0: i32) -> (i32, i32) {
    %c0_i32 = arith.constant 0 : i32
    %c0_i32_0 = arith.constant 0 : i32
    %c0_i32_1 = arith.constant 0 : i32
    return %c0_i32, %c0_i32_0 : i32, i32
  }
  func.func @transform_2(%arg0: i32) -> (i32, i32) {
    %c0_i32 = arith.constant 0 : i32
    %c0_i32_0 = arith.constant 0 : i32
    return %c0_i32, %arg0 : i32, i32
  }
}

module attributes {stable_mosaic.version = 11 : i64} {
  func.func @_onehot_gather_kernel(%arg0: i32, %arg1: memref<1x512xi32, #tpu.memory_space<vmem>>, %arg2: memref<32x640xbf16, #tpu.memory_space<vmem>>, %arg3: memref<32x512xbf16, #tpu.memory_space<vmem>>) attributes {dimension_semantics = [#tpu.dimension_semantics<parallel>], iteration_bounds = array<i64: 2>, scalar_prefetch = 0 : i64, scratch_operands = 0 : i64, tpu.core_type = #tpu.core_type<tc>, window_params = [{transform_indices = @transform_0, window_bounds = array<i64: 1, 512>}, {pipeline_mode = #tpu.pipeline_mode<synchronous>, transform_indices = @transform_1, window_bounds = array<i64: 32, 640>}, {transform_indices = @transform_2, window_bounds = array<i64: 32, 512>}]} {
    %c0 = arith.constant 0 : index
    %c0_0 = arith.constant 0 : index
    %0 = vector.load %arg1[%c0, %c0_0] : memref<1x512xi32, #tpu.memory_space<vmem>>, vector<1x512xi32>
    %1 = tpu.iota {dimensions = array<i32: 0>} : vector<640x512xi32>
    %2 = vector.broadcast %0 : vector<1x512xi32> to vector<640x512xi32>
    %3 = arith.cmpi eq, %1, %2 : vector<640x512xi32>
    %4 = arith.extui %3 : vector<640x512xi1> to vector<640x512xi32>
    %5 = arith.sitofp %4 : vector<640x512xi32> to vector<640x512xf32>
    %6 = arith.truncf %5 : vector<640x512xf32> to vector<640x512xbf16>
    %c0_1 = arith.constant 0 : index
    %c0_2 = arith.constant 0 : index
    %7 = vector.load %arg2[%c0_1, %c0_2] : memref<32x640xbf16, #tpu.memory_space<vmem>>, vector<32x640xbf16>
    %cst = arith.constant dense<0.000000e+00> : vector<32x512xf32>
    %8 = tpu.matmul %7, %6, %cst {dimension_numbers = #tpu.dot_dimension_numbers<[1], [0], [0], [1], [0, 0, 1, 1], [], []>} : vector<32x640xbf16>, vector<640x512xbf16>, vector<32x512xf32> -> vector<32x512xf32>
    %9 = arith.truncf %8 : vector<32x512xf32> to vector<32x512xbf16>
    %c0_3 = arith.constant 0 : index
    %c0_4 = arith.constant 0 : index
    %10 = vector.load %arg3[%c0_3, %c0_4] : memref<32x512xbf16, #tpu.memory_space<vmem>>, vector<32x512xbf16>
    tpu.vector_store %arg3[%c0_3, %c0_4], %9 {strides = array<i32>} : memref<32x512xbf16, #tpu.memory_space<vmem>>, vector<32x512xbf16>,
    return
  }
  func.func @transform_0(%arg0: i32) -> (i32, i32) {
    %c0_i32 = arith.constant 0 : i32
    %c0_i32_0 = arith.constant 0 : i32
    return %c0_i32, %arg0 : i32, i32
  }
  func.func @transform_1(%arg0: i32) -> (i32, i32) {
    %c0_i32 = arith.constant 0 : i32
    %c0_i32_0 = arith.constant 0 : i32
    %c0_i32_1 = arith.constant 0 : i32
    return %c0_i32, %c0_i32_0 : i32, i32
  }
  func.func @transform_2(%arg0: i32) -> (i32, i32) {
    %c0_i32 = arith.constant 0 : i32
    %c0_i32_0 = arith.constant 0 : i32
    return %c0_i32, %arg0 : i32, i32
  }
}

</mosaic_0001>

<bundles_post_ra>
// kernel: tpu_custom_call.1
= control target key start
LH: loop header
LB: loop body
LE: loop exit
PB: predicated region body
PF: predicated region fallthrough
CT: control target
= control target key end

     0   :  { %7 = vsyncpa [#allocation3], 0  ;;  %s4378_s0 = inlined_call_operand.hbm [shape: s32[1,1024], index: 0, kind: input, shape index: {}]   ;;  %s4379_s1 = inlined_call_operand.hbm [shape: bf16[32,640], index: 1, kind: input, shape index: {}]   ;;  %s4380_s2 = inlined_call_operand.hbm [shape: bf16[32,1024], index: 2, kind: output, shape index: {}]  }
   0x1   :  { %9 = vsyncpa [#allocation3 + $0x1], 0 }
   0x2   :  { %10 = vsyncpa [#allocation6], 0 }
   0x3   :  { %11 = vsyncpa [#allocation4], 0 }
   0x4   :  { %13 = vsyncpa [#allocation4 + $0x1], 0  ;;  %s2868_s9 = smov 0   ;;  %s2870_s10 = smov 0  }
   0x5   :  { %s2872_s11 = smov 0   ;;  %s2874_s12 = smov 0  }
   0x6 LB: > { %s108_s15 = sshll.u32 %s4379_s1, 4  ;;  %s2892_s16 = sadd.s32 4294967295, %s2844_s12   ;;  %s2844_s12 = sphi %s2874_s12, %s4594_s12   ;;  %s2840_s11 = sphi %s2872_s11, %s4593_s11   ;;  %s2836_s10 = sphi %s2870_s10, %s4592_s10   ;;  %s2832_s9 = sphi %s2868_s9, %s4591_s9   ;;  %s109_s15 = int_to_ptr.hbm [resolvable:$true] %s108_s15 }
   0x7   : > { %p1946_p0 = scmp.ge.s32.totalorder %s2844_s12, 1  ;;  %p40_p1 = scmp.eq.s32.totalorder %s2892_s16, 0 }
   0x8   : > { %p97_p2 = scmp.lt.s32.totalorder %s2844_s12, 3  ;;  %s2846_s18 = smov [#allocation5]  }
   0x9   : > { %s110_s19 = sshll.u32 %s2846_s18, 4  ;;  %s2847_s20 = smov 320   ;;  %s111_s19 = int_to_ptr.vmem [resolvable:$true] %s110_s19 }
   0xa   : > { %p2897_p3 = pnand %p1946_p0, %p97_p2  ;;  %s2848_s21 = smov 20  }
   0xb   : > { %s1945_s22 = sadd.s32 4294967294, %s2844_s12   ;;  %s2908_s23 = sadd.s32 1, %s2844_s12  }
   0xc   : > { %p2659_p4 = pneg %p2897_p3  ;;  %s26_s24 = sadd.s32 1, %s2840_s11 }
   0xd   : > { %s23_s25 = ssub.s32 %s2844_s12, %s2908_s23  ;;  %p33_p7 = scmp.ne.s32.totalorder %s2840_s11, %s2836_s10 }
   0xe   : > { %p2660_p6 = pnand %p2659_p4, %p40_p1  ;;  %p24_p8 = scmp.eq.s32.totalorder %s23_s25, 0 }
   0xf   : > { %p34_p9 = scmp.eq.s32.totalorder %s2844_s12, 0  ;;  %p39_p10 = scmp.ne.s32.totalorder %s2836_s10, %s2832_s9 }
  0x10   : > { %2662 = dma.hbm_to_vmem [thread:$0]  (!%p2660_p6), %s109_s15, 1280, %s111_s19, [#allocation6], %s2847_s20, %s2847_s20, %s2848_s21  }
  0x11   : > { %p84_p11 = scmp.eq.s32.totalorder %s2892_s16, 1  ;;  %p2924_p12 = por %p40_p1, %p39_p10 }
  0x12   : > { %s2920_s26 = scalar_select %p24_p8, %s2840_s11, %s26_s24  }
  0x13   : > { %p2928_p13 = por %p84_p11, %p33_p7  ;;  %p90_p0 = scmp.eq.s32.totalorder %s1945_s22, 1 }
  0x14   : > { %p35_p2 = por %p34_p9, %p33_p7  ;;  %s124_s29 = sand.u32 1, %s2840_s11  }
  0x15   : > { %p2933_p4 = por %p90_p0, %p39_p10  ;;  %p2672_p6 = scmp.lt.s32.totalorder %s2844_s12, 2 }
  0x16   : > { %s1949_s3 = sshll.u32 %s124_s29, 2  ;;  %s1950_s4 = sshll.u32 %s2844_s12, 2 }
  0x17   : > { %s132_s7 = scalar_lea.hbm %s4378_s0, %s1950_s4  ;;  %s128_s13 = scalar_lea.vmem [#allocation2], %s1949_s3 }
  0x18   : > { %s134_s8 = sshll.u32 %s132_s7, 4  ;;  %s136_s14 = sshll.u32 %s128_s13, 4  ;;  %s135_s8 = int_to_ptr.hbm [resolvable:$true] %s134_s8  ;;  %s137_s14 = int_to_ptr.vmem [resolvable:$true] %s136_s14 }
  0x19   : > { %p2942_p8 = pnand %p2672_p6, %p35_p2  ;;  %s125_s18 = scalar_lea.sflag [#allocation3], %s124_s29 }
  0x1a   : > { %s2744_s19 = sshra.s32 %s135_s8, 4  ;;  %s2751_s24 = scalar_lea.hbm %s4378_s0, 8  ;;  %s2745_s19 = int_to_ptr.hbm [resolvable:$true] %s2744_s19 }
  0x1b   : > { %s2746_s20 = scalar_lea.hbm %s2745_s19, 4  ;;  %p2748_p9 = pneg %p2942_p8 }
  0x1c   : > { %p2747_p7 = scmp.ne.s32.totalorder %s2745_s19, %s2746_s20  ;;  %p2752_p0 = scmp.lt.s32.totalorder %s2745_s19, %s4378_s0 }
  0x1d   : > { %p2753_p2 = scmp.lt.s32.totalorder %s2751_s24, %s2746_s20 }
  0x1e   : > { %p2749_p10 = pnand %p2748_p9, %p2747_p7 }
  0x1f   : > { %p2754_p6 = por %p2753_p2, %p2752_p0 }
  0x20   : > { %p2750_p11 = pneg %p2749_p10 }
  0x22   : > { %p2755_p5 = pnand %p2754_p6, %p2750_p11 }
  0x24   : > { %2758 = shalt.err (!%p2755_p5)
}
  0x25   : > { %2666 = dma.hbm_to_vmem [thread:$0]  (!%p2942_p8), %s135_s8, 64, %s137_s14, %s125_s18  }
  0x26   : > { %145 = sbr.rel (%p2897_p3) target bundleno = 391 (0x187), region = 28 }
  0x2b   : > { %s2959_s29 = sand.u32 1, %s2836_s10  }
  0x2c   : > { %s1952_s4 = sshll.u32 %s2959_s29, 2  ;;  %s148_s5 = scalar_lea.sflag [#allocation3], %s2959_s29 }
  0x2d   : > { %s151_s6 = scalar_lea.vmem [#allocation2], %s1952_s4 }
  0x2e   : > { %2819 = dma.done.wait (%p2924_p12), %s148_s5, 64  }
  0x2f   : > { %2821 = vsyncadd (%p2924_p12), %s148_s5, 4294967232 }
  0x30   : > { %2823 = dma.done.wait (%p40_p1), [#allocation6], 1280  }
  0x31   : > { %2825 = vsyncadd (%p40_p1), [#allocation6], 4294966016  ;;  %v181_v0 = vlaneseq  ;;  %v2988_v7 = vld [vmem:[%s151_s6] sm:$0xf]  ;;  %v4381_v20 = vmov 1.0|1.0  }
  0x32   : > { %4483 = vst [vmem:[#allocation14_spill] sm:$0xff] %v2988_v7  ;;  %v3003_v12 = vperm.slane %v2988_v7, 0  ;;  %s1954_s17 = sshll.u32 %s2959_s29, 6  ;;  %s2650_s7 = sshll.u32 %s2892_s16, 4 }
  0x33   : > { %v2971_v1 = vshrl.u32 %v181_v0, 7  ;;  %s4333_s27 = scalar_lea.vmem [#allocation7], %s1954_s17  ;;  %s1858_s14 = scalar_lea.hbm %s4380_s2, %s2650_s7 }
  0x34   : > { %s1859_s15 = sshll.u32 %s4333_s27, 4  ;;  %s1861_s18 = sshll.u32 %s1858_s14, 4  ;;  %s1860_s15 = int_to_ptr.vmem [resolvable:$true] %s1859_s15  ;;  %s1862_s18 = int_to_ptr.hbm [resolvable:$true] %s1861_s18 }
  0x35   : > { %v2974_v2 = vadd.s32 112, %v2971_v1  ;;  %v2977_v3 = vadd.s32 120, %v2971_v1  ;;  %v2980_v4 = vadd.s32 240, %v2971_v1  ;;  %v2983_v5 = vadd.s32 248, %v2971_v1  ;;  %s1847_s16 = scalar_lea.sflag [#allocation4], %s2959_s29  ;;  %s2788_s19 = sshra.s32 %s1862_s18, 4  ;;  %s2789_s19 = int_to_ptr.hbm [resolvable:$true] %s2788_s19 }
  0x36   : > { %v2986_v6 = vadd.s32 368, %v2971_v1  ;;  %v2991_v8 = vadd.s32 376, %v2971_v1  ;;  %v2994_v9 = vadd.s32 496, %v2971_v1  ;;  %v2997_v10 = vadd.s32 504, %v2971_v1  ;;  %s2790_s20 = scalar_lea.hbm %s2789_s19, 64  ;;  %s2794_s24 = scalar_lea.hbm %s4380_s2, 128 }
  0x37   : > { %4480 = vst [vmem:[#allocation11_spill] sm:$0xff] %v2980_v4  ;;  %v3000_v11 = vadd.s32 96, %v2971_v1  ;;  %v3006_v13 = vadd.s32 104, %v2971_v1  ;;  %v3009_v14 = vadd.s32 224, %v2971_v1  ;;  %v3012_v15 = vadd.s32 232, %v2971_v1  ;;  %p2791_p1 = scmp.ne.s32.totalorder %s2789_s19, %s2790_s20  ;;  %p2795_p12 = scmp.lt.s32.totalorder %s2789_s19, %s4380_s2 }
  0x38   : > { %4481 = vst [vmem:[#allocation12_spill] sm:$0xff] %v2983_v5  ;;  %v3015_v16 = vadd.s32 352, %v2971_v1  ;;  %v3018_v17 = vadd.s32 360, %v2971_v1  ;;  %v3021_v18 = vadd.s32 480, %v2971_v1  ;;  %v3024_v19 = vadd.s32 488, %v2971_v1  ;;  %p2796_p8 = scmp.lt.s32.totalorder %s2794_s24, %s2790_s20 }
  0x39   : > { %4482 = vst [vmem:[#allocation13_spill] sm:$0xff] %v2986_v6  ;;  %vm322_vm0 = vcmp.eq.s32.totalorder %v2974_v2, %v3003_v12  ;;  %vm326_vm1 = vcmp.eq.s32.totalorder %v2977_v3, %v3003_v12  ;;  %vm386_vm2 = vcmp.eq.s32.totalorder %v2980_v4, %v3003_v12  ;;  %vm390_vm3 = vcmp.eq.s32.totalorder %v2983_v5, %v3003_v12  ;;  %p2792_p3 = pnand %p2791_p1, %p2928_p13 }
  0x3a   : > { %4484 = vst [vmem:[#allocation15_spill] sm:$0xff] %v2991_v8  ;;  %vm2315_vm4 = vmpackc.low %vm326_vm1, %vm322_vm0  ;;  %vm450_vm5 = vcmp.eq.s32.totalorder %v2986_v6, %v3003_v12  ;;  %vm454_vm6 = vcmp.eq.s32.totalorder %v2991_v8, %v3003_v12  ;;  %vm514_vm7 = vcmp.eq.s32.totalorder %v2994_v9, %v3003_v12  ;;  %vm518_vm8 = vcmp.eq.s32.totalorder %v2997_v10, %v3003_v12  ;;  %p2797_p7 = por %p2796_p8, %p2795_p12 }
  0x3b   : > { %4485 = vst [vmem:[#allocation16_spill] sm:$0xff] %v2994_v9  ;;  %2316 = vmatpush.bf16.msk.msra.mxu0 %vm2315_vm4, %v4381_v20  ;;  %vm2331_vm9 = vmpackc.low %vm390_vm3, %vm386_vm2  ;;  %vm314_vm10 = vcmp.eq.s32.totalorder %v3000_v11, %v3003_v12  ;;  %vm318_vm11 = vcmp.eq.s32.totalorder %v3006_v13, %v3003_v12  ;;  %v3048_v21 = vadd.s32 80, %v2971_v1  ;;  %v3051_v22 = vadd.s32 88, %v2971_v1  ;;  %p2793_p5 = pneg %p2792_p3 }
  0x3c   : > { %4486 = vst [vmem:[#allocation17_spill] sm:$0xff] %v2997_v10  ;;  %2332 = vmatpush.bf16.msk.msra.mxu1 %vm2331_vm9, %v4381_v20  ;;  %vm2347_vm12 = vmpackc.low %vm454_vm6, %vm450_vm5  ;;  %vm378_vm13 = vcmp.eq.s32.totalorder %v3009_v14, %v3003_v12  ;;  %vm382_vm14 = vcmp.eq.s32.totalorder %v3012_v15, %v3003_v12  ;;  %v3059_v23 = vadd.s32 208, %v2971_v1  ;;  %v3062_v24 = vadd.s32 216, %v2971_v1 }
  0x3d   : > { %4487 = vst [vmem:[#allocation18_spill] sm:$0xff] %v3009_v14  ;;  %2348 = vmatpush.bf16.msk.msra.mxu2 %vm2347_vm12, %v4381_v20  ;;  %vm2363_vm15 = vmpackc.low %vm518_vm8, %vm514_vm7  ;;  %vm442_vm0 = vcmp.eq.s32.totalorder %v3015_v16, %v3003_v12  ;;  %vm446_vm1 = vcmp.eq.s32.totalorder %v3018_v17, %v3003_v12  ;;  %vm506_vm2 = vcmp.eq.s32.totalorder %v3021_v18, %v3003_v12  ;;  %v3087_v25 = vadd.s32 336, %v2971_v1  ;;  %p2798_p9 = pnand %p2797_p7, %p2793_p5 }
  0x3e   : > { %4488 = vst [vmem:[#allocation19_spill] sm:$0xff] %v3012_v15  ;;  %vm510_vm3 = vcmp.eq.s32.totalorder %v3024_v19, %v3003_v12  ;;  %2364 = vmatpush.bf16.msk.msra.mxu3 %vm2363_vm15, %v4381_v20  ;;  %vm2317_vm4 = vmpackc.low %vm318_vm11, %vm314_vm10  ;;  %v3090_v26 = vadd.s32 344, %v2971_v1  ;;  %v3093_v27 = vadd.s32 464, %v2971_v1  ;;  %v3096_v28 = vadd.s32 472, %v2971_v1 }
  0x3f   : > { %4489 = vst [vmem:[#allocation20_spill] sm:$0xff] %v3015_v16  ;;  %2318 = vmatpush.bf16.msk.msra.mxu0 %vm2317_vm4, %v4381_v20  ;;  %vm2333_vm5 = vmpackc.low %vm382_vm14, %vm378_vm13  ;;  %vm306_vm6 = vcmp.eq.s32.totalorder %v3048_v21, %v3003_v12  ;;  %vm310_vm7 = vcmp.eq.s32.totalorder %v3051_v22, %v3003_v12  ;;  %v3110_v29 = vadd.s32 64, %v2971_v1  ;;  %v3113_v30 = vadd.s32 72, %v2971_v1 }
  0x40   : > { %4490 = vst [vmem:[#allocation21_spill] sm:$0xff] %v3018_v17  ;;  %2334 = vmatpush.bf16.msk.msra.mxu1 %vm2333_vm5, %v4381_v20  ;;  %vm2349_vm8 = vmpackc.low %vm446_vm1, %vm442_vm0  ;;  %vm370_vm9 = vcmp.eq.s32.totalorder %v3059_v23, %v3003_v12  ;;  %vm374_vm10 = vcmp.eq.s32.totalorder %v3062_v24, %v3003_v12  ;;  %v3127_v31 = vadd.s32 192, %v2971_v1  ;;  %v3130_v32 = vadd.s32 200, %v2971_v1 }
  0x41   : > { %4491 = vst [vmem:[#allocation22_spill] sm:$0xff] %v3021_v18  ;;  %2350 = vmatpush.bf16.msk.msra.mxu2 %vm2349_vm8, %v4381_v20  ;;  %vm2365_vm11 = vmpackc.low %vm510_vm3, %vm506_vm2  ;;  %vm434_vm12 = vcmp.eq.s32.totalorder %v3087_v25, %v3003_v12  ;;  %vm438_vm13 = vcmp.eq.s32.totalorder %v3090_v26, %v3003_v12  ;;  %vm498_vm14 = vcmp.eq.s32.totalorder %v3093_v27, %v3003_v12  ;;  %v3155_v33 = vadd.s32 320, %v2971_v1  ;;  %v2643_v18 = vld [vmem:[#allocation5 + $0x18] sm:$0xf0] }
  0x42   : > { %4492 = vst [vmem:[#allocation23_spill] sm:$0xff] %v3024_v19  ;;  %vm502_vm15 = vcmp.eq.s32.totalorder %v3096_v28, %v3003_v12  ;;  %2366 = vmatpush.bf16.msk.msra.mxu3 %vm2365_vm11, %v4381_v20  ;;  %vm2319_vm0 = vmpackc.low %vm310_vm7, %vm306_vm6  ;;  %v3158_v34 = vadd.s32 328, %v2971_v1  ;;  %v3161_v35 = vadd.s32 448, %v2971_v1  ;;  %v3164_v36 = vadd.s32 456, %v2971_v1  ;;  %v2285_v19 = vld [vmem:[#allocation5 + $0x8] sm:$0xf] }
  0x43   : > { %4493 = vst [vmem:[#allocation24_spill] sm:$0xff] %v3059_v23  ;;  %2320 = vmatpush.bf16.msk.msra.mxu0 %vm2319_vm0, %v4381_v20  ;;  %vm2335_vm1 = vmpackc.low %vm374_vm10, %vm370_vm9  ;;  %vm298_vm2 = vcmp.eq.s32.totalorder %v3110_v29, %v3003_v12  ;;  %vm302_vm3 = vcmp.eq.s32.totalorder %v3113_v30, %v3003_v12  ;;  %v3178_v37 = vadd.s32 48, %v2971_v1  ;;  %v3181_v38 = vadd.s32 56, %v2971_v1 }
  0x44   : > { %4494 = vst [vmem:[#allocation25_spill] sm:$0xff] %v3062_v24  ;;  %2336 = vmatpush.bf16.msk.msra.mxu1 %vm2335_vm1, %v4381_v20  ;;  %vm2351_vm4 = vmpackc.low %vm438_vm13, %vm434_vm12  ;;  %vm362_vm5 = vcmp.eq.s32.totalorder %v3127_v31, %v3003_v12  ;;  %vm366_vm6 = vcmp.eq.s32.totalorder %v3130_v32, %v3003_v12  ;;  %v3195_v39 = vadd.s32 176, %v2971_v1  ;;  %v3198_v40 = vadd.s32 184, %v2971_v1 }
  0x45   : > { %4495 = vst [vmem:[#allocation26_spill] sm:$0xff] %v3087_v25  ;;  %2352 = vmatpush.bf16.msk.msra.mxu2 %vm2351_vm4, %v4381_v20  ;;  %vm2367_vm7 = vmpackc.low %vm502_vm15, %vm498_vm14  ;;  %vm426_vm8 = vcmp.eq.s32.totalorder %v3155_v33, %v3003_v12  ;;  %vm430_vm9 = vcmp.eq.s32.totalorder %v3158_v34, %v3003_v12  ;;  %vm490_vm10 = vcmp.eq.s32.totalorder %v3161_v35, %v3003_v12  ;;  %v3223_v41 = vadd.s32 304, %v2971_v1 }
  0x46   : > { %4496 = vst [vmem:[#allocation27_spill] sm:$0xff] %v3090_v26  ;;  %vm494_vm11 = vcmp.eq.s32.totalorder %v3164_v36, %v3003_v12  ;;  %2368 = vmatpush.bf16.msk.msra.mxu3 %vm2367_vm7, %v4381_v20  ;;  %vm2321_vm12 = vmpackc.low %vm302_vm3, %vm298_vm2  ;;  %v3226_v42 = vadd.s32 312, %v2971_v1  ;;  %v3229_v43 = vadd.s32 432, %v2971_v1  ;;  %v3232_v44 = vadd.s32 440, %v2971_v1 }
  0x47   : > { %4497 = vst [vmem:[#allocation28_spill] sm:$0xff] %v3093_v27  ;;  %2322 = vmatpush.bf16.msk.msra.mxu0 %vm2321_vm12, %v4381_v20  ;;  %vm2337_vm13 = vmpackc.low %vm366_vm6, %vm362_vm5  ;;  %vm290_vm14 = vcmp.eq.s32.totalorder %v3178_v37, %v3003_v12  ;;  %vm294_vm15 = vcmp.eq.s32.totalorder %v3181_v38, %v3003_v12  ;;  %v3246_v45 = vadd.s32 32, %v2971_v1  ;;  %v3249_v46 = vadd.s32 40, %v2971_v1  ;;  %v2279_v27 = vld [vmem:[#allocation5 + $0x14] sm:$0xf0] }
  0x48   : > { %4498 = vst [vmem:[#allocation29_spill] sm:$0xff] %v3096_v28  ;;  %2338 = vmatpush.bf16.msk.msra.mxu1 %vm2337_vm13, %v4381_v20  ;;  %vm2353_vm0 = vmpackc.low %vm430_vm9, %vm426_vm8  ;;  %vm354_vm1 = vcmp.eq.s32.totalorder %v3195_v39, %v3003_v12  ;;  %vm358_vm2 = vcmp.eq.s32.totalorder %v3198_v40, %v3003_v12  ;;  %v3263_v47 = vadd.s32 160, %v2971_v1  ;;  %v3266_v48 = vadd.s32 168, %v2971_v1  ;;  %v2640_v28 = vld [vmem:[#allocation5 + $0x4] sm:$0xf] }
  0x49   : > { %4499 = vst [vmem:[#allocation30_spill] sm:$0xff] %v3110_v29  ;;  %2354 = vmatpush.bf16.msk.msra.mxu2 %vm2353_vm0, %v4381_v20  ;;  %vm2369_vm3 = vmpackc.low %vm494_vm11, %vm490_vm10  ;;  %vm418_vm4 = vcmp.eq.s32.totalorder %v3223_v41, %v3003_v12  ;;  %vm422_vm5 = vcmp.eq.s32.totalorder %v3226_v42, %v3003_v12  ;;  %vm482_vm6 = vcmp.eq.s32.totalorder %v3229_v43, %v3003_v12  ;;  %v3291_v49 = vadd.s32 288, %v2971_v1 }
  0x4a   : > { %4500 = vst [vmem:[#allocation31_spill] sm:$0xff] %v3113_v30  ;;  %vm486_vm7 = vcmp.eq.s32.totalorder %v3232_v44, %v3003_v12  ;;  %2370 = vmatpush.bf16.msk.msra.mxu3 %vm2369_vm3, %v4381_v20  ;;  %vm2323_vm8 = vmpackc.low %vm294_vm15, %vm290_vm14  ;;  %v3294_v50 = vadd.s32 296, %v2971_v1  ;;  %v3297_v51 = vadd.s32 416, %v2971_v1  ;;  %v3300_v52 = vadd.s32 424, %v2971_v1 }
  0x4b   : > { %4501 = vst [vmem:[#allocation32_spill] sm:$0xff] %v3127_v31  ;;  %2324 = vmatpush.bf16.msk.msra.mxu0 %vm2323_vm8, %v4381_v20  ;;  %vm2339_vm9 = vmpackc.low %vm358_vm2, %vm354_vm1  ;;  %vm282_vm10 = vcmp.eq.s32.totalorder %v3246_v45, %v3003_v12  ;;  %vm286_vm11 = vcmp.eq.s32.totalorder %v3249_v46, %v3003_v12  ;;  %v3314_v53 = vadd.s32 16, %v2971_v1  ;;  %v3317_v54 = vadd.s32 24, %v2971_v1 }
  0x4c   : > { %4502 = vst [vmem:[#allocation33_spill] sm:$0xff] %v3130_v32  ;;  %2340 = vmatpush.bf16.msk.msra.mxu1 %vm2339_vm9, %v4381_v20  ;;  %vm2355_vm12 = vmpackc.low %vm422_vm5, %vm418_vm4  ;;  %vm346_vm13 = vcmp.eq.s32.totalorder %v3263_v47, %v3003_v12  ;;  %vm350_vm14 = vcmp.eq.s32.totalorder %v3266_v48, %v3003_v12  ;;  %v3331_v55 = vadd.s32 144, %v2971_v1  ;;  %v3334_v56 = vadd.s32 152, %v2971_v1 }
  0x4d   : > { %4503 = vst [vmem:[#allocation34_spill] sm:$0xff] %v3161_v35  ;;  %2356 = vmatpush.bf16.msk.msra.mxu2 %vm2355_vm12, %v4381_v20  ;;  %vm2371_vm15 = vmpackc.low %vm486_vm7, %vm482_vm6  ;;  %vm410_vm0 = vcmp.eq.s32.totalorder %v3291_v49, %v3003_v12  ;;  %vm414_vm1 = vcmp.eq.s32.totalorder %v3294_v50, %v3003_v12  ;;  %vm474_vm2 = vcmp.eq.s32.totalorder %v3297_v51, %v3003_v12  ;;  %v3359_v57 = vadd.s32 272, %v2971_v1 }
  0x4e   : > { %4504 = vst [vmem:[#allocation35_spill] sm:$0xff] %v3164_v36  ;;  %vm478_vm3 = vcmp.eq.s32.totalorder %v3300_v52, %v3003_v12  ;;  %2372 = vmatpush.bf16.msk.msra.mxu3 %vm2371_vm15, %v4381_v20  ;;  %vm2325_vm4 = vmpackc.low %vm286_vm11, %vm282_vm10  ;;  %v3362_v58 = vadd.s32 280, %v2971_v1  ;;  %v3365_v59 = vadd.s32 400, %v2971_v1  ;;  %v3368_v60 = vadd.s32 408, %v2971_v1  ;;  %v2642_v36 = vld [vmem:[#allocation5 + $0x10] sm:$0xf0] }
  0x4f   : > { %4505 = vst [vmem:[#allocation36_spill] sm:$0xff] %v3198_v40  ;;  %2326 = vmatpush.bf16.msk.msra.mxu0 %vm2325_vm4, %v4381_v20  ;;  %vm2341_vm5 = vmpackc.low %vm350_vm14, %vm346_vm13  ;;  %vm274_vm6 = vcmp.eq.s32.totalorder %v3314_v53, %v3003_v12  ;;  %vm278_vm7 = vcmp.eq.s32.totalorder %v3317_v54, %v3003_v12  ;;  %v3382_v61 = vadd.s32 8, %v2971_v1  ;;  %vm338_vm9 = vcmp.eq.s32.totalorder %v3331_v55, %v3003_v12 }
  0x50   : > { %4506 = vst [vmem:[#allocation37_spill] sm:$0xff] %v3223_v41  ;;  %2342 = vmatpush.bf16.msk.msra.mxu1 %vm2341_vm5, %v4381_v20  ;;  %vm2357_vm8 = vmpackc.low %vm414_vm1, %vm410_vm0  ;;  %vm342_vm10 = vcmp.eq.s32.totalorder %v3334_v56, %v3003_v12  ;;  %v3396_v62 = vadd.s32 128, %v2971_v1  ;;  %v3399_v63 = vadd.s32 136, %v2971_v1  ;;  %vm402_vm12 = vcmp.eq.s32.totalorder %v3359_v57, %v3003_v12 }
  0x51   : > { %4507 = vst [vmem:[#allocation38_spill] sm:$0xff] %v3226_v42  ;;  %2358 = vmatpush.bf16.msk.msra.mxu2 %vm2357_vm8, %v4381_v20  ;;  %vm2373_vm11 = vmpackc.low %vm478_vm3, %vm474_vm2  ;;  %vm406_vm13 = vcmp.eq.s32.totalorder %v3362_v58, %v3003_v12  ;;  %vm466_vm14 = vcmp.eq.s32.totalorder %v3365_v59, %v3003_v12  ;;  %v3415_v0 = vadd.s32 256, %v2971_v1  ;;  %v2277_v20 = vld [vmem:[#allocation5] sm:$0xf]  ;;  %vm470_vm0 = vcmp.eq.s32.totalorder %v3368_v60, %v3003_v12 }
  0x52   : > { %4508 = vst [vmem:[#allocation39_spill] sm:$0xff] %v3229_v43  ;;  %vm2327_vm15 = vmpackc.low %vm278_vm7, %vm274_vm6  ;;  %v3433_v43 = vadd.s32 392, %v2971_v1  ;;  %v3436_v35 = vperm.slane %v2988_v7, 1  ;;  %vm266_vm2 = vcmp.eq.s32.totalorder %v2971_v1, %v3003_v12  ;;  %vm270_vm3 = vcmp.eq.s32.totalorder %v3382_v61, %v3003_v12  ;;  %v2287_v7 = vld [vmem:[#allocation5 + $0x1c] sm:$0xf0] }
  0x53   : > { %4509 = vst [vmem:[#allocation40_spill] sm:$0xff] %v3232_v44  ;;  %v4525_v44 = vmov 1.0|1.0   ;;  %vm2343_vm1 = vmpackc.low %vm342_vm10, %vm338_vm9  ;;  %vm330_vm5 = vcmp.eq.s32.totalorder %v3396_v62, %v3003_v12  ;;  %vm334_vm6 = vcmp.eq.s32.totalorder %v3399_v63, %v3003_v12  ;;  %vm394_vm8 = vcmp.eq.s32.totalorder %v3415_v0, %v3003_v12 }
  0x54   : > { %4510 = vst [vmem:[#allocation41_spill] sm:$0xff] %v3263_v47  ;;  %2374 = vmatpush.bf16.msk.msra.mxu3 %vm2373_vm11, %v4525_v44  ;;  %2328 = vmatpush.bf16.msk.msra.mxu0 %vm2327_vm15, %v4525_v44  ;;  %vm2359_vm4 = vmpackc.low %vm406_vm13, %vm402_vm12  ;;  %v3472_v10 = vadd.s32 624, %v2971_v1  ;;  %v3475_v9 = vadd.s32 632, %v2971_v1  ;;  %vm462_vm12 = vcmp.eq.s32.totalorder %v3433_v43, %v3003_v12  ;;  %vm391_vm15 = vcmp.eq.s32.totalorder %v2983_v5, %v3436_v35 }
  0x55   : > { %4511 = vst [vmem:[#allocation42_spill] sm:$0xff] %v3266_v48  ;;  %2344 = vmatpush.bf16.msk.msra.mxu1 %vm2343_vm1, %v4525_v44  ;;  %2360 = vmatpush.bf16.msk.msra.mxu2 %vm2359_vm4, %v4525_v44  ;;  %vm2375_vm7 = vmpackc.low %vm470_vm0, %vm466_vm14  ;;  %vm387_vm14 = vcmp.eq.s32.totalorder %v2980_v4, %v3436_v35  ;;  %vm323_vm4 = vcmp.eq.s32.totalorder %v2974_v2, %v3436_v35 }
  0x56   : > { %4512 = vst [vmem:[#allocation43_spill] sm:$0xff] %v3291_v49  ;;  %vm2329_vm10 = vmpackc.low %vm270_vm3, %vm266_vm2  ;;  %vm578_vm1 = vcmp.eq.s32.totalorder %v3472_v10, %v3003_v12  ;;  %vm582_vm2 = vcmp.eq.s32.totalorder %v3475_v9, %v3003_v12 }
  0x57   : > { %4513 = vst [vmem:[#allocation44_spill] sm:$0xff] %v3294_v50  ;;  %vm2345_vm13 = vmpackc.low %vm334_vm6, %vm330_vm5  ;;  %vm327_vm5 = vcmp.eq.s32.totalorder %v2977_v3, %v3436_v35 }
  0x58   : > { %4514 = vst [vmem:[#allocation45_spill] sm:$0xff] %v3297_v51  ;;  %v3430_v51 = vadd.s32 384, %v2971_v1  ;;  %2376 = vmatpush.bf16.msk.msra.mxu3 %vm2375_vm7, %v4525_v44  ;;  %2330 = vmatpush.bf16.msk.msra.mxu0 %vm2329_vm10, %v4525_v44  ;;  %vm2411_vm6 = vmpackc.low %vm391_vm15, %vm387_vm14  ;;  %vm451_vm7 = vcmp.eq.s32.totalorder %v2986_v6, %v3436_v35  ;;  %vm379_vm10 = vcmp.eq.s32.totalorder %v3009_v14, %v3436_v35  ;;  %v2648_v6 = vld [vmem:[#allocation5 + $0x40] sm:$0xf0] }
  0x59   : > { %4515 = vst [vmem:[#allocation46_spill] sm:$0xff] %v3300_v52  ;;  %v3427_v52 = vadd.s32 264, %v2971_v1  ;;  %2346 = vmatpush.bf16.msk.msra.mxu1 %vm2345_vm13, %v4525_v44 }
  0x5a   : > { %4516 = vst [vmem:[#allocation47_spill] sm:$0xff] %v3334_v56  ;;  %vm458_vm11 = vcmp.eq.s32.totalorder %v3430_v51, %v3003_v12 }
  0x5b   : > { %4517 = vst [vmem:[#allocation48_spill] sm:$0xff] %v3359_v57  ;;  %vm398_vm9 = vcmp.eq.s32.totalorder %v3427_v52, %v3003_v12  ;;  %vm2377_vm3 = vmpackc.low %vm462_vm12, %vm458_vm11  ;;  %vm383_vm11 = vcmp.eq.s32.totalorder %v3012_v15, %v3436_v35 }
  0x5c   : > { %4518 = vst [vmem:[#allocation49_spill] sm:$0xff] %v3362_v58  ;;  %v3499_v58 = vor.u32 %v2643_v18, %v2285_v19  ;;  %vm2361_vm0 = vmpackc.low %vm398_vm9, %vm394_vm8  ;;  %v3517_v18 = vadd.s32 608, %v2971_v1  ;;  %v3520_v19 = vadd.s32 616, %v2971_v1  ;;  %2378 = vmatpush.bf16.msk.msra.mxu3 %vm2377_vm3, %v4525_v44  ;;  %vm455_vm8 = vcmp.eq.s32.totalorder %v2991_v8, %v3436_v35  ;;  %v2305_v8 = vld [vmem:[#allocation5 + $0x30] sm:$0xf] }
  0x5d   : > { %4519 = vst [vmem:[#allocation50_spill] sm:$0xff] %v3365_v59  ;;  %v2641_v59 = vld [vmem:[#allocation5 + $0xc] sm:$0xf]  ;;  %2362 = vmatpush.bf16.msk.msra.mxu2 %vm2361_vm0, %v4525_v44  ;;  %vm2379_vm9 = vmpackc.low %vm582_vm2, %vm578_vm1  ;;  %vm315_vm0 = vcmp.eq.s32.totalorder %v3000_v11, %v3436_v35  ;;  %vm319_vm1 = vcmp.eq.s32.totalorder %v3006_v13, %v3436_v35  ;;  %vm443_vm3 = vcmp.eq.s32.totalorder %v3015_v16, %v3436_v35 }
  0x5e   : > { %4520 = vst [vmem:[#allocation51_spill] sm:$0xff] %v3368_v60  ;;  %v3488_v60 = vor.u32 %v2642_v36, %v2277_v20  ;;  %v3529_v20 = vor.u32 %v2641_v59, %v2287_v7  ;;  %2380 = vmatpush.bf16.msk.msrb.mxu0 %vm2379_vm9, %v4525_v44  ;;  %vm2395_vm12 = vmpackc.low %vm327_vm5, %vm323_vm4  ;;  %vm570_vm13 = vcmp.eq.s32.totalorder %v3517_v18, %v3003_v12  ;;  %v3563_v7 = vadd.s32 592, %v2971_v1  ;;  %v2297_v59 = vld [vmem:[#allocation5 + $0x28] sm:$0xf]  ;;  %v2645_v16 = vld [vmem:[#allocation5 + $0x2c] sm:$0xf] }
  0x5f   : > { %4521 = vst [vmem:[#allocation52_spill] sm:$0xff] %v3382_v61  ;;  %v3497_v61 = vor.u32 %v2640_v28, %v2279_v27  ;;  %vm574_vm14 = vcmp.eq.s32.totalorder %v3520_v19, %v3003_v12  ;;  %v3566_v27 = vadd.s32 600, %v2971_v1  ;;  %2396 = vmatpush.bf16.msk.msrb.mxu1 %vm2395_vm12, %v4525_v44  ;;  %vm2427_vm15 = vmpackc.low %vm455_vm8, %vm451_vm7  ;;  %vm447_vm4 = vcmp.eq.s32.totalorder %v3018_v17, %v3436_v35  ;;  %v2647_v17 = vld [vmem:[#allocation5 + $0x38] sm:$0xf0] }
  0x60   : > { %4522 = vst [vmem:[#allocation53_spill] sm:$0xff] %v3396_v62  ;;  %1458 = vmatmul.bf16.vlgmr.msra.gmra.mxu0 %v3488_v60  ;;  %1496 = vmatmul.bf16.vlgmr.msra.gmra.mxu2 %v3499_v58  ;;  %vm2413_vm2 = vmpackc.low %vm383_vm11, %vm379_vm10  ;;  %vm375_vm7 = vcmp.eq.s32.totalorder %v3062_v24, %v3436_v35  ;;  %vm562_vm9 = vcmp.eq.s32.totalorder %v3563_v7, %v3003_v12  ;;  %v3599_v28 = vadd.s32 576, %v2971_v1  ;;  %v3602_v36 = vadd.s32 584, %v2971_v1  ;;  %v2307_v24 = vld [vmem:[#allocation5 + $0x44] sm:$0xf0] }
  0x61   : > { %4523 = vst [vmem:[#allocation54_spill] sm:$0xff] %v3399_v63  ;;  %1477 = vmatmul.bf16.vlgmr.msra.gmra.mxu1 %v3497_v61  ;;  %2412 = vmatpush.bf16.msk.msrb.mxu2 %vm2411_vm6, %v4525_v44  ;;  %vm2381_vm5 = vmpackc.low %vm574_vm14, %vm570_vm13  ;;  %vm371_vm6 = vcmp.eq.s32.totalorder %v3059_v23, %v3436_v35  ;;  %vm566_vm10 = vcmp.eq.s32.totalorder %v3566_v27, %v3003_v12 }
  0x62   : > { %4524 = vst [vmem:[#allocation55_spill] sm:$0xff] %v3415_v0  ;;  %1515 = vmatmul.bf16.vlgmr.msra.gmra.mxu3 %v3529_v20  ;;  %2382 = vmatpush.bf16.msk.msrb.mxu0 %vm2381_vm5, %v4525_v44  ;;  %vm2397_vm8 = vmpackc.low %vm319_vm1, %vm315_vm0  ;;  %vm307_vm12 = vcmp.eq.s32.totalorder %v3048_v21, %v3436_v35  ;;  %vm311_vm13 = vcmp.eq.s32.totalorder %v3051_v22, %v3436_v35 }
  0x63   : > { %4526 = vst [vmem:[#allocation56_spill] sm:$0xff] %v3427_v52  ;;  %2428 = vmatpush.bf16.msk.msrb.mxu3 %vm2427_vm15, %v4525_v44  ;;  %2398 = vmatpush.bf16.msk.msrb.mxu1 %vm2397_vm8, %v4525_v44  ;;  %vm2429_vm11 = vmpackc.low %vm447_vm4, %vm443_vm3  ;;  %vm435_vm15 = vcmp.eq.s32.totalorder %v3087_v25, %v3436_v35  ;;  %vm439_vm0 = vcmp.eq.s32.totalorder %v3090_v26, %v3436_v35  ;;  %v2646_v25 = vld [vmem:[#allocation5 + $0x34] sm:$0xf] }
  0x64   : > { %4527 = vst [vmem:[#allocation57_spill] sm:$0xff] %v3430_v51  ;;  %vm2415_vm14 = vmpackc.low %vm375_vm7, %vm371_vm6  ;;  %vm367_vm3 = vcmp.eq.s32.totalorder %v3130_v32, %v3436_v35  ;;  %vm554_vm5 = vcmp.eq.s32.totalorder %v3599_v28, %v3003_v12  ;;  %vm558_vm6 = vcmp.eq.s32.totalorder %v3602_v36, %v3003_v12  ;;  %v3634_v51 = vadd.s32 568, %v2971_v1 }
  0x65   : > { %4528 = vst [vmem:[#allocation58_spill] sm:$0xff] %v3433_v43  ;;  %2414 = vmatpush.bf16.msk.msrb.mxu2 %vm2413_vm2, %v4525_v44  ;;  %vm2383_vm1 = vmpackc.low %vm566_vm10, %vm562_vm9  ;;  %vm363_vm2 = vcmp.eq.s32.totalorder %v3127_v31, %v3436_v35  ;;  %v3631_v43 = vadd.s32 560, %v2971_v1  ;;  %vm299_vm8 = vcmp.eq.s32.totalorder %v3110_v29, %v3436_v35  ;;  %vm303_vm9 = vcmp.eq.s32.totalorder %v3113_v30, %v3436_v35 }
  0x66   : > { %4529 = vst [vmem:[#allocation59_spill] sm:$0xff] %v3499_v58  ;;  %2384 = vmatpush.bf16.msk.msrb.mxu0 %vm2383_vm1, %v4525_v44  ;;  %vm2399_vm4 = vmpackc.low %vm311_vm13, %vm307_vm12  ;;  %vm431_vm12 = vcmp.eq.s32.totalorder %v3158_v34, %v3436_v35  ;;  %v3658_v26 = vor.u32 %v2647_v17, %v2297_v59  ;;  %v3669_v31 = vor.u32 %v2648_v6, %v2305_v8  ;;  %v3687_v6 = vadd.s32 544, %v2971_v1  ;;  %v4534_v59 = vld [vmem:[#allocation49_spill] sm:$0xff] }
  0x67   : > { %4530 = vst [vmem:[#allocation60_spill] sm:$0xff] %v3529_v20  ;;  %2430 = vmatpush.bf16.msk.msrb.mxu3 %vm2429_vm11, %v4525_v44  ;;  %v2299_v20 = vld [vmem:[#allocation5 + $0x3c] sm:$0xf0]  ;;  %2400 = vmatpush.bf16.msk.msrb.mxu1 %vm2399_vm4, %v4525_v44  ;;  %vm2431_vm7 = vmpackc.low %vm439_vm0, %vm435_vm15  ;;  %vm427_vm11 = vcmp.eq.s32.totalorder %v3155_v33, %v3436_v35  ;;  %vm359_vm15 = vcmp.eq.s32.totalorder %v3198_v40, %v3436_v35  ;;  %v3690_v8 = vadd.s32 552, %v2971_v1  ;;  %v3733_v17 = vadd.s32 528, %v2971_v1 }
  0x68   : > { %vm2417_vm10 = vmpackc.low %vm367_vm3, %vm363_vm2  ;;  %v3667_v32 = vor.u32 %v2645_v16, %v2299_v20  ;;  %4532 = vst [vmem:[#allocation62_spill] sm:$0xff] %v3669_v31  ;;  %vm546_vm1 = vcmp.eq.s32.totalorder %v3631_v43, %v3003_v12  ;;  %vm550_vm2 = vcmp.eq.s32.totalorder %v3634_v51, %v3003_v12  ;;  %v3699_v16 = vor.u32 %v2646_v25, %v2307_v24 }
  0x69   : > { %2416 = vmatpush.bf16.msk.msrb.mxu2 %vm2415_vm14, %v4525_v44  ;;  %vm2385_vm13 = vmpackc.low %vm558_vm6, %vm554_vm5  ;;  %vm355_vm14 = vcmp.eq.s32.totalorder %v3195_v39, %v3436_v35  ;;  %vm291_vm4 = vcmp.eq.s32.totalorder %v3178_v37, %v3436_v35  ;;  %vm295_vm5 = vcmp.eq.s32.totalorder %v3181_v38, %v3436_v35  ;;  %v3736_v24 = vadd.s32 536, %v2971_v1 }
  0x6a   : > { %4531 = vst [vmem:[#allocation61_spill] sm:$0xff] %v3667_v32  ;;  %2386 = vmatpush.bf16.msk.msrb.mxu0 %vm2385_vm13, %v4525_v44  ;;  %vm2401_vm0 = vmpackc.low %vm303_vm9, %vm299_vm8  ;;  %vm423_vm8 = vcmp.eq.s32.totalorder %v3226_v42, %v3436_v35  ;;  %vm538_vm13 = vcmp.eq.s32.totalorder %v3687_v6, %v3003_v12  ;;  %v3769_v25 = vadd.s32 512, %v2971_v1  ;;  %v3772_v20 = vadd.s32 520, %v2971_v1  ;;  %v4537_v42 = vld [vmem:[#allocation16_spill] sm:$0xff] }
  0x6b   : > { %2432 = vmatpush.bf16.msk.msrb.mxu3 %vm2431_vm7, %v4525_v44  ;;  %2402 = vmatpush.bf16.msk.msrb.mxu1 %vm2401_vm0, %v4525_v44  ;;  %vm2433_vm3 = vmpackc.low %vm431_vm12, %vm427_vm11  ;;  %4533 = vst [vmem:[#allocation63_spill] sm:$0xff] %v3699_v16  ;;  %vm419_vm7 = vcmp.eq.s32.totalorder %v3223_v41, %v3436_v35  ;;  %vm351_vm11 = vcmp.eq.s32.totalorder %v3266_v48, %v3436_v35  ;;  %v4547_v41 = vld [vmem:[#allocation33_spill] sm:$0xff] }
  0x6c   : > { %vm2419_vm6 = vmpackc.low %vm359_vm15, %vm355_vm14  ;;  %vm542_vm14 = vcmp.eq.s32.totalorder %v3690_v8, %v3003_v12  ;;  %vm283_vm0 = vcmp.eq.s32.totalorder %v3246_v45, %v3436_v35 }
  0x6d   : > { %2418 = vmatpush.bf16.msk.msrb.mxu2 %vm2417_vm10, %v4525_v44  ;;  %vm2387_vm9 = vmpackc.low %vm550_vm2, %vm546_vm1  ;;  %vm347_vm10 = vcmp.eq.s32.totalorder %v3263_v47, %v3436_v35  ;;  %vm287_vm1 = vcmp.eq.s32.totalorder %v3249_v46, %v3436_v35 }
  0x6e   : > { %2388 = vmatpush.bf16.msk.msrb.mxu0 %vm2387_vm9, %v4525_v44  ;;  %vm2403_vm12 = vmpackc.low %vm295_vm5, %vm291_vm4  ;;  %vm415_vm4 = vcmp.eq.s32.totalorder %v3294_v50, %v3436_v35  ;;  %vm530_vm9 = vcmp.eq.s32.totalorder %v3733_v17, %v3003_v12  ;;  %v4535_v50 = vld [vmem:[#allocation14_spill] sm:$0xff] }
  0x6f   : > { %2434 = vmatpush.bf16.msk.msrb.mxu3 %vm2433_vm3, %v4525_v44  ;;  %2404 = vmatpush.bf16.msk.msrb.mxu1 %vm2403_vm12, %v4525_v44  ;;  %vm2435_vm15 = vmpackc.low %vm423_vm8, %vm419_vm7  ;;  %vm411_vm3 = vcmp.eq.s32.totalorder %v3291_v49, %v3436_v35  ;;  %vm343_vm7 = vcmp.eq.s32.totalorder %v3334_v56, %v3436_v35  ;;  %vm275_vm12 = vcmp.eq.s32.totalorder %v3314_v53, %v3436_v35  ;;  %v3785_v49 = vperm.slane %v4535_v50, 2 }
  0x70   : > { %1463 = vmatmul.bf16.gmra.mxu0 %v3658_v26  ;;  %1501 = vmatmul.bf16.gmra.mxu2 %v3669_v31  ;;  %vm2421_vm2 = vmpackc.low %vm351_vm11, %vm347_vm10  ;;  %vm534_vm10 = vcmp.eq.s32.totalorder %v3736_v24, %v3003_v12 }
  0x71   : > { %1482 = vmatmul.bf16.gmra.mxu1 %v3667_v32  ;;  %2420 = vmatpush.bf16.msk.msrb.mxu2 %vm2419_vm6, %v4525_v44  ;;  %vm2389_vm5 = vmpackc.low %vm542_vm14, %vm538_vm13  ;;  %vm339_vm6 = vcmp.eq.s32.totalorder %v3331_v55, %v3436_v35  ;;  %vm279_vm13 = vcmp.eq.s32.totalorder %v3317_v54, %v3436_v35 }
  0x72   : > { %1520 = vmatmul.bf16.gmra.mxu3 %v3699_v16  ;;  %2390 = vmatpush.bf16.msk.msrb.mxu0 %vm2389_vm5, %v4525_v44  ;;  %vm2405_vm8 = vmpackc.low %vm287_vm1, %vm283_vm0  ;;  %vm407_vm0 = vcmp.eq.s32.totalorder %v4534_v59, %v3436_v35  ;;  %vm522_vm5 = vcmp.eq.s32.totalorder %v3769_v25, %v3003_v12  ;;  %v2293_v59 = vld [vmem:[#allocation5 + $0x10] sm:$0xf]  ;;  %v4536_v16 = vld [vmem:[#allocation52_spill] sm:$0xff] }
  0x73   : > { %2436 = vmatpush.bf16.msk.msrb.mxu3 %vm2435_vm15, %v4525_v44  ;;  %2406 = vmatpush.bf16.msk.msrb.mxu1 %vm2405_vm8, %v4525_v44  ;;  %vm2437_vm11 = vmpackc.low %vm415_vm4, %vm411_vm3  ;;  %vm403_vm15 = vcmp.eq.s32.totalorder %v3359_v57, %v3436_v35  ;;  %vm335_vm3 = vcmp.eq.s32.totalorder %v3399_v63, %v3436_v35  ;;  %v2644_v57 = vld [vmem:[#allocation5 + $0x20] sm:$0xf0]  ;;  %vm267_vm8 = vcmp.eq.s32.totalorder %v2971_v1, %v3436_v35 }
  0x74   : > { %vm2423_vm14 = vmpackc.low %vm343_vm7, %vm339_vm6  ;;  %vm526_vm6 = vcmp.eq.s32.totalorder %v3772_v20, %v3003_v12  ;;  %v3808_v12 = vor.u32 %v2644_v57, %v2293_v59  ;;  %v4539_v57 = vld [vmem:[#allocation22_spill] sm:$0xff]  ;;  %v4540_v59 = vld [vmem:[#allocation23_spill] sm:$0xff] }
  0x75   : > { %2422 = vmatpush.bf16.msk.msrb.mxu2 %vm2421_vm2, %v4525_v44  ;;  %vm2391_vm1 = vmpackc.low %vm534_vm10, %vm530_vm9  ;;  %vm331_vm2 = vcmp.eq.s32.totalorder %v3396_v62, %v3436_v35  ;;  %vm271_vm9 = vcmp.eq.s32.totalorder %v4536_v16, %v3436_v35 }
  0x76   : > { %2392 = vmatpush.bf16.msk.msrb.mxu0 %vm2391_vm1, %v4525_v44  ;;  %vm2407_vm4 = vmpackc.low %vm279_vm13, %vm275_vm12  ;;  %vm399_vm12 = vcmp.eq.s32.totalorder %v3427_v52, %v3436_v35  ;;  %vm515_vm1 = vcmp.eq.s32.totalorder %v4537_v42, %v3436_v35  ;;  %v2649_v52 = vld [vmem:[#allocation5 + $0x48] sm:$0xf0] }
  0x77   : > { %2438 = vmatpush.bf16.msk.msrb.mxu3 %vm2437_vm11, %v4525_v44  ;;  %2408 = vmatpush.bf16.msk.msrb.mxu1 %vm2407_vm4, %v4525_v44  ;;  %vm2439_vm7 = vmpackc.low %vm407_vm0, %vm403_vm15  ;;  %vm395_vm11 = vcmp.eq.s32.totalorder %v3415_v0, %v3436_v35  ;;  %vm328_vm15 = vcmp.eq.s32.totalorder %v2977_v3, %v3785_v49  ;;  %v4538_v0 = vld [vmem:[#allocation17_spill] sm:$0xff]  ;;  %vm579_vm4 = vcmp.eq.s32.totalorder %v3472_v10, %v3436_v35 }
  0x78   : > { %vm2425_vm10 = vmpackc.low %vm335_vm3, %vm331_vm2  ;;  %vm519_vm2 = vcmp.eq.s32.totalorder %v4538_v0, %v3436_v35 }
  0x79   : > { %2424 = vmatpush.bf16.msk.msrb.mxu2 %vm2423_vm14, %v4525_v44  ;;  %vm2393_vm13 = vmpackc.low %vm526_vm6, %vm522_vm5  ;;  %vm324_vm14 = vcmp.eq.s32.totalorder %v2974_v2, %v3785_v49  ;;  %vm583_vm5 = vcmp.eq.s32.totalorder %v3475_v9, %v3436_v35 }
  0x7a   : > { %2394 = vmatpush.bf16.msk.msrb.mxu0 %vm2393_vm13, %v4525_v44  ;;  %vm2409_vm0 = vmpackc.low %vm271_vm9, %vm267_vm8  ;;  %vm392_vm8 = vcmp.eq.s32.totalorder %v2983_v5, %v3785_v49  ;;  %vm507_vm13 = vcmp.eq.s32.totalorder %v4539_v57, %v3436_v35  ;;  %v4542_v5 = vld [vmem:[#allocation29_spill] sm:$0xff] }
  0x7b   : > { %2440 = vmatpush.bf16.msk.msrb.mxu3 %vm2439_vm7, %v4525_v44  ;;  %2410 = vmatpush.bf16.msk.msrb.mxu1 %vm2409_vm0, %v4525_v44  ;;  %vm2441_vm3 = vmpackc.low %vm399_vm12, %vm395_vm11  ;;  %vm388_vm7 = vcmp.eq.s32.totalorder %v2980_v4, %v3785_v49  ;;  %vm320_vm11 = vcmp.eq.s32.totalorder %v3006_v13, %v3785_v49  ;;  %vm571_vm0 = vcmp.eq.s32.totalorder %v3517_v18, %v3436_v35  ;;  %v4545_v4 = vld [vmem:[#allocation35_spill] sm:$0xff] }
  0x7c   : > { %vm2475_vm6 = vmpackc.low %vm328_vm15, %vm324_vm14  ;;  %vm511_vm14 = vcmp.eq.s32.totalorder %v4540_v59, %v3436_v35 }
  0x7d   : > { %2426 = vmatpush.bf16.msk.msrb.mxu2 %vm2425_vm10, %v4525_v44  ;;  %vm2443_vm9 = vmpackc.low %vm519_vm2, %vm515_vm1  ;;  %vm316_vm10 = vcmp.eq.s32.totalorder %v3000_v11, %v3785_v49  ;;  %vm575_vm1 = vcmp.eq.s32.totalorder %v3520_v19, %v3436_v35 }
  0x7e   : > { %vm2459_vm12 = vmpackc.low %vm583_vm5, %vm579_vm4  ;;  %2444 = vmatpush.bf16.msk.msra.mxu0 %vm2443_vm9, %v4525_v44  ;;  %vm384_vm4 = vcmp.eq.s32.totalorder %v3012_v15, %v3785_v49  ;;  %v4543_v15 = vld [vmem:[#allocation25_spill] sm:$0xff] }
  0x7f   : > { %2442 = vmatpush.bf16.msk.msrb.mxu3 %vm2441_vm3, %v4525_v44  ;;  %vm2491_vm15 = vmpackc.low %vm392_vm8, %vm388_vm7  ;;  %2460 = vmatpush.bf16.msk.msra.mxu1 %vm2459_vm12, %v4525_v44  ;;  %vm380_vm3 = vcmp.eq.s32.totalorder %v3009_v14, %v3785_v49  ;;  %vm312_vm7 = vcmp.eq.s32.totalorder %v3051_v22, %v3785_v49  ;;  %vm563_vm12 = vcmp.eq.s32.totalorder %v3563_v7, %v3436_v35  ;;  %v4544_v14 = vld [vmem:[#allocation34_spill] sm:$0xff] }
  0x80   : > { %1534 = vmatmul.bf16.vlgmr.msrb.gmra.mxu0 %v3808_v12  ;;  %1572 = vmatmul.bf16.vlgmr.msrb.gmra.mxu2 %v3497_v61  ;;  %vm2477_vm2 = vmpackc.low %vm320_vm11, %vm316_vm10  ;;  %vm503_vm10 = vcmp.eq.s32.totalorder %v4542_v5, %v3436_v35 }
  0x81   : > { %2476 = vmatpush.bf16.msk.msra.mxu2 %vm2475_vm6, %v4525_v44  ;;  %1553 = vmatmul.bf16.vlgmr.msrb.gmra.mxu1 %v3488_v60  ;;  %vm2445_vm5 = vmpackc.low %vm511_vm14, %vm507_vm13  ;;  %vm308_vm6 = vcmp.eq.s32.totalorder %v3048_v21, %v3785_v49  ;;  %vm567_vm13 = vcmp.eq.s32.totalorder %v3566_v27, %v3436_v35 }
  0x82   : > { %1591 = vmatmul.bf16.vlgmr.msrb.gmra.mxu3 %v3499_v58  ;;  %vm2461_vm8 = vmpackc.low %vm575_vm1, %vm571_vm0  ;;  %v4541_v58 = vld [vmem:[#allocation28_spill] sm:$0xff]  ;;  %2446 = vmatpush.bf16.msk.msra.mxu0 %vm2445_vm5, %v4525_v44  ;;  %vm376_vm0 = vcmp.eq.s32.totalorder %v4543_v15, %v3785_v49  ;;  %vm491_vm5 = vcmp.eq.s32.totalorder %v4544_v14, %v3436_v35 }
  0x83   : > { %2492 = vmatpush.bf16.msk.msra.mxu3 %vm2491_vm15, %v4525_v44  ;;  %vm499_vm9 = vcmp.eq.s32.totalorder %v4541_v58, %v3436_v35  ;;  %vm2493_vm11 = vmpackc.low %vm384_vm4, %vm380_vm3  ;;  %2462 = vmatpush.bf16.msk.msra.mxu1 %vm2461_vm8, %v4525_v44  ;;  %vm372_vm15 = vcmp.eq.s32.totalorder %v3059_v23, %v3785_v49  ;;  %vm304_vm3 = vcmp.eq.s32.totalorder %v3113_v30, %v3785_v49  ;;  %v2313_v23 = vld [vmem:[#allocation5 + $0x38] sm:$0xf] }
  0x84   : > { %vm2479_vm14 = vmpackc.low %vm312_vm7, %vm308_vm6  ;;  %vm495_vm6 = vcmp.eq.s32.totalorder %v4545_v4, %v3436_v35  ;;  %vm555_vm8 = vcmp.eq.s32.totalorder %v3599_v28, %v3436_v35  ;;  %v4546_v15 = vld [vmem:[#allocation32_spill] sm:$0xff]  ;;  %v3894_v30 = vor.u32 %v2649_v52, %v2313_v23  ;;  %v4550_v23 = vld [vmem:[#allocation45_spill] sm:$0xff] }
  0x85   : > { %2478 = vmatpush.bf16.msk.msra.mxu2 %vm2477_vm2, %v4525_v44  ;;  %vm2447_vm1 = vmpackc.low %vm503_vm10, %vm499_vm9  ;;  %vm300_vm2 = vcmp.eq.s32.totalorder %v3110_v29, %v3785_v49  ;;  %vm559_vm9 = vcmp.eq.s32.totalorder %v3602_v36, %v3436_v35  ;;  %v4548_v29 = vld [vmem:[#allocation39_spill] sm:$0xff]  ;;  %v4551_v52 = vld [vmem:[#allocation46_spill] sm:$0xff] }
  0x86   : > { %vm2463_vm4 = vmpackc.low %vm567_vm13, %vm563_vm12  ;;  %2448 = vmatpush.bf16.msk.msra.mxu0 %vm2447_vm1, %v4525_v44  ;;  %vm368_vm12 = vcmp.eq.s32.totalorder %v4547_v41, %v3785_v49  ;;  %vm483_vm1 = vcmp.eq.s32.totalorder %v4548_v29, %v3436_v35 }
  0x87   : > { %2494 = vmatpush.bf16.msk.msra.mxu3 %vm2493_vm11, %v4525_v44  ;;  %vm2495_vm7 = vmpackc.low %vm376_vm0, %vm372_vm15  ;;  %2464 = vmatpush.bf16.msk.msra.mxu1 %vm2463_vm4, %v4525_v44  ;;  %vm364_vm11 = vcmp.eq.s32.totalorder %v4546_v15, %v3785_v49  ;;  %vm296_vm15 = vcmp.eq.s32.totalorder %v3181_v38, %v3785_v49  ;;  %v4549_v15 = vld [vmem:[#allocation40_spill] sm:$0xff]  ;;  %vm547_vm4 = vcmp.eq.s32.totalorder %v3631_v43, %v3436_v35 }
  0x88   : > { %vm2481_vm10 = vmpackc.low %vm304_vm3, %vm300_vm2  ;;  %vm487_vm2 = vcmp.eq.s32.totalorder %v4549_v15, %v3436_v35 }
  0x89   : > { %2480 = vmatpush.bf16.msk.msra.mxu2 %vm2479_vm14, %v4525_v44  ;;  %vm2449_vm13 = vmpackc.low %vm495_vm6, %vm491_vm5  ;;  %vm292_vm14 = vcmp.eq.s32.totalorder %v3178_v37, %v3785_v49  ;;  %vm551_vm5 = vcmp.eq.s32.totalorder %v3634_v51, %v3436_v35 }
  0x8a   : > { %vm2465_vm0 = vmpackc.low %vm559_vm9, %vm555_vm8  ;;  %2450 = vmatpush.bf16.msk.msra.mxu0 %vm2449_vm13, %v4525_v44  ;;  %vm360_vm8 = vcmp.eq.s32.totalorder %v3198_v40, %v3785_v49  ;;  %vm475_vm13 = vcmp.eq.s32.totalorder %v4550_v23, %v3436_v35  ;;  %v4553_v40 = vld [vmem:[#allocation51_spill] sm:$0xff] }
  0x8b   : > { %2496 = vmatpush.bf16.msk.msra.mxu3 %vm2495_vm7, %v4525_v44  ;;  %vm2497_vm3 = vmpackc.low %vm368_vm12, %vm364_vm11  ;;  %2466 = vmatpush.bf16.msk.msra.mxu1 %vm2465_vm0, %v4525_v44  ;;  %vm356_vm7 = vcmp.eq.s32.totalorder %v3195_v39, %v3785_v49  ;;  %vm288_vm11 = vcmp.eq.s32.totalorder %v3249_v46, %v3785_v49  ;;  %vm539_vm0 = vcmp.eq.s32.totalorder %v3687_v6, %v3436_v35 }
  0x8c   : > { %vm2483_vm6 = vmpackc.low %vm296_vm15, %vm292_vm14  ;;  %vm479_vm14 = vcmp.eq.s32.totalorder %v4551_v52, %v3436_v35 }
  0x8d   : > { %2482 = vmatpush.bf16.msk.msra.mxu2 %vm2481_vm10, %v4525_v44  ;;  %vm2451_vm9 = vmpackc.low %vm487_vm2, %vm483_vm1  ;;  %vm284_vm10 = vcmp.eq.s32.totalorder %v3246_v45, %v3785_v49  ;;  %vm543_vm1 = vcmp.eq.s32.totalorder %v3690_v8, %v3436_v35 }
  0x8e   : > { %vm2467_vm12 = vmpackc.low %vm551_vm5, %vm547_vm4  ;;  %2452 = vmatpush.bf16.msk.msra.mxu0 %vm2451_vm9, %v4525_v44  ;;  %vm352_vm4 = vcmp.eq.s32.totalorder %v3266_v48, %v3785_v49  ;;  %v4554_v48 = vld [vmem:[#allocation57_spill] sm:$0xff] }
  0x8f   : > { %2498 = vmatpush.bf16.msk.msra.mxu3 %vm2497_vm3, %v4525_v44  ;;  %vm2499_vm15 = vmpackc.low %vm360_vm8, %vm356_vm7  ;;  %2468 = vmatpush.bf16.msk.msra.mxu1 %vm2467_vm12, %v4525_v44  ;;  %vm348_vm3 = vcmp.eq.s32.totalorder %v3263_v47, %v3785_v49  ;;  %vm280_vm7 = vcmp.eq.s32.totalorder %v3317_v54, %v3785_v49  ;;  %vm531_vm12 = vcmp.eq.s32.totalorder %v3733_v17, %v3436_v35  ;;  %v4555_v47 = vld [vmem:[#allocation58_spill] sm:$0xff] }
  0x90   : > { %1539 = vmatmul.bf16.gmra.mxu0 %v3894_v30  ;;  %1577 = vmatmul.bf16.gmra.mxu2 %v3667_v32  ;;  %vm2485_vm2 = vmpackc.low %vm288_vm11, %vm284_vm10  ;;  %vm471_vm10 = vcmp.eq.s32.totalorder %v4553_v40, %v3436_v35 }
  0x91   : > { %2484 = vmatpush.bf16.msk.msra.mxu2 %vm2483_vm6, %v4525_v44  ;;  %1558 = vmatmul.bf16.gmra.mxu1 %v3658_v26  ;;  %vm2453_vm5 = vmpackc.low %vm479_vm14, %vm475_vm13  ;;  %vm276_vm6 = vcmp.eq.s32.totalorder %v3314_v53, %v3785_v49  ;;  %vm535_vm13 = vcmp.eq.s32.totalorder %v3736_v24, %v3436_v35 }
  0x92   : > { %1596 = vmatmul.bf16.gmra.mxu3 %v3669_v31  ;;  %vm2469_vm8 = vmpackc.low %vm543_vm1, %vm539_vm0  ;;  %v4552_v31 = vld [vmem:[#allocation50_spill] sm:$0xff]  ;;  %2454 = vmatpush.bf16.msk.msra.mxu0 %vm2453_vm5, %v4525_v44  ;;  %vm344_vm0 = vcmp.eq.s32.totalorder %v3334_v56, %v3785_v49  ;;  %vm459_vm5 = vcmp.eq.s32.totalorder %v4554_v48, %v3436_v35  ;;  %v3974_v56 = vperm.slane %v4535_v50, 3  ;;  %v4557_v50 = vld [vmem:[#allocation15_spill] sm:$0xff] }
  0x93   : > { %2500 = vmatpush.bf16.msk.msra.mxu3 %vm2499_vm15, %v4525_v44  ;;  %vm467_vm9 = vcmp.eq.s32.totalorder %v4552_v31, %v3436_v35  ;;  %vm2501_vm11 = vmpackc.low %vm352_vm4, %vm348_vm3  ;;  %2470 = vmatpush.bf16.msk.msra.mxu1 %vm2469_vm8, %v4525_v44  ;;  %vm340_vm15 = vcmp.eq.s32.totalorder %v3331_v55, %v3785_v49  ;;  %vm272_vm3 = vcmp.eq.s32.totalorder %v4536_v16, %v3785_v49 }
  0x94   : > { %vm2487_vm14 = vmpackc.low %vm280_vm7, %vm276_vm6  ;;  %vm463_vm6 = vcmp.eq.s32.totalorder %v4555_v47, %v3436_v35  ;;  %vm523_vm8 = vcmp.eq.s32.totalorder %v3769_v25, %v3436_v35 }
  0x95   : > { %2486 = vmatpush.bf16.msk.msra.mxu2 %vm2485_vm2, %v4525_v44  ;;  %vm2455_vm1 = vmpackc.low %vm471_vm10, %vm467_vm9  ;;  %vm268_vm2 = vcmp.eq.s32.totalorder %v2971_v1, %v3785_v49  ;;  %vm527_vm9 = vcmp.eq.s32.totalorder %v3772_v20, %v3436_v35  ;;  %v4556_v35 = vld [vmem:[#allocation13_spill] sm:$0xff] }
  0x96   : > { %vm2471_vm4 = vmpackc.low %vm535_vm13, %vm531_vm12  ;;  %2456 = vmatpush.bf16.msk.msra.mxu0 %vm2455_vm1, %v4525_v44  ;;  %vm336_vm12 = vcmp.eq.s32.totalorder %v3399_v63, %v3785_v49  ;;  %vm452_vm1 = vcmp.eq.s32.totalorder %v4556_v35, %v3785_v49  ;;  %v4558_v63 = vld [vmem:[#allocation60_spill] sm:$0xff] }
  0x97   : > { %2502 = vmatpush.bf16.msk.msra.mxu3 %vm2501_vm11, %v4525_v44  ;;  %vm2503_vm7 = vmpackc.low %vm344_vm0, %vm340_vm15  ;;  %2472 = vmatpush.bf16.msk.msra.mxu1 %vm2471_vm4, %v4525_v44  ;;  %vm332_vm11 = vcmp.eq.s32.totalorder %v3396_v62, %v3785_v49  ;;  %vm584_vm15 = vcmp.eq.s32.totalorder %v3475_v9, %v3785_v49  ;;  %vm516_vm4 = vcmp.eq.s32.totalorder %v4537_v42, %v3785_v49  ;;  %v4559_v62 = vld [vmem:[#allocation20_spill] sm:$0xff] }
  0x98   : > { %vm2489_vm10 = vmpackc.low %vm272_vm3, %vm268_vm2  ;;  %vm456_vm2 = vcmp.eq.s32.totalorder %v4557_v50, %v3785_v49 }
  0x99   : > { %2488 = vmatpush.bf16.msk.msra.mxu2 %vm2487_vm14, %v4525_v44  ;;  %vm2457_vm13 = vmpackc.low %vm463_vm6, %vm459_vm5  ;;  %vm580_vm14 = vcmp.eq.s32.totalorder %v3472_v10, %v3785_v49  ;;  %vm520_vm5 = vcmp.eq.s32.totalorder %v4538_v0, %v3785_v49 }
  0x9a   : > { %vm2473_vm0 = vmpackc.low %vm527_vm9, %vm523_vm8  ;;  %2458 = vmatpush.bf16.msk.msra.mxu0 %vm2457_vm13, %v4525_v44  ;;  %vm329_vm8 = vcmp.eq.s32.totalorder %v2977_v3, %v3974_v56  ;;  %vm444_vm13 = vcmp.eq.s32.totalorder %v4559_v62, %v3785_v49  ;;  %v4561_v3 = vld [vmem:[#allocation26_spill] sm:$0xff] }
  0x9b   : > { %2504 = vmatpush.bf16.msk.msra.mxu3 %vm2503_vm7, %v4525_v44  ;;  %vm2505_vm3 = vmpackc.low %vm336_vm12, %vm332_vm11  ;;  %2474 = vmatpush.bf16.msk.msra.mxu1 %vm2473_vm0, %v4525_v44  ;;  %vm325_vm7 = vcmp.eq.s32.totalorder %v2974_v2, %v3974_v56  ;;  %vm576_vm11 = vcmp.eq.s32.totalorder %v3520_v19, %v3785_v49  ;;  %v4560_v2 = vld [vmem:[#allocation21_spill] sm:$0xff]  ;;  %vm508_vm0 = vcmp.eq.s32.totalorder %v4539_v57, %v3785_v49 }
  0x9c   : > { %vm2539_vm6 = vmpackc.low %vm584_vm15, %vm580_vm14  ;;  %vm448_vm14 = vcmp.eq.s32.totalorder %v4560_v2, %v3785_v49 }
  0x9d   : > { %2490 = vmatpush.bf16.msk.msra.mxu2 %vm2489_vm10, %v4525_v44  ;;  %vm2507_vm9 = vmpackc.low %vm456_vm2, %vm452_vm1  ;;  %vm572_vm10 = vcmp.eq.s32.totalorder %v3517_v18, %v3785_v49  ;;  %vm512_vm1 = vcmp.eq.s32.totalorder %v4540_v59, %v3785_v49 }
  0x9e   : > { %vm2523_vm12 = vmpackc.low %vm520_vm5, %vm516_vm4  ;;  %2508 = vmatpush.bf16.msk.msrb.mxu0 %vm2507_vm9, %v4525_v44  ;;  %vm321_vm4 = vcmp.eq.s32.totalorder %v3006_v13, %v3974_v56  ;;  %vm436_vm9 = vcmp.eq.s32.totalorder %v4561_v3, %v3785_v49  ;;  %v4563_v13 = vld [vmem:[#allocation30_spill] sm:$0xff] }
  0x9f   : > { %2506 = vmatpush.bf16.msk.msra.mxu3 %vm2505_vm3, %v4525_v44  ;;  %vm2555_vm15 = vmpackc.low %vm329_vm8, %vm325_vm7  ;;  %2524 = vmatpush.bf16.msk.msrb.mxu1 %vm2523_vm12, %v4525_v44  ;;  %vm317_vm3 = vcmp.eq.s32.totalorder %v3000_v11, %v3974_v56  ;;  %vm568_vm7 = vcmp.eq.s32.totalorder %v3566_v27, %v3785_v49  ;;  %v4562_v11 = vld [vmem:[#allocation27_spill] sm:$0xff]  ;;  %vm500_vm12 = vcmp.eq.s32.totalorder %v4541_v58, %v3785_v49 }
  0xa0   : > { %1610 = vmatmul.bf16.vlgmr.msra.gmra.mxu0 %v4558_v63  ;;  %1648 = vmatmul.bf16.vlgmr.msra.gmra.mxu2 %v3488_v60  ;;  %vm2541_vm2 = vmpackc.low %vm576_vm11, %vm572_vm10  ;;  %vm440_vm10 = vcmp.eq.s32.totalorder %v4562_v11, %v3785_v49 }
  0xa1   : > { %2540 = vmatpush.bf16.msk.msrb.mxu2 %vm2539_vm6, %v4525_v44  ;;  %1629 = vmatmul.bf16.vlgmr.msra.gmra.mxu1 %v3808_v12  ;;  %vm2509_vm5 = vmpackc.low %vm448_vm14, %vm444_vm13  ;;  %vm564_vm6 = vcmp.eq.s32.totalorder %v3563_v7, %v3785_v49  ;;  %vm504_vm13 = vcmp.eq.s32.totalorder %v4542_v5, %v3785_v49 }
  0xa2   : > { %1667 = vmatmul.bf16.vlgmr.msra.gmra.mxu3 %v3497_v61  ;;  %vm2525_vm8 = vmpackc.low %vm512_vm1, %vm508_vm0  ;;  %2510 = vmatpush.bf16.msk.msrb.mxu0 %vm2509_vm5, %v4525_v44  ;;  %vm313_vm0 = vcmp.eq.s32.totalorder %v3051_v22, %v3974_v56  ;;  %vm428_vm5 = vcmp.eq.s32.totalorder %v3155_v33, %v3785_v49  ;;  %v4565_v22 = vld [vmem:[#allocation37_spill] sm:$0xff] }
  0xa3   : > { %2556 = vmatpush.bf16.msk.msrb.mxu3 %vm2555_vm15, %v4525_v44  ;;  %vm2557_vm11 = vmpackc.low %vm321_vm4, %vm317_vm3  ;;  %2526 = vmatpush.bf16.msk.msrb.mxu1 %vm2525_vm8, %v4525_v44  ;;  %vm309_vm15 = vcmp.eq.s32.totalorder %v3048_v21, %v3974_v56  ;;  %vm560_vm3 = vcmp.eq.s32.totalorder %v3602_v36, %v3785_v49  ;;  %vm492_vm8 = vcmp.eq.s32.totalorder %v4544_v14, %v3785_v49  ;;  %v4564_v21 = vld [vmem:[#allocation31_spill] sm:$0xff] }
  0xa4   : > { %vm2543_vm14 = vmpackc.low %vm568_vm7, %vm564_vm6  ;;  %vm432_vm6 = vcmp.eq.s32.totalorder %v3158_v34, %v3785_v49 }
  0xa5   : > { %2542 = vmatpush.bf16.msk.msrb.mxu2 %vm2541_vm2, %v4525_v44  ;;  %vm2511_vm1 = vmpackc.low %vm440_vm10, %vm436_vm9  ;;  %vm556_vm2 = vcmp.eq.s32.totalorder %v3599_v28, %v3785_v49  ;;  %vm496_vm9 = vcmp.eq.s32.totalorder %v4545_v4, %v3785_v49 }
  0xa6   : > { %vm2527_vm4 = vmpackc.low %vm504_vm13, %vm500_vm12  ;;  %2512 = vmatpush.bf16.msk.msrb.mxu0 %vm2511_vm1, %v4525_v44  ;;  %vm305_vm12 = vcmp.eq.s32.totalorder %v4564_v21, %v3974_v56  ;;  %vm420_vm1 = vcmp.eq.s32.totalorder %v4565_v22, %v3785_v49  ;;  %v4567_v21 = vld [vmem:[#allocation63_spill] sm:$0xff] }
  0xa7   : > { %2558 = vmatpush.bf16.msk.msrb.mxu3 %vm2557_vm11, %v4525_v44  ;;  %vm2559_vm7 = vmpackc.low %vm313_vm0, %vm309_vm15  ;;  %2528 = vmatpush.bf16.msk.msrb.mxu1 %vm2527_vm4, %v4525_v44  ;;  %vm301_vm11 = vcmp.eq.s32.totalorder %v4563_v13, %v3974_v56  ;;  %vm552_vm15 = vcmp.eq.s32.totalorder %v3634_v51, %v3785_v49  ;;  %v4566_v13 = vld [vmem:[#allocation38_spill] sm:$0xff]  ;;  %vm484_vm4 = vcmp.eq.s32.totalorder %v4548_v29, %v3785_v49 }
  0xa8   : > { %vm2545_vm10 = vmpackc.low %vm560_vm3, %vm556_vm2  ;;  %vm424_vm2 = vcmp.eq.s32.totalorder %v4566_v13, %v3785_v49 }
  0xa9   : > { %2544 = vmatpush.bf16.msk.msrb.mxu2 %vm2543_vm14, %v4525_v44  ;;  %vm2513_vm13 = vmpackc.low %vm432_vm6, %vm428_vm5  ;;  %vm548_vm14 = vcmp.eq.s32.totalorder %v3631_v43, %v3785_v49  ;;  %vm488_vm5 = vcmp.eq.s32.totalorder %v4549_v15, %v3785_v49 }
  0xaa   : > { %vm2529_vm0 = vmpackc.low %vm496_vm9, %vm492_vm8  ;;  %2514 = vmatpush.bf16.msk.msrb.mxu0 %vm2513_vm13, %v4525_v44  ;;  %vm297_vm8 = vcmp.eq.s32.totalorder %v3181_v38, %v3974_v56  ;;  %v4569_v38 = vld [vmem:[#allocation44_spill] sm:$0xff] }
  0xab   : > { %2560 = vmatpush.bf16.msk.msrb.mxu3 %vm2559_vm7, %v4525_v44  ;;  %vm2561_vm3 = vmpackc.low %vm305_vm12, %vm301_vm11  ;;  %2530 = vmatpush.bf16.msk.msrb.mxu1 %vm2529_vm0, %v4525_v44  ;;  %vm293_vm7 = vcmp.eq.s32.totalorder %v3178_v37, %v3974_v56  ;;  %vm544_vm11 = vcmp.eq.s32.totalorder %v3690_v8, %v3785_v49  ;;  %v4568_v37 = vld [vmem:[#allocation43_spill] sm:$0xff]  ;;  %vm476_vm0 = vcmp.eq.s32.totalorder %v4550_v23, %v3785_v49 }
  0xac   : > { %vm2547_vm6 = vmpackc.low %vm552_vm15, %vm548_vm14  ;;  %vm412_vm13 = vcmp.eq.s32.totalorder %v4568_v37, %v3785_v49  ;;  %vm416_vm14 = vcmp.eq.s32.totalorder %v4569_v38, %v3785_v49 }
  0xad   : > { %2546 = vmatpush.bf16.msk.msrb.mxu2 %vm2545_vm10, %v4525_v44  ;;  %vm2515_vm9 = vmpackc.low %vm424_vm2, %vm420_vm1  ;;  %vm540_vm10 = vcmp.eq.s32.totalorder %v3687_v6, %v3785_v49  ;;  %vm480_vm1 = vcmp.eq.s32.totalorder %v4551_v52, %v3785_v49 }
  0xae   : > { %vm2531_vm12 = vmpackc.low %vm488_vm5, %vm484_vm4  ;;  %2516 = vmatpush.bf16.msk.msrb.mxu0 %vm2515_vm9, %v4525_v44  ;;  %vm289_vm4 = vcmp.eq.s32.totalorder %v3249_v46, %v3974_v56  ;;  %v4572_v46 = vld [vmem:[#allocation55_spill] sm:$0xff] }
  0xaf   : > { %2562 = vmatpush.bf16.msk.msrb.mxu3 %vm2561_vm3, %v4525_v44  ;;  %vm2563_vm15 = vmpackc.low %vm297_vm8, %vm293_vm7  ;;  %2532 = vmatpush.bf16.msk.msrb.mxu1 %vm2531_vm12, %v4525_v44  ;;  %vm285_vm3 = vcmp.eq.s32.totalorder %v3246_v45, %v3974_v56  ;;  %vm536_vm7 = vcmp.eq.s32.totalorder %v3736_v24, %v3785_v49  ;;  %v4571_v45 = vld [vmem:[#allocation49_spill] sm:$0xff]  ;;  %vm468_vm12 = vcmp.eq.s32.totalorder %v4552_v31, %v3785_v49 }
  0xb0   : > { %1615 = vmatmul.bf16.gmra.mxu0 %v4567_v21  ;;  %1653 = vmatmul.bf16.gmra.mxu2 %v3658_v26  ;;  %vm2549_vm2 = vmpackc.low %vm544_vm11, %vm540_vm10  ;;  %vm408_vm10 = vcmp.eq.s32.totalorder %v4571_v45, %v3785_v49 }
  0xb1   : > { %2548 = vmatpush.bf16.msk.msrb.mxu2 %vm2547_vm6, %v4525_v44  ;;  %1634 = vmatmul.bf16.gmra.mxu1 %v3894_v30  ;;  %vm2517_vm5 = vmpackc.low %vm416_vm14, %vm412_vm13  ;;  %vm532_vm6 = vcmp.eq.s32.totalorder %v3733_v17, %v3785_v49  ;;  %vm472_vm13 = vcmp.eq.s32.totalorder %v4553_v40, %v3785_v49 }
  0xb2   : > { %1672 = vmatmul.bf16.gmra.mxu3 %v3667_v32  ;;  %vm2533_vm8 = vmpackc.low %vm480_vm1, %vm476_vm0  ;;  %v4570_v32 = vld [vmem:[#allocation48_spill] sm:$0xff]  ;;  %2518 = vmatpush.bf16.msk.msrb.mxu0 %vm2517_vm5, %v4525_v44  ;;  %vm281_vm0 = vcmp.eq.s32.totalorder %v3317_v54, %v3974_v56  ;;  %vm396_vm5 = vcmp.eq.s32.totalorder %v4572_v46, %v3785_v49 }
  0xb3   : > { %2564 = vmatpush.bf16.msk.msrb.mxu3 %vm2563_vm15, %v4525_v44  ;;  %vm404_vm9 = vcmp.eq.s32.totalorder %v4570_v32, %v3785_v49  ;;  %vm2565_vm11 = vmpackc.low %vm289_vm4, %vm285_vm3  ;;  %2534 = vmatpush.bf16.msk.msrb.mxu1 %vm2533_vm8, %v4525_v44  ;;  %vm277_vm15 = vcmp.eq.s32.totalorder %v3314_v53, %v3974_v56  ;;  %vm528_vm3 = vcmp.eq.s32.totalorder %v3772_v20, %v3785_v49  ;;  %v4573_v53 = vld [vmem:[#allocation56_spill] sm:$0xff] }
  0xb4   : > { %vm2551_vm14 = vmpackc.low %vm536_vm7, %vm532_vm6  ;;  %vm400_vm6 = vcmp.eq.s32.totalorder %v4573_v53, %v3785_v49  ;;  %vm460_vm8 = vcmp.eq.s32.totalorder %v4554_v48, %v3785_v49  ;;  %v4579_v54 = vld [vmem:[#allocation24_spill] sm:$0xff] }
  0xb5   : > { %2550 = vmatpush.bf16.msk.msrb.mxu2 %vm2549_vm2, %v4525_v44  ;;  %vm2519_vm1 = vmpackc.low %vm408_vm10, %vm404_vm9  ;;  %vm524_vm2 = vcmp.eq.s32.totalorder %v3769_v25, %v3785_v49  ;;  %vm464_vm9 = vcmp.eq.s32.totalorder %v4555_v47, %v3785_v49  ;;  %v4574_v49 = vld [vmem:[#allocation11_spill] sm:$0xff] }
  0xb6   : > { %vm2535_vm4 = vmpackc.low %vm472_vm13, %vm468_vm12  ;;  %2520 = vmatpush.bf16.msk.msrb.mxu0 %vm2519_vm1, %v4525_v44  ;;  %vm273_vm12 = vcmp.eq.s32.totalorder %v4536_v16, %v3974_v56  ;;  %vm389_vm1 = vcmp.eq.s32.totalorder %v4574_v49, %v3974_v56 }
  0xb7   : > { %2566 = vmatpush.bf16.msk.msrb.mxu3 %vm2565_vm11, %v4525_v44  ;;  %vm2567_vm7 = vmpackc.low %vm281_vm0, %vm277_vm15  ;;  %2536 = vmatpush.bf16.msk.msrb.mxu1 %vm2535_vm4, %v4525_v44  ;;  %vm269_vm11 = vcmp.eq.s32.totalorder %v2971_v1, %v3974_v56  ;;  %vm521_vm15 = vcmp.eq.s32.totalorder %v4538_v0, %v3974_v56  ;;  %v4575_v1 = vld [vmem:[#allocation12_spill] sm:$0xff]  ;;  %vm453_vm4 = vcmp.eq.s32.totalorder %v4556_v35, %v3974_v56 }
  0xb8   : > { %vm2553_vm10 = vmpackc.low %vm528_vm3, %vm524_vm2  ;;  %vm393_vm2 = vcmp.eq.s32.totalorder %v4575_v1, %v3974_v56 }
  0xb9   : > { %2552 = vmatpush.bf16.msk.msrb.mxu2 %vm2551_vm14, %v4525_v44  ;;  %vm2521_vm13 = vmpackc.low %vm400_vm6, %vm396_vm5  ;;  %vm517_vm14 = vcmp.eq.s32.totalorder %v4537_v42, %v3974_v56  ;;  %vm457_vm5 = vcmp.eq.s32.totalorder %v4557_v50, %v3974_v56  ;;  %v4578_v42 = vld [vmem:[#allocation59_spill] sm:$0xff] }
  0xba   : > { %vm2537_vm0 = vmpackc.low %vm464_vm9, %vm460_vm8  ;;  %2522 = vmatpush.bf16.msk.msrb.mxu0 %vm2521_vm13, %v4525_v44  ;;  %vm585_vm8 = vcmp.eq.s32.totalorder %v3475_v9, %v3974_v56  ;;  %v4577_v9 = vld [vmem:[#allocation19_spill] sm:$0xff] }
  0xbb   : > { %2568 = vmatpush.bf16.msk.msrb.mxu3 %vm2567_vm7, %v4525_v44  ;;  %vm2569_vm3 = vmpackc.low %vm273_vm12, %vm269_vm11  ;;  %2538 = vmatpush.bf16.msk.msrb.mxu1 %vm2537_vm0, %v4525_v44  ;;  %vm581_vm7 = vcmp.eq.s32.totalorder %v3472_v10, %v3974_v56  ;;  %vm513_vm11 = vcmp.eq.s32.totalorder %v4540_v59, %v3974_v56  ;;  %v4576_v10 = vld [vmem:[#allocation18_spill] sm:$0xff]  ;;  %vm445_vm0 = vcmp.eq.s32.totalorder %v4559_v62, %v3974_v56 }
  0xbc   : > { %vm2603_vm6 = vmpackc.low %vm521_vm15, %vm517_vm14  ;;  %vm381_vm13 = vcmp.eq.s32.totalorder %v4576_v10, %v3974_v56  ;;  %vm385_vm14 = vcmp.eq.s32.totalorder %v4577_v9, %v3974_v56 }
  0xbd   : > { %2554 = vmatpush.bf16.msk.msrb.mxu2 %vm2553_vm10, %v4525_v44  ;;  %vm2571_vm9 = vmpackc.low %vm393_vm2, %vm389_vm1  ;;  %vm509_vm10 = vcmp.eq.s32.totalorder %v4539_v57, %v3974_v56  ;;  %vm449_vm1 = vcmp.eq.s32.totalorder %v4560_v2, %v3974_v56 }
  0xbe   : > { %2572 = vmatpush.bf16.msk.msra.mxu0 %vm2571_vm9, %v4525_v44  ;;  %vm2587_vm12 = vmpackc.low %vm457_vm5, %vm453_vm4  ;;  %vm577_vm4 = vcmp.eq.s32.totalorder %v3520_v19, %v3974_v56  ;;  %vm373_vm9 = vcmp.eq.s32.totalorder %v4579_v54, %v3974_v56 }
  0xbf   : > { %2570 = vmatpush.bf16.msk.msrb.mxu3 %vm2569_vm3, %v4525_v44  ;;  %vm2619_vm15 = vmpackc.low %vm585_vm8, %vm581_vm7  ;;  %2588 = vmatpush.bf16.msk.msra.mxu1 %vm2587_vm12, %v4525_v44  ;;  %vm573_vm3 = vcmp.eq.s32.totalorder %v3517_v18, %v3974_v56  ;;  %vm505_vm7 = vcmp.eq.s32.totalorder %v4542_v5, %v3974_v56  ;;  %vm437_vm12 = vcmp.eq.s32.totalorder %v4561_v3, %v3974_v56  ;;  %v4581_v5 = vld [vmem:[#allocation32_spill] sm:$0xff] }
  0xc0   : > { %1724 = vmatmul.bf16.vlgmr.msrb.gmra.mxu2 %v3808_v12  ;;  %1686 = vmatmul.bf16.vlgmr.msrb.gmra.mxu0 %v4578_v42  ;;  %vm2605_vm2 = vmpackc.low %vm513_vm11, %vm509_vm10 }
  0xc1   : > { %2604 = vmatpush.bf16.msk.msra.mxu2 %vm2603_vm6, %v4525_v44  ;;  %1705 = vmatmul.bf16.vlgmr.msrb.gmra.mxu1 %v4558_v63  ;;  %vm2573_vm5 = vmpackc.low %vm385_vm14, %vm381_vm13  ;;  %vm501_vm6 = vcmp.eq.s32.totalorder %v4541_v58, %v3974_v56  ;;  %vm441_vm13 = vcmp.eq.s32.totalorder %v4562_v11, %v3974_v56 }
  0xc2   : > { %1743 = vmatmul.bf16.vlgmr.msrb.gmra.mxu3 %v3488_v60  ;;  %2574 = vmatpush.bf16.msk.msra.mxu0 %vm2573_vm5, %v4525_v44  ;;  %vm2589_vm8 = vmpackc.low %vm449_vm1, %vm445_vm0  ;;  %v4580_v60 = vld [vmem:[#allocation25_spill] sm:$0xff]  ;;  %vm569_vm0 = vcmp.eq.s32.totalorder %v3566_v27, %v3974_v56  ;;  %vm365_vm5 = vcmp.eq.s32.totalorder %v4581_v5, %v3974_v56 }
  0xc3   : > { %2620 = vmatpush.bf16.msk.msra.mxu3 %vm2619_vm15, %v4525_v44  ;;  %vm377_vm10 = vcmp.eq.s32.totalorder %v4580_v60, %v3974_v56  ;;  %vm2621_vm11 = vmpackc.low %vm577_vm4, %vm573_vm3  ;;  %2590 = vmatpush.bf16.msk.msra.mxu1 %vm2589_vm8, %v4525_v44  ;;  %vm565_vm15 = vcmp.eq.s32.totalorder %v3563_v7, %v3974_v56  ;;  %vm497_vm3 = vcmp.eq.s32.totalorder %v4545_v4, %v3974_v56  ;;  %v4582_v4 = vld [vmem:[#allocation36_spill] sm:$0xff] }
  0xc4   : > { %vm2607_vm14 = vmpackc.low %vm505_vm7, %vm501_vm6  ;;  %vm369_vm6 = vcmp.eq.s32.totalorder %v4547_v41, %v3974_v56  ;;  %vm429_vm8 = vcmp.eq.s32.totalorder %v3155_v33, %v3974_v56 }
  0xc5   : > { %2606 = vmatpush.bf16.msk.msra.mxu2 %vm2605_vm2, %v4525_v44  ;;  %vm2575_vm1 = vmpackc.low %vm377_vm10, %vm373_vm9  ;;  %vm493_vm2 = vcmp.eq.s32.totalorder %v4544_v14, %v3974_v56  ;;  %vm433_vm9 = vcmp.eq.s32.totalorder %v3158_v34, %v3974_v56  ;;  %v4583_v14 = vld [vmem:[#allocation41_spill] sm:$0xff] }
  0xc6   : > { %2576 = vmatpush.bf16.msk.msra.mxu0 %vm2575_vm1, %v4525_v44  ;;  %vm2591_vm4 = vmpackc.low %vm441_vm13, %vm437_vm12  ;;  %vm561_vm12 = vcmp.eq.s32.totalorder %v3602_v36, %v3974_v56  ;;  %vm357_vm1 = vcmp.eq.s32.totalorder %v3195_v39, %v3974_v56 }
  0xc7   : > { %2622 = vmatpush.bf16.msk.msra.mxu3 %vm2621_vm11, %v4525_v44  ;;  %vm2623_vm7 = vmpackc.low %vm569_vm0, %vm565_vm15  ;;  %2592 = vmatpush.bf16.msk.msra.mxu1 %vm2591_vm4, %v4525_v44  ;;  %vm557_vm11 = vcmp.eq.s32.totalorder %v3599_v28, %v3974_v56  ;;  %vm489_vm15 = vcmp.eq.s32.totalorder %v4549_v15, %v3974_v56  ;;  %vm421_vm4 = vcmp.eq.s32.totalorder %v4565_v22, %v3974_v56  ;;  %v4584_v15 = vld [vmem:[#allocation42_spill] sm:$0xff] }
  0xc8   : > { %vm2609_vm10 = vmpackc.low %vm497_vm3, %vm493_vm2  ;;  %vm361_vm2 = vcmp.eq.s32.totalorder %v4582_v4, %v3974_v56 }
  0xc9   : > { %2608 = vmatpush.bf16.msk.msra.mxu2 %vm2607_vm14, %v4525_v44  ;;  %vm2577_vm13 = vmpackc.low %vm369_vm6, %vm365_vm5  ;;  %vm485_vm14 = vcmp.eq.s32.totalorder %v4548_v29, %v3974_v56  ;;  %vm425_vm5 = vcmp.eq.s32.totalorder %v4566_v13, %v3974_v56  ;;  %v4585_v29 = vld [vmem:[#allocation62_spill] sm:$0xff] }
  0xca   : > { %2578 = vmatpush.bf16.msk.msra.mxu0 %vm2577_vm13, %v4525_v44  ;;  %vm2593_vm0 = vmpackc.low %vm433_vm9, %vm429_vm8  ;;  %vm553_vm8 = vcmp.eq.s32.totalorder %v3634_v51, %v3974_v56  ;;  %vm349_vm13 = vcmp.eq.s32.totalorder %v4583_v14, %v3974_v56 }
  0xcb   : > { %2624 = vmatpush.bf16.msk.msra.mxu3 %vm2623_vm7, %v4525_v44  ;;  %vm2625_vm3 = vmpackc.low %vm561_vm12, %vm557_vm11  ;;  %2594 = vmatpush.bf16.msk.msra.mxu1 %vm2593_vm0, %v4525_v44  ;;  %vm549_vm7 = vcmp.eq.s32.totalorder %v3631_v43, %v3974_v56  ;;  %vm481_vm11 = vcmp.eq.s32.totalorder %v4551_v52, %v3974_v56  ;;  %vm413_vm0 = vcmp.eq.s32.totalorder %v4568_v37, %v3974_v56 }
  0xcc   : > { %vm2611_vm6 = vmpackc.low %vm489_vm15, %vm485_vm14  ;;  %vm353_vm14 = vcmp.eq.s32.totalorder %v4584_v15, %v3974_v56 }
  0xcd   : > { %2610 = vmatpush.bf16.msk.msra.mxu2 %vm2609_vm10, %v4525_v44  ;;  %vm2579_vm9 = vmpackc.low %vm361_vm2, %vm357_vm1  ;;  %vm477_vm10 = vcmp.eq.s32.totalorder %v4550_v23, %v3974_v56  ;;  %vm417_vm1 = vcmp.eq.s32.totalorder %v4569_v38, %v3974_v56 }
  0xce   : > { %2580 = vmatpush.bf16.msk.msra.mxu0 %vm2579_vm9, %v4525_v44  ;;  %vm2595_vm12 = vmpackc.low %vm425_vm5, %vm421_vm4  ;;  %vm545_vm4 = vcmp.eq.s32.totalorder %v3690_v8, %v3974_v56  ;;  %vm341_vm9 = vcmp.eq.s32.totalorder %v3331_v55, %v3974_v56 }
  0xcf   : > { %2626 = vmatpush.bf16.msk.msra.mxu3 %vm2625_vm3, %v4525_v44  ;;  %vm2627_vm15 = vmpackc.low %vm553_vm8, %vm549_vm7  ;;  %2596 = vmatpush.bf16.msk.msra.mxu1 %vm2595_vm12, %v4525_v44  ;;  %vm541_vm3 = vcmp.eq.s32.totalorder %v3687_v6, %v3974_v56  ;;  %vm473_vm7 = vcmp.eq.s32.totalorder %v4553_v40, %v3974_v56  ;;  %vm405_vm12 = vcmp.eq.s32.totalorder %v4570_v32, %v3974_v56  ;;  %v4588_v32 = vld [vmem:[#allocation54_spill] sm:$0xff] }
  0xd0   : > { %1729 = vmatmul.bf16.gmra.mxu2 %v3894_v30  ;;  %1691 = vmatmul.bf16.gmra.mxu0 %v4585_v29  ;;  %vm2613_vm2 = vmpackc.low %vm481_vm11, %vm477_vm10 }
  0xd1   : > { %2612 = vmatpush.bf16.msk.msra.mxu2 %vm2611_vm6, %v4525_v44  ;;  %1710 = vmatmul.bf16.gmra.mxu1 %v4567_v21  ;;  %vm2581_vm5 = vmpackc.low %vm353_vm14, %vm349_vm13  ;;  %vm469_vm6 = vcmp.eq.s32.totalorder %v4552_v31, %v3974_v56  ;;  %vm409_vm13 = vcmp.eq.s32.totalorder %v4571_v45, %v3974_v56  ;;  %v4587_v31 = vld [vmem:[#allocation53_spill] sm:$0xff] }
  0xd2   : > { %1748 = vmatmul.bf16.gmra.mxu3 %v3658_v26  ;;  %2582 = vmatpush.bf16.msk.msra.mxu0 %vm2581_vm5, %v4525_v44  ;;  %vm2597_vm8 = vmpackc.low %vm417_vm1, %vm413_vm0  ;;  %v4586_v26 = vld [vmem:[#allocation47_spill] sm:$0xff]  ;;  %vm537_vm0 = vcmp.eq.s32.totalorder %v3736_v24, %v3974_v56  ;;  %vm333_vm5 = vcmp.eq.s32.totalorder %v4587_v31, %v3974_v56 }
  0xd3   : > { %2628 = vmatpush.bf16.msk.msra.mxu3 %vm2627_vm15, %v4525_v44  ;;  %vm345_vm10 = vcmp.eq.s32.totalorder %v4586_v26, %v3974_v56  ;;  %vm2629_vm11 = vmpackc.low %vm545_vm4, %vm541_vm3  ;;  %2598 = vmatpush.bf16.msk.msra.mxu1 %vm2597_vm8, %v4525_v44  ;;  %vm533_vm15 = vcmp.eq.s32.totalorder %v3733_v17, %v3974_v56  ;;  %vm465_vm3 = vcmp.eq.s32.totalorder %v4555_v47, %v3974_v56 }
  0xd4   : > { %vm2615_vm14 = vmpackc.low %vm473_vm7, %vm469_vm6  ;;  %vm337_vm6 = vcmp.eq.s32.totalorder %v4588_v32, %v3974_v56  ;;  %vm397_vm8 = vcmp.eq.s32.totalorder %v4572_v46, %v3974_v56 }
  0xd5   : > { %2614 = vmatpush.bf16.msk.msra.mxu2 %vm2613_vm2, %v4525_v44  ;;  %vm2583_vm1 = vmpackc.low %vm345_vm10, %vm341_vm9  ;;  %vm461_vm2 = vcmp.eq.s32.totalorder %v4554_v48, %v3974_v56  ;;  %vm401_vm9 = vcmp.eq.s32.totalorder %v4573_v53, %v3974_v56 }
  0xd6   : > { %2584 = vmatpush.bf16.msk.msra.mxu0 %vm2583_vm1, %v4525_v44  ;;  %vm2599_vm4 = vmpackc.low %vm409_vm13, %vm405_vm12  ;;  %vm529_vm12 = vcmp.eq.s32.totalorder %v3772_v20, %v3974_v56 }
  0xd7   : > { %2630 = vmatpush.bf16.msk.msra.mxu3 %vm2629_vm11, %v4525_v44  ;;  %vm2631_vm7 = vmpackc.low %vm537_vm0, %vm533_vm15  ;;  %2600 = vmatpush.bf16.msk.msra.mxu1 %vm2599_vm4, %v4525_v44  ;;  %vm525_vm11 = vcmp.eq.s32.totalorder %v3769_v25, %v3974_v56  ;;  %v4589_v56 = vld [vmem:[#allocation61_spill] sm:$0xff] }
  0xd8   : > { %vm2617_vm10 = vmpackc.low %vm465_vm3, %vm461_vm2 }
  0xd9   : > { %2616 = vmatpush.bf16.msk.msra.mxu2 %vm2615_vm14, %v4525_v44  ;;  %vm2585_vm13 = vmpackc.low %vm337_vm6, %vm333_vm5 }
  0xda   : > { %2586 = vmatpush.bf16.msk.msra.mxu0 %vm2585_vm13, %v4525_v44  ;;  %vm2601_vm14 = vmpackc.low %vm401_vm9, %vm397_vm8 }
  0xdb   : > { %2632 = vmatpush.bf16.msk.msra.mxu3 %vm2631_vm7, %v4525_v44  ;;  %vm2633_vm15 = vmpackc.low %vm529_vm12, %vm525_vm11  ;;  %2602 = vmatpush.bf16.msk.msra.mxu1 %vm2601_vm14, %v4525_v44 }
  0xdd   : > { %2618 = vmatpush.bf16.msk.msra.mxu2 %vm2617_vm10, %v4525_v44  ;;  %v1459_v33 = vpop.f32.mrf.mxu0 }
  0xde   : > { %v1478_v34 = vpop.f32.mrf.mxu1 }
  0xdf   : > { %2634 = vmatpush.bf16.msk.msra.mxu3 %vm2633_vm15, %v4525_v44 }
  0xe0   : > { %1800 = vmatmul.bf16.vlgmr.msra.gmra.mxu2 %v4558_v63  ;;  %1762 = vmatmul.bf16.vlgmr.msra.gmra.mxu0 %v3497_v61 }
  0xe1   : > { %1781 = vmatmul.bf16.vlgmr.msra.gmra.mxu1 %v4578_v42 }
  0xe2   : > { %1819 = vmatmul.bf16.vlgmr.msra.gmra.mxu3 %v3808_v12  ;;  %v1479_v12 = vadd.f32 %v1478_v34, %v1459_v33 }
  0xe3   : > { %v1497_v39 = vpop.f32.mrf.mxu2 }
  0xe4   : > { %v1498_v59 = vadd.f32 %v1497_v39, %v1479_v12 }
  0xe5   : > { %v1461_v40 = vpop.f32.mrf.mxu0  ;;  %v1516_v41 = vpop.f32.mrf.mxu3 }
  0xe6   : > { %v1480_v43 = vpop.f32.mrf.mxu1  ;;  %v1517_v2 = vadd.f32 %v1516_v41, %v1498_v59 }
  0xe7   : > { %v1481_v22 = vadd.f32 %v1480_v43, %v1461_v40 }
  0xeb   : > { %v1499_v47 = vpop.f32.mrf.mxu2 }
  0xec   : > { %v1500_v38 = vadd.f32 %v1499_v47, %v1481_v22 }
  0xed   : > { %v1464_v48 = vpop.f32.mrf.mxu0  ;;  %v1518_v51 = vpop.f32.mrf.mxu3 }
  0xee   : > { %v1483_v55 = vpop.f32.mrf.mxu1  ;;  %v1519_v10 = vadd.f32 %v1518_v51, %v1500_v38 }
  0xef   : > { %v1484_v54 = vadd.f32 %v1483_v55, %v1464_v48 }
  0xf0   : > { %1805 = vmatmul.bf16.gmra.mxu2 %v4567_v21  ;;  %1767 = vmatmul.bf16.gmra.mxu0 %v4589_v56 }
  0xf1   : > { %1786 = vmatmul.bf16.gmra.mxu1 %v4585_v29 }
  0xf2   : > { %1824 = vmatmul.bf16.gmra.mxu3 %v3894_v30 }
  0xf3   : > { %v1502_v44 = vpop.f32.mrf.mxu2 }
  0xf4   : > { %v1503_v14 = vadd.f32 %v1502_v44, %v1484_v54 }
  0xf5   : > { %v1466_v58 = vpop.f32.mrf.mxu0  ;;  %v1521_v61 = vpop.f32.mrf.mxu3 }
  0xf6   : > { %v1485_v62 = vpop.f32.mrf.mxu1  ;;  %v1522_v33 = vadd.f32 %v1521_v61, %v1503_v14 }
  0xf7   : > { %v1486_v40 = vadd.f32 %v1485_v62, %v1466_v58 }
  0xfb   : > { %v1504_v63 = vpop.f32.mrf.mxu2 }
  0xfc   : > { %v1505_v48 = vadd.f32 %v1504_v63, %v1486_v40 }
  0xfd   : > { %v4330_v0 = vpop.f32.mrf.mxu3  ;;  %v1535_v18 = vpop.f32.mrf.mxu0 }
  0xfe   : > { %v1554_v19 = vpop.f32.mrf.mxu1  ;;  %v1536_v13 = vadd.f32 %v1535_v18, %v1517_v2 }
 0x103   : > { %v1573_v7 = vpop.f32.mrf.mxu2 }
 0x104   : > { %v1574_v57 = vadd.f32 %v1573_v7, %v1554_v19  ;;  %v1524_v19 = vadd.f32 %v4330_v0, %v1505_v48 }
 0x105   : > { %v1592_v27 = vpop.f32.mrf.mxu3  ;;  %v1537_v28 = vpop.f32.mrf.mxu0 }
 0x106   : > { %v1556_v36 = vpop.f32.mrf.mxu1  ;;  %v1593_v52 = vadd.f32 %v1592_v27, %v1574_v57  ;;  %v1538_v60 = vadd.f32 %v1537_v28, %v1519_v10 }
 0x10b   : > { %v1575_v6 = vpop.f32.mrf.mxu2 }
 0x10c   : > { %v1576_v21 = vadd.f32 %v1575_v6, %v1556_v36 }
 0x10d   : > { %v1594_v8 = vpop.f32.mrf.mxu3  ;;  %v1540_v16 = vpop.f32.mrf.mxu0 }
 0x10e   : > { %v1559_v17 = vpop.f32.mrf.mxu1  ;;  %v1595_v53 = vadd.f32 %v1594_v8, %v1576_v21  ;;  %v1541_v41 = vadd.f32 %v1540_v16, %v1522_v33 }
 0x113   : > { %v1578_v24 = vpop.f32.mrf.mxu2 }
 0x114   : > { %v1579_v5 = vadd.f32 %v1578_v24, %v1559_v17 }
 0x115   : > { %v1597_v30 = vpop.f32.mrf.mxu3  ;;  %v1542_v25 = vpop.f32.mrf.mxu0 }
 0x116   : > { %v1561_v20 = vpop.f32.mrf.mxu1  ;;  %v1598_v26 = vadd.f32 %v1597_v30, %v1579_v5  ;;  %v1543_v28 = vadd.f32 %v1542_v25, %v1524_v19 }
 0x11b   : > { %v1580_v23 = vpop.f32.mrf.mxu2 }
 0x11c   : > { %v1581_v43 = vadd.f32 %v1580_v23, %v1561_v20 }
 0x11d   : > { %v1599_v35 = vpop.f32.mrf.mxu3  ;;  %v1611_v50 = vpop.f32.mrf.mxu0 }
 0x11e   : > { %v1612_v3 = vadd.f32 %v1611_v50, %v1593_v52  ;;  %v1630_v11 = vpop.f32.mrf.mxu1  ;;  %v1600_v56 = vadd.f32 %v1599_v35, %v1581_v43 }
 0x120   : > { %v1631_v37 = vadd.f32 %v1630_v11, %v1612_v3 }
 0x122   : > { %v1830_v45 = vpack.c.bf16 %v1631_v37, %v1536_v13 }
 0x123   : > { %v1649_v46 = vpop.f32.mrf.mxu2 }
 0x124   : > { %1838 = vst [vmem:[%s4333_s27] sm:$0xff] %v1830_v45 }
 0x125   : > { %v1668_v49 = vpop.f32.mrf.mxu3  ;;  %v1613_v1 = vpop.f32.mrf.mxu0 }
 0x126   : > { %v1614_v9 = vadd.f32 %v1613_v1, %v1595_v53  ;;  %v1632_v42 = vpop.f32.mrf.mxu1  ;;  %v1669_v50 = vadd.f32 %v1668_v49, %v1649_v46 }
 0x128   : > { %v1633_v4 = vadd.f32 %v1632_v42, %v1614_v9 }
 0x12a   : > { %v1832_v15 = vpack.c.bf16 %v1633_v4, %v1538_v60 }
 0x12b   : > { %v1651_v29 = vpop.f32.mrf.mxu2 }
 0x12c   : > { %1840 = vst [vmem:[%s4333_s27 + $0x10] sm:$0xff] %v1832_v15 }
 0x12d   : > { %v1670_v31 = vpop.f32.mrf.mxu3  ;;  %v1616_v32 = vpop.f32.mrf.mxu0 }
 0x12e   : > { %v1617_v34 = vadd.f32 %v1616_v32, %v1598_v26  ;;  %v1635_v39 = vpop.f32.mrf.mxu1  ;;  %v1671_v53 = vadd.f32 %v1670_v31, %v1651_v29 }
 0x130   : > { %v1636_v47 = vadd.f32 %v1635_v39, %v1617_v34 }
 0x132   : > { %v1834_v51 = vpack.c.bf16 %v1636_v47, %v1541_v41 }
 0x133   : > { %v1654_v55 = vpop.f32.mrf.mxu2 }
 0x134   : > { %1842 = vst [vmem:[%s4333_s27 + $0x20] sm:$0xff] %v1834_v51 }
 0x135   : > { %v1673_v44 = vpop.f32.mrf.mxu3  ;;  %v1618_v18 = vpop.f32.mrf.mxu0 }
 0x136   : > { %v1619_v7 = vadd.f32 %v1618_v18, %v1600_v56  ;;  %v1637_v27 = vpop.f32.mrf.mxu1  ;;  %v1674_v26 = vadd.f32 %v1673_v44, %v1654_v55 }
 0x138   : > { %v1638_v61 = vadd.f32 %v1637_v27, %v1619_v7 }
 0x13a   : > { %v1836_v36 = vpack.c.bf16 %v1638_v61, %v1543_v28 }
 0x13b   : > { %v1656_v6 = vpop.f32.mrf.mxu2 }
 0x13c   : > { %1844 = vst [vmem:[%s4333_s27 + $0x30] sm:$0xff] %v1836_v36 }
 0x13d   : > { %v1675_v58 = vpop.f32.mrf.mxu3  ;;  %v1687_v62 = vpop.f32.mrf.mxu0 }
 0x13e   : > { %v1706_v8 = vpop.f32.mrf.mxu1  ;;  %v1688_v22 = vadd.f32 %v1687_v62, %v1669_v50  ;;  %v1676_v56 = vadd.f32 %v1675_v58, %v1656_v6 }
 0x140   : > { %v1707_v37 = vadd.f32 %v1706_v8, %v1688_v22 }
 0x143   : > { %v1725_v16 = vpop.f32.mrf.mxu2 }
 0x144   : > { %v1726_v1 = vadd.f32 %v1725_v16, %v1707_v37 }
 0x145   : > { %v1744_v63 = vpop.f32.mrf.mxu3  ;;  %v1689_v17 = vpop.f32.mrf.mxu0 }
 0x146   : > { %v1708_v24 = vpop.f32.mrf.mxu1  ;;  %v1690_v60 = vadd.f32 %v1689_v17, %v1671_v53 }
 0x148   : > { %v1709_v4 = vadd.f32 %v1708_v24, %v1690_v60 }
 0x14b   : > { %v1727_v30 = vpop.f32.mrf.mxu2 }
 0x14c   : > { %v1728_v32 = vadd.f32 %v1727_v30, %v1709_v4 }
 0x14d   : > { %v1746_v20 = vpop.f32.mrf.mxu3  ;;  %v1692_v12 = vpop.f32.mrf.mxu0 }
 0x14e   : > { %v1711_v57 = vpop.f32.mrf.mxu1  ;;  %v1693_v39 = vadd.f32 %v1692_v12, %v1674_v26 }
 0x150   : > { %v1712_v47 = vadd.f32 %v1711_v57, %v1693_v39 }
 0x153   : > { %v1730_v59 = vpop.f32.mrf.mxu2 }
 0x154   : > { %v1731_v18 = vadd.f32 %v1730_v59, %v1712_v47 }
 0x155   : > { %v1749_v0 = vpop.f32.mrf.mxu3  ;;  %v1694_v23 = vpop.f32.mrf.mxu0 }
 0x156   : > { %v1713_v52 = vpop.f32.mrf.mxu1  ;;  %v1695_v7 = vadd.f32 %v1694_v23, %v1676_v56 }
 0x158   : > { %v1714_v6 = vadd.f32 %v1713_v52, %v1695_v7 }
 0x15b   : > { %v1732_v25 = vpop.f32.mrf.mxu2 }
 0x15c   : > { %v1733_v8 = vadd.f32 %v1732_v25, %v1714_v6 }
 0x15d   : > { %v1751_v35 = vpop.f32.mrf.mxu3  ;;  %v1763_v2 = vpop.f32.mrf.mxu0 }
 0x15e   : > { %v1782_v3 = vpop.f32.mrf.mxu1  ;;  %v1764_v11 = vadd.f32 %v1763_v2, %v1744_v63 }
 0x160   : > { %v1783_v13 = vadd.f32 %v1782_v3, %v1764_v11 }
 0x163   : > { %v1801_v21 = vpop.f32.mrf.mxu2 }
 0x164   : > { %v1802_v38 = vadd.f32 %v1801_v21, %v1783_v13 }
 0x165   : > { %v1820_v45 = vpop.f32.mrf.mxu3  ;;  %v1765_v9 = vpop.f32.mrf.mxu0 }
 0x166   : > { %v1821_v10 = vadd.f32 %v1820_v45, %v1802_v38  ;;  %v1784_v42 = vpop.f32.mrf.mxu1  ;;  %v1766_v54 = vadd.f32 %v1765_v9, %v1746_v20 }
 0x168   : > { %v1831_v5 = vpack.c.bf16 %v1821_v10, %v1726_v1  ;;  %v1785_v46 = vadd.f32 %v1784_v42, %v1766_v54 }
 0x16a   : > { %1839 = vst [vmem:[%s4333_s27 + $0x8] sm:$0xff] %v1831_v5 }
 0x16b   : > { %v1803_v49 = vpop.f32.mrf.mxu2 }
 0x16c   : > { %v1804_v14 = vadd.f32 %v1803_v49, %v1785_v46 }
 0x16d   : > { %v1822_v15 = vpop.f32.mrf.mxu3  ;;  %v1768_v34 = vpop.f32.mrf.mxu0 }
 0x16e   : > { %v1823_v33 = vadd.f32 %v1822_v15, %v1804_v14  ;;  %v1769_v29 = vadd.f32 %v1768_v34, %v1749_v0  ;;  %v1787_v31 = vpop.f32.mrf.mxu1 }
 0x170   : > { %v1833_v40 = vpack.c.bf16 %v1823_v33, %v1728_v32  ;;  %v1788_v41 = vadd.f32 %v1787_v31, %v1769_v29 }
 0x172   : > { %1841 = vst [vmem:[%s4333_s27 + $0x18] sm:$0xff] %v1833_v40 }
 0x173   : > { %v1806_v43 = vpop.f32.mrf.mxu2 }
 0x174   : > { %v1807_v48 = vadd.f32 %v1806_v43, %v1788_v41 }
 0x175   : > { %v1825_v51 = vpop.f32.mrf.mxu3  ;;  %v1770_v55 = vpop.f32.mrf.mxu0 }
 0x176   : > { %v1826_v19 = vadd.f32 %v1825_v51, %v1807_v48  ;;  %v1771_v44 = vadd.f32 %v1770_v55, %v1751_v35  ;;  %v1789_v28 = vpop.f32.mrf.mxu1 }
 0x178   : > { %v1835_v27 = vpack.c.bf16 %v1826_v19, %v1731_v18  ;;  %v1790_v61 = vadd.f32 %v1789_v28, %v1771_v44 }
 0x17a   : > { %1843 = vst [vmem:[%s4333_s27 + $0x28] sm:$0xff] %v1835_v27 }
 0x17b   : > { %v1808_v36 = vpop.f32.mrf.mxu2 }
 0x17c   : > { %v1809_v58 = vadd.f32 %v1808_v36, %v1790_v61 }
 0x17d   : > { %v1827_v62 = vpop.f32.mrf.mxu3 }
 0x17e   : > { %v1828_v16 = vadd.f32 %v1827_v62, %v1809_v58 }
 0x180   : > { %v1837_v63 = vpack.c.bf16 %v1828_v16, %v1733_v8 }
 0x182   : > { %1845 = vst [vmem:[%s4333_s27 + $0x38] sm:$0xff] %v1837_v63 }
 0x183   : > { %2801 = shalt.err (!%p2798_p9)
}
 0x184   : > { %s2850_s29 = smov 256   ;;  %s2851_s4 = smov 512  }
 0x185   : > { %s2852_s5 = smov 16  }
 0x186   : > { %2657 = dma.vmem_to_hbm [thread:$0]  (%p2928_p13), %s1860_s15, 1024, %s1862_s18, %s1847_s16, %s2850_s29, %s2851_s4, %s2852_s5  }
 0x187 PF: > { %s1876_s6 = sand.u32 1, %s2832_s9   ;;  %p4590_p10 = scmp.ge.s32.totalorder %s2844_s12, 2 }
 0x188   : > { %s1877_s17 = scalar_lea.sflag [#allocation4], %s1876_s6 }
 0x189   : > { %p2668_p11 = pnand %p4590_p10, %p2933_p4 }
 0x18b   : > { %p2669_p0 = pneg %p2668_p11 }
 0x18d   : > { %2827 = dma.done.wait (%p2669_p0), %s1877_s17, 1024  }
 0x18e   : > { %2829 = vsyncadd (%p2669_p0), %s1877_s17, 4294966272  ;;  %p16_p2 = scmp.ge.s32.totalorder %s2908_s23, 4   ;;  %s4591_s9 = smov %s2836_s10 }
 0x18f   : > { %s4592_s10 = smov %s2840_s11  ;;  %s4593_s11 = smov %s2920_s26 }
 0x190   : > { %s4594_s12 = smov %s2908_s23  ;;  %18 = sbr.rel (!%p16_p2) target bundleno = 6 (0x6), region = 77 }
 0x195   :  { %1883 = vsyncpa [#allocation3], 1 }
 0x196   :  { %1885 = vsyncpa [#allocation3 + $0x1], 1 }
 0x197   :  { %1886 = vsyncpa [#allocation6], 1 }
 0x198   :  { %1887 = vsyncpa [#allocation4], 1 }
 0x199   :  { %1889 = vsyncpa [#allocation4 + $0x1], 1 }

// kernel: tpu_custom_call.1
= control target key start
LH: loop header
LB: loop body
LE: loop exit
PB: predicated region body
PF: predicated region fallthrough
CT: control target
= control target key end

     0   :  { %7 = vsyncpa [#allocation3], 0  ;;  %s4378_s0 = inlined_call_operand.hbm [shape: s32[1,1024], index: 0, kind: input, shape index: {}]   ;;  %s4379_s1 = inlined_call_operand.hbm [shape: bf16[32,640], index: 1, kind: input, shape index: {}]   ;;  %s4380_s2 = inlined_call_operand.hbm [shape: bf16[32,1024], index: 2, kind: output, shape index: {}]  }
   0x1   :  { %9 = vsyncpa [#allocation3 + $0x1], 0 }
   0x2   :  { %10 = vsyncpa [#allocation6], 0 }
   0x3   :  { %11 = vsyncpa [#allocation4], 0 }
   0x4   :  { %13 = vsyncpa [#allocation4 + $0x1], 0  ;;  %s2868_s9 = smov 0   ;;  %s2870_s10 = smov 0  }
   0x5   :  { %s2872_s11 = smov 0   ;;  %s2874_s12 = smov 0  }
   0x6 LB: > { %s108_s15 = sshll.u32 %s4379_s1, 4  ;;  %s2892_s16 = sadd.s32 4294967295, %s2844_s12   ;;  %s2844_s12 = sphi %s2874_s12, %s4594_s12   ;;  %s2840_s11 = sphi %s2872_s11, %s4593_s11   ;;  %s2836_s10 = sphi %s2870_s10, %s4592_s10   ;;  %s2832_s9 = sphi %s2868_s9, %s4591_s9   ;;  %s109_s15 = int_to_ptr.hbm [resolvable:$true] %s108_s15 }
   0x7   : > { %p1946_p0 = scmp.ge.s32.totalorder %s2844_s12, 1  ;;  %p40_p1 = scmp.eq.s32.totalorder %s2892_s16, 0 }
   0x8   : > { %p97_p2 = scmp.lt.s32.totalorder %s2844_s12, 3  ;;  %s2846_s18 = smov [#allocation5]  }
   0x9   : > { %s110_s19 = sshll.u32 %s2846_s18, 4  ;;  %s2847_s20 = smov 320   ;;  %s111_s19 = int_to_ptr.vmem [resolvable:$true] %s110_s19 }
   0xa   : > { %p2897_p3 = pnand %p1946_p0, %p97_p2  ;;  %s2848_s21 = smov 20  }
   0xb   : > { %s1945_s22 = sadd.s32 4294967294, %s2844_s12   ;;  %s2908_s23 = sadd.s32 1, %s2844_s12  }
   0xc   : > { %p2659_p4 = pneg %p2897_p3  ;;  %s26_s24 = sadd.s32 1, %s2840_s11 }
   0xd   : > { %s23_s25 = ssub.s32 %s2844_s12, %s2908_s23  ;;  %p33_p7 = scmp.ne.s32.totalorder %s2840_s11, %s2836_s10 }
   0xe   : > { %p2660_p6 = pnand %p2659_p4, %p40_p1  ;;  %p24_p8 = scmp.eq.s32.totalorder %s23_s25, 0 }
   0xf   : > { %p34_p9 = scmp.eq.s32.totalorder %s2844_s12, 0  ;;  %p39_p10 = scmp.ne.s32.totalorder %s2836_s10, %s2832_s9 }
  0x10   : > { %2662 = dma.hbm_to_vmem [thread:$0]  (!%p2660_p6), %s109_s15, 1280, %s111_s19, [#allocation6], %s2847_s20, %s2847_s20, %s2848_s21  }
  0x11   : > { %p84_p11 = scmp.eq.s32.totalorder %s2892_s16, 1  ;;  %p2924_p12 = por %p40_p1, %p39_p10 }
  0x12   : > { %s2920_s26 = scalar_select %p24_p8, %s2840_s11, %s26_s24  }
  0x13   : > { %p2928_p13 = por %p84_p11, %p33_p7  ;;  %p90_p0 = scmp.eq.s32.totalorder %s1945_s22, 1 }
  0x14   : > { %p35_p2 = por %p34_p9, %p33_p7  ;;  %s124_s29 = sand.u32 1, %s2840_s11  }
  0x15   : > { %p2933_p4 = por %p90_p0, %p39_p10  ;;  %p2672_p6 = scmp.lt.s32.totalorder %s2844_s12, 2 }
  0x16   : > { %s1949_s3 = sshll.u32 %s124_s29, 2  ;;  %s1950_s4 = sshll.u32 %s2844_s12, 2 }
  0x17   : > { %s132_s7 = scalar_lea.hbm %s4378_s0, %s1950_s4  ;;  %s128_s13 = scalar_lea.vmem [#allocation2], %s1949_s3 }
  0x18   : > { %s134_s8 = sshll.u32 %s132_s7, 4  ;;  %s136_s14 = sshll.u32 %s128_s13, 4  ;;  %s135_s8 = int_to_ptr.hbm [resolvable:$true] %s134_s8  ;;  %s137_s14 = int_to_ptr.vmem [resolvable:$true] %s136_s14 }
  0x19   : > { %p2942_p8 = pnand %p2672_p6, %p35_p2  ;;  %s125_s18 = scalar_lea.sflag [#allocation3], %s124_s29 }
  0x1a   : > { %s2744_s19 = sshra.s32 %s135_s8, 4  ;;  %s2751_s24 = scalar_lea.hbm %s4378_s0, 8  ;;  %s2745_s19 = int_to_ptr.hbm [resolvable:$true] %s2744_s19 }
  0x1b   : > { %s2746_s20 = scalar_lea.hbm %s2745_s19, 4  ;;  %p2748_p9 = pneg %p2942_p8 }
  0x1c   : > { %p2747_p7 = scmp.ne.s32.totalorder %s2745_s19, %s2746_s20  ;;  %p2752_p0 = scmp.lt.s32.totalorder %s2745_s19, %s4378_s0 }
  0x1d   : > { %p2753_p2 = scmp.lt.s32.totalorder %s2751_s24, %s2746_s20 }
  0x1e   : > { %p2749_p10 = pnand %p2748_p9, %p2747_p7 }
  0x1f   : > { %p2754_p6 = por %p2753_p2, %p2752_p0 }
  0x20   : > { %p2750_p11 = pneg %p2749_p10 }
  0x22   : > { %p2755_p5 = pnand %p2754_p6, %p2750_p11 }
  0x24   : > { %2758 = shalt.err (!%p2755_p5)
}
  0x25   : > { %2666 = dma.hbm_to_vmem [thread:$0]  (!%p2942_p8), %s135_s8, 64, %s137_s14, %s125_s18  }
  0x26   : > { %145 = sbr.rel (%p2897_p3) target bundleno = 391 (0x187), region = 28 }
  0x2b   : > { %s2959_s29 = sand.u32 1, %s2836_s10  }
  0x2c   : > { %s1952_s4 = sshll.u32 %s2959_s29, 2  ;;  %s148_s5 = scalar_lea.sflag [#allocation3], %s2959_s29 }
  0x2d   : > { %s151_s6 = scalar_lea.vmem [#allocation2], %s1952_s4 }
  0x2e   : > { %2819 = dma.done.wait (%p2924_p12), %s148_s5, 64  }
  0x2f   : > { %2821 = vsyncadd (%p2924_p12), %s148_s5, 4294967232 }
  0x30   : > { %2823 = dma.done.wait (%p40_p1), [#allocation6], 1280  }
  0x31   : > { %2825 = vsyncadd (%p40_p1), [#allocation6], 4294966016  ;;  %v181_v0 = vlaneseq  ;;  %v2988_v7 = vld [vmem:[%s151_s6] sm:$0xf]  ;;  %v4381_v20 = vmov 1.0|1.0  }
  0x32   : > { %4483 = vst [vmem:[#allocation14_spill] sm:$0xff] %v2988_v7  ;;  %v3003_v12 = vperm.slane %v2988_v7, 0  ;;  %s1954_s17 = sshll.u32 %s2959_s29, 6  ;;  %s2650_s7 = sshll.u32 %s2892_s16, 4 }
  0x33   : > { %v2971_v1 = vshrl.u32 %v181_v0, 7  ;;  %s4333_s27 = scalar_lea.vmem [#allocation7], %s1954_s17  ;;  %s1858_s14 = scalar_lea.hbm %s4380_s2, %s2650_s7 }
  0x34   : > { %s1859_s15 = sshll.u32 %s4333_s27, 4  ;;  %s1861_s18 = sshll.u32 %s1858_s14, 4  ;;  %s1860_s15 = int_to_ptr.vmem [resolvable:$true] %s1859_s15  ;;  %s1862_s18 = int_to_ptr.hbm [resolvable:$true] %s1861_s18 }
  0x35   : > { %v2974_v2 = vadd.s32 112, %v2971_v1  ;;  %v2977_v3 = vadd.s32 120, %v2971_v1  ;;  %v2980_v4 = vadd.s32 240, %v2971_v1  ;;  %v2983_v5 = vadd.s32 248, %v2971_v1  ;;  %s1847_s16 = scalar_lea.sflag [#allocation4], %s2959_s29  ;;  %s2788_s19 = sshra.s32 %s1862_s18, 4  ;;  %s2789_s19 = int_to_ptr.hbm [resolvable:$true] %s2788_s19 }
  0x36   : > { %v2986_v6 = vadd.s32 368, %v2971_v1  ;;  %v2991_v8 = vadd.s32 376, %v2971_v1  ;;  %v2994_v9 = vadd.s32 496, %v2971_v1  ;;  %v2997_v10 = vadd.s32 504, %v2971_v1  ;;  %s2790_s20 = scalar_lea.hbm %s2789_s19, 64  ;;  %s2794_s24 = scalar_lea.hbm %s4380_s2, 128 }
  0x37   : > { %4480 = vst [vmem:[#allocation11_spill] sm:$0xff] %v2980_v4  ;;  %v3000_v11 = vadd.s32 96, %v2971_v1  ;;  %v3006_v13 = vadd.s32 104, %v2971_v1  ;;  %v3009_v14 = vadd.s32 224, %v2971_v1  ;;  %v3012_v15 = vadd.s32 232, %v2971_v1  ;;  %p2791_p1 = scmp.ne.s32.totalorder %s2789_s19, %s2790_s20  ;;  %p2795_p12 = scmp.lt.s32.totalorder %s2789_s19, %s4380_s2 }
  0x38   : > { %4481 = vst [vmem:[#allocation12_spill] sm:$0xff] %v2983_v5  ;;  %v3015_v16 = vadd.s32 352, %v2971_v1  ;;  %v3018_v17 = vadd.s32 360, %v2971_v1  ;;  %v3021_v18 = vadd.s32 480, %v2971_v1  ;;  %v3024_v19 = vadd.s32 488, %v2971_v1  ;;  %p2796_p8 = scmp.lt.s32.totalorder %s2794_s24, %s2790_s20 }
  0x39   : > { %4482 = vst [vmem:[#allocation13_spill] sm:$0xff] %v2986_v6  ;;  %vm322_vm0 = vcmp.eq.s32.totalorder %v2974_v2, %v3003_v12  ;;  %vm326_vm1 = vcmp.eq.s32.totalorder %v2977_v3, %v3003_v12  ;;  %vm386_vm2 = vcmp.eq.s32.totalorder %v2980_v4, %v3003_v12  ;;  %vm390_vm3 = vcmp.eq.s32.totalorder %v2983_v5, %v3003_v12  ;;  %p2792_p3 = pnand %p2791_p1, %p2928_p13 }
  0x3a   : > { %4484 = vst [vmem:[#allocation15_spill] sm:$0xff] %v2991_v8  ;;  %vm2315_vm4 = vmpackc.low %vm326_vm1, %vm322_vm0  ;;  %vm450_vm5 = vcmp.eq.s32.totalorder %v2986_v6, %v3003_v12  ;;  %vm454_vm6 = vcmp.eq.s32.totalorder %v2991_v8, %v3003_v12  ;;  %vm514_vm7 = vcmp.eq.s32.totalorder %v2994_v9, %v3003_v12  ;;  %vm518_vm8 = vcmp.eq.s32.totalorder %v2997_v10, %v3003_v12  ;;  %p2797_p7 = por %p2796_p8, %p2795_p12 }
  0x3b   : > { %4485 = vst [vmem:[#allocation16_spill] sm:$0xff] %v2994_v9  ;;  %2316 = vmatpush.bf16.msk.msra.mxu0 %vm2315_vm4, %v4381_v20  ;;  %vm2331_vm9 = vmpackc.low %vm390_vm3, %vm386_vm2  ;;  %vm314_vm10 = vcmp.eq.s32.totalorder %v3000_v11, %v3003_v12  ;;  %vm318_vm11 = vcmp.eq.s32.totalorder %v3006_v13, %v3003_v12  ;;  %v3048_v21 = vadd.s32 80, %v2971_v1  ;;  %v3051_v22 = vadd.s32 88, %v2971_v1  ;;  %p2793_p5 = pneg %p2792_p3 }
  0x3c   : > { %4486 = vst [vmem:[#allocation17_spill] sm:$0xff] %v2997_v10  ;;  %2332 = vmatpush.bf16.msk.msra.mxu1 %vm2331_vm9, %v4381_v20  ;;  %vm2347_vm12 = vmpackc.low %vm454_vm6, %vm450_vm5  ;;  %vm378_vm13 = vcmp.eq.s32.totalorder %v3009_v14, %v3003_v12  ;;  %vm382_vm14 = vcmp.eq.s32.totalorder %v3012_v15, %v3003_v12  ;;  %v3059_v23 = vadd.s32 208, %v2971_v1  ;;  %v3062_v24 = vadd.s32 216, %v2971_v1 }
  0x3d   : > { %4487 = vst [vmem:[#allocation18_spill] sm:$0xff] %v3009_v14  ;;  %2348 = vmatpush.bf16.msk.msra.mxu2 %vm2347_vm12, %v4381_v20  ;;  %vm2363_vm15 = vmpackc.low %vm518_vm8, %vm514_vm7  ;;  %vm442_vm0 = vcmp.eq.s32.totalorder %v3015_v16, %v3003_v12  ;;  %vm446_vm1 = vcmp.eq.s32.totalorder %v3018_v17, %v3003_v12  ;;  %vm506_vm2 = vcmp.eq.s32.totalorder %v3021_v18, %v3003_v12  ;;  %v3087_v25 = vadd.s32 336, %v2971_v1  ;;  %p2798_p9 = pnand %p2797_p7, %p2793_p5 }
  0x3e   : > { %4488 = vst [vmem:[#allocation19_spill] sm:$0xff] %v3012_v15  ;;  %vm510_vm3 = vcmp.eq.s32.totalorder %v3024_v19, %v3003_v12  ;;  %2364 = vmatpush.bf16.msk.msra.mxu3 %vm2363_vm15, %v4381_v20  ;;  %vm2317_vm4 = vmpackc.low %vm318_vm11, %vm314_vm10  ;;  %v3090_v26 = vadd.s32 344, %v2971_v1  ;;  %v3093_v27 = vadd.s32 464, %v2971_v1  ;;  %v3096_v28 = vadd.s32 472, %v2971_v1 }
  0x3f   : > { %4489 = vst [vmem:[#allocation20_spill] sm:$0xff] %v3015_v16  ;;  %2318 = vmatpush.bf16.msk.msra.mxu0 %vm2317_vm4, %v4381_v20  ;;  %vm2333_vm5 = vmpackc.low %vm382_vm14, %vm378_vm13  ;;  %vm306_vm6 = vcmp.eq.s32.totalorder %v3048_v21, %v3003_v12  ;;  %vm310_vm7 = vcmp.eq.s32.totalorder %v3051_v22, %v3003_v12  ;;  %v3110_v29 = vadd.s32 64, %v2971_v1  ;;  %v3113_v30 = vadd.s32 72, %v2971_v1 }
  0x40   : > { %4490 = vst [vmem:[#allocation21_spill] sm:$0xff] %v3018_v17  ;;  %2334 = vmatpush.bf16.msk.msra.mxu1 %vm2333_vm5, %v4381_v20  ;;  %vm2349_vm8 = vmpackc.low %vm446_vm1, %vm442_vm0  ;;  %vm370_vm9 = vcmp.eq.s32.totalorder %v3059_v23, %v3003_v12  ;;  %vm374_vm10 = vcmp.eq.s32.totalorder %v3062_v24, %v3003_v12  ;;  %v3127_v31 = vadd.s32 192, %v2971_v1  ;;  %v3130_v32 = vadd.s32 200, %v2971_v1 }
  0x41   : > { %4491 = vst [vmem:[#allocation22_spill] sm:$0xff] %v3021_v18  ;;  %2350 = vmatpush.bf16.msk.msra.mxu2 %vm2349_vm8, %v4381_v20  ;;  %vm2365_vm11 = vmpackc.low %vm510_vm3, %vm506_vm2  ;;  %vm434_vm12 = vcmp.eq.s32.totalorder %v3087_v25, %v3003_v12  ;;  %vm438_vm13 = vcmp.eq.s32.totalorder %v3090_v26, %v3003_v12  ;;  %vm498_vm14 = vcmp.eq.s32.totalorder %v3093_v27, %v3003_v12  ;;  %v3155_v33 = vadd.s32 320, %v2971_v1  ;;  %v2643_v18 = vld [vmem:[#allocation5 + $0x18] sm:$0xf0] }
  0x42   : > { %4492 = vst [vmem:[#allocation23_spill] sm:$0xff] %v3024_v19  ;;  %vm502_vm15 = vcmp.eq.s32.totalorder %v3096_v28, %v3003_v12  ;;  %2366 = vmatpush.bf16.msk.msra.mxu3 %vm2365_vm11, %v4381_v20  ;;  %vm2319_vm0 = vmpackc.low %vm310_vm7, %vm306_vm6  ;;  %v3158_v34 = vadd.s32 328, %v2971_v1  ;;  %v3161_v35 = vadd.s32 448, %v2971_v1  ;;  %v3164_v36 = vadd.s32 456, %v2971_v1  ;;  %v2285_v19 = vld [vmem:[#allocation5 + $0x8] sm:$0xf] }
  0x43   : > { %4493 = vst [vmem:[#allocation24_spill] sm:$0xff] %v3059_v23  ;;  %2320 = vmatpush.bf16.msk.msra.mxu0 %vm2319_vm0, %v4381_v20  ;;  %vm2335_vm1 = vmpackc.low %vm374_vm10, %vm370_vm9  ;;  %vm298_vm2 = vcmp.eq.s32.totalorder %v3110_v29, %v3003_v12  ;;  %vm302_vm3 = vcmp.eq.s32.totalorder %v3113_v30, %v3003_v12  ;;  %v3178_v37 = vadd.s32 48, %v2971_v1  ;;  %v3181_v38 = vadd.s32 56, %v2971_v1 }
  0x44   : > { %4494 = vst [vmem:[#allocation25_spill] sm:$0xff] %v3062_v24  ;;  %2336 = vmatpush.bf16.msk.msra.mxu1 %vm2335_vm1, %v4381_v20  ;;  %vm2351_vm4 = vmpackc.low %vm438_vm13, %vm434_vm12  ;;  %vm362_vm5 = vcmp.eq.s32.totalorder %v3127_v31, %v3003_v12  ;;  %vm366_vm6 = vcmp.eq.s32.totalorder %v3130_v32, %v3003_v12  ;;  %v3195_v39 = vadd.s32 176, %v2971_v1  ;;  %v3198_v40 = vadd.s32 184, %v2971_v1 }
  0x45   : > { %4495 = vst [vmem:[#allocation26_spill] sm:$0xff] %v3087_v25  ;;  %2352 = vmatpush.bf16.msk.msra.mxu2 %vm2351_vm4, %v4381_v20  ;;  %vm2367_vm7 = vmpackc.low %vm502_vm15, %vm498_vm14  ;;  %vm426_vm8 = vcmp.eq.s32.totalorder %v3155_v33, %v3003_v12  ;;  %vm430_vm9 = vcmp.eq.s32.totalorder %v3158_v34, %v3003_v12  ;;  %vm490_vm10 = vcmp.eq.s32.totalorder %v3161_v35, %v3003_v12  ;;  %v3223_v41 = vadd.s32 304, %v2971_v1 }
  0x46   : > { %4496 = vst [vmem:[#allocation27_spill] sm:$0xff] %v3090_v26  ;;  %vm494_vm11 = vcmp.eq.s32.totalorder %v3164_v36, %v3003_v12  ;;  %2368 = vmatpush.bf16.msk.msra.mxu3 %vm2367_vm7, %v4381_v20  ;;  %vm2321_vm12 = vmpackc.low %vm302_vm3, %vm298_vm2  ;;  %v3226_v42 = vadd.s32 312, %v2971_v1  ;;  %v3229_v43 = vadd.s32 432, %v2971_v1  ;;  %v3232_v44 = vadd.s32 440, %v2971_v1 }
  0x47   : > { %4497 = vst [vmem:[#allocation28_spill] sm:$0xff] %v3093_v27  ;;  %2322 = vmatpush.bf16.msk.msra.mxu0 %vm2321_vm12, %v4381_v20  ;;  %vm2337_vm13 = vmpackc.low %vm366_vm6, %vm362_vm5  ;;  %vm290_vm14 = vcmp.eq.s32.totalorder %v3178_v37, %v3003_v12  ;;  %vm294_vm15 = vcmp.eq.s32.totalorder %v3181_v38, %v3003_v12  ;;  %v3246_v45 = vadd.s32 32, %v2971_v1  ;;  %v3249_v46 = vadd.s32 40, %v2971_v1  ;;  %v2279_v27 = vld [vmem:[#allocation5 + $0x14] sm:$0xf0] }
  0x48   : > { %4498 = vst [vmem:[#allocation29_spill] sm:$0xff] %v3096_v28  ;;  %2338 = vmatpush.bf16.msk.msra.mxu1 %vm2337_vm13, %v4381_v20  ;;  %vm2353_vm0 = vmpackc.low %vm430_vm9, %vm426_vm8  ;;  %vm354_vm1 = vcmp.eq.s32.totalorder %v3195_v39, %v3003_v12  ;;  %vm358_vm2 = vcmp.eq.s32.totalorder %v3198_v40, %v3003_v12  ;;  %v3263_v47 = vadd.s32 160, %v2971_v1  ;;  %v3266_v48 = vadd.s32 168, %v2971_v1  ;;  %v2640_v28 = vld [vmem:[#allocation5 + $0x4] sm:$0xf] }
  0x49   : > { %4499 = vst [vmem:[#allocation30_spill] sm:$0xff] %v3110_v29  ;;  %2354 = vmatpush.bf16.msk.msra.mxu2 %vm2353_vm0, %v4381_v20  ;;  %vm2369_vm3 = vmpackc.low %vm494_vm11, %vm490_vm10  ;;  %vm418_vm4 = vcmp.eq.s32.totalorder %v3223_v41, %v3003_v12  ;;  %vm422_vm5 = vcmp.eq.s32.totalorder %v3226_v42, %v3003_v12  ;;  %vm482_vm6 = vcmp.eq.s32.totalorder %v3229_v43, %v3003_v12  ;;  %v3291_v49 = vadd.s32 288, %v2971_v1 }
  0x4a   : > { %4500 = vst [vmem:[#allocation31_spill] sm:$0xff] %v3113_v30  ;;  %vm486_vm7 = vcmp.eq.s32.totalorder %v3232_v44, %v3003_v12  ;;  %2370 = vmatpush.bf16.msk.msra.mxu3 %vm2369_vm3, %v4381_v20  ;;  %vm2323_vm8 = vmpackc.low %vm294_vm15, %vm290_vm14  ;;  %v3294_v50 = vadd.s32 296, %v2971_v1  ;;  %v3297_v51 = vadd.s32 416, %v2971_v1  ;;  %v3300_v52 = vadd.s32 424, %v2971_v1 }
  0x4b   : > { %4501 = vst [vmem:[#allocation32_spill] sm:$0xff] %v3127_v31  ;;  %2324 = vmatpush.bf16.msk.msra.mxu0 %vm2323_vm8, %v4381_v20  ;;  %vm2339_vm9 = vmpackc.low %vm358_vm2, %vm354_vm1  ;;  %vm282_vm10 = vcmp.eq.s32.totalorder %v3246_v45, %v3003_v12  ;;  %vm286_vm11 = vcmp.eq.s32.totalorder %v3249_v46, %v3003_v12  ;;  %v3314_v53 = vadd.s32 16, %v2971_v1  ;;  %v3317_v54 = vadd.s32 24, %v2971_v1 }
  0x4c   : > { %4502 = vst [vmem:[#allocation33_spill] sm:$0xff] %v3130_v32  ;;  %2340 = vmatpush.bf16.msk.msra.mxu1 %vm2339_vm9, %v4381_v20  ;;  %vm2355_vm12 = vmpackc.low %vm422_vm5, %vm418_vm4  ;;  %vm346_vm13 = vcmp.eq.s32.totalorder %v3263_v47, %v3003_v12  ;;  %vm350_vm14 = vcmp.eq.s32.totalorder %v3266_v48, %v3003_v12  ;;  %v3331_v55 = vadd.s32 144, %v2971_v1  ;;  %v3334_v56 = vadd.s32 152, %v2971_v1 }
  0x4d   : > { %4503 = vst [vmem:[#allocation34_spill] sm:$0xff] %v3161_v35  ;;  %2356 = vmatpush.bf16.msk.msra.mxu2 %vm2355_vm12, %v4381_v20  ;;  %vm2371_vm15 = vmpackc.low %vm486_vm7, %vm482_vm6  ;;  %vm410_vm0 = vcmp.eq.s32.totalorder %v3291_v49, %v3003_v12  ;;  %vm414_vm1 = vcmp.eq.s32.totalorder %v3294_v50, %v3003_v12  ;;  %vm474_vm2 = vcmp.eq.s32.totalorder %v3297_v51, %v3003_v12  ;;  %v3359_v57 = vadd.s32 272, %v2971_v1 }
  0x4e   : > { %4504 = vst [vmem:[#allocation35_spill] sm:$0xff] %v3164_v36  ;;  %vm478_vm3 = vcmp.eq.s32.totalorder %v3300_v52, %v3003_v12  ;;  %2372 = vmatpush.bf16.msk.msra.mxu3 %vm2371_vm15, %v4381_v20  ;;  %vm2325_vm4 = vmpackc.low %vm286_vm11, %vm282_vm10  ;;  %v3362_v58 = vadd.s32 280, %v2971_v1  ;;  %v3365_v59 = vadd.s32 400, %v2971_v1  ;;  %v3368_v60 = vadd.s32 408, %v2971_v1  ;;  %v2642_v36 = vld [vmem:[#allocation5 + $0x10] sm:$0xf0] }
  0x4f   : > { %4505 = vst [vmem:[#allocation36_spill] sm:$0xff] %v3198_v40  ;;  %2326 = vmatpush.bf16.msk.msra.mxu0 %vm2325_vm4, %v4381_v20  ;;  %vm2341_vm5 = vmpackc.low %vm350_vm14, %vm346_vm13  ;;  %vm274_vm6 = vcmp.eq.s32.totalorder %v3314_v53, %v3003_v12  ;;  %vm278_vm7 = vcmp.eq.s32.totalorder %v3317_v54, %v3003_v12  ;;  %v3382_v61 = vadd.s32 8, %v2971_v1  ;;  %vm338_vm9 = vcmp.eq.s32.totalorder %v3331_v55, %v3003_v12 }
  0x50   : > { %4506 = vst [vmem:[#allocation37_spill] sm:$0xff] %v3223_v41  ;;  %2342 = vmatpush.bf16.msk.msra.mxu1 %vm2341_vm5, %v4381_v20  ;;  %vm2357_vm8 = vmpackc.low %vm414_vm1, %vm410_vm0  ;;  %vm342_vm10 = vcmp.eq.s32.totalorder %v3334_v56, %v3003_v12  ;;  %v3396_v62 = vadd.s32 128, %v2971_v1  ;;  %v3399_v63 = vadd.s32 136, %v2971_v1  ;;  %vm402_vm12 = vcmp.eq.s32.totalorder %v3359_v57, %v3003_v12 }
  0x51   : > { %4507 = vst [vmem:[#allocation38_spill] sm:$0xff] %v3226_v42  ;;  %2358 = vmatpush.bf16.msk.msra.mxu2 %vm2357_vm8, %v4381_v20  ;;  %vm2373_vm11 = vmpackc.low %vm478_vm3, %vm474_vm2  ;;  %vm406_vm13 = vcmp.eq.s32.totalorder %v3362_v58, %v3003_v12  ;;  %vm466_vm14 = vcmp.eq.s32.totalorder %v3365_v59, %v3003_v12  ;;  %v3415_v0 = vadd.s32 256, %v2971_v1  ;;  %v2277_v20 = vld [vmem:[#allocation5] sm:$0xf]  ;;  %vm470_vm0 = vcmp.eq.s32.totalorder %v3368_v60, %v3003_v12 }
  0x52   : > { %4508 = vst [vmem:[#allocation39_spill] sm:$0xff] %v3229_v43  ;;  %vm2327_vm15 = vmpackc.low %vm278_vm7, %vm274_vm6  ;;  %v3433_v43 = vadd.s32 392, %v2971_v1  ;;  %v3436_v35 = vperm.slane %v2988_v7, 1  ;;  %vm266_vm2 = vcmp.eq.s32.totalorder %v2971_v1, %v3003_v12  ;;  %vm270_vm3 = vcmp.eq.s32.totalorder %v3382_v61, %v3003_v12  ;;  %v2287_v7 = vld [vmem:[#allocation5 + $0x1c] sm:$0xf0] }
  0x53   : > { %4509 = vst [vmem:[#allocation40_spill] sm:$0xff] %v3232_v44  ;;  %v4525_v44 = vmov 1.0|1.0   ;;  %vm2343_vm1 = vmpackc.low %vm342_vm10, %vm338_vm9  ;;  %vm330_vm5 = vcmp.eq.s32.totalorder %v3396_v62, %v3003_v12  ;;  %vm334_vm6 = vcmp.eq.s32.totalorder %v3399_v63, %v3003_v12  ;;  %vm394_vm8 = vcmp.eq.s32.totalorder %v3415_v0, %v3003_v12 }
  0x54   : > { %4510 = vst [vmem:[#allocation41_spill] sm:$0xff] %v3263_v47  ;;  %2374 = vmatpush.bf16.msk.msra.mxu3 %vm2373_vm11, %v4525_v44  ;;  %2328 = vmatpush.bf16.msk.msra.mxu0 %vm2327_vm15, %v4525_v44  ;;  %vm2359_vm4 = vmpackc.low %vm406_vm13, %vm402_vm12  ;;  %v3472_v10 = vadd.s32 624, %v2971_v1  ;;  %v3475_v9 = vadd.s32 632, %v2971_v1  ;;  %vm462_vm12 = vcmp.eq.s32.totalorder %v3433_v43, %v3003_v12  ;;  %vm391_vm15 = vcmp.eq.s32.totalorder %v2983_v5, %v3436_v35 }
  0x55   : > { %4511 = vst [vmem:[#allocation42_spill] sm:$0xff] %v3266_v48  ;;  %2344 = vmatpush.bf16.msk.msra.mxu1 %vm2343_vm1, %v4525_v44  ;;  %2360 = vmatpush.bf16.msk.msra.mxu2 %vm2359_vm4, %v4525_v44  ;;  %vm2375_vm7 = vmpackc.low %vm470_vm0, %vm466_vm14  ;;  %vm387_vm14 = vcmp.eq.s32.totalorder %v2980_v4, %v3436_v35  ;;  %vm323_vm4 = vcmp.eq.s32.totalorder %v2974_v2, %v3436_v35 }
  0x56   : > { %4512 = vst [vmem:[#allocation43_spill] sm:$0xff] %v3291_v49  ;;  %vm2329_vm10 = vmpackc.low %vm270_vm3, %vm266_vm2  ;;  %vm578_vm1 = vcmp.eq.s32.totalorder %v3472_v10, %v3003_v12  ;;  %vm582_vm2 = vcmp.eq.s32.totalorder %v3475_v9, %v3003_v12 }
  0x57   : > { %4513 = vst [vmem:[#allocation44_spill] sm:$0xff] %v3294_v50  ;;  %vm2345_vm13 = vmpackc.low %vm334_vm6, %vm330_vm5  ;;  %vm327_vm5 = vcmp.eq.s32.totalorder %v2977_v3, %v3436_v35 }
  0x58   : > { %4514 = vst [vmem:[#allocation45_spill] sm:$0xff] %v3297_v51  ;;  %v3430_v51 = vadd.s32 384, %v2971_v1  ;;  %2376 = vmatpush.bf16.msk.msra.mxu3 %vm2375_vm7, %v4525_v44  ;;  %2330 = vmatpush.bf16.msk.msra.mxu0 %vm2329_vm10, %v4525_v44  ;;  %vm2411_vm6 = vmpackc.low %vm391_vm15, %vm387_vm14  ;;  %vm451_vm7 = vcmp.eq.s32.totalorder %v2986_v6, %v3436_v35  ;;  %vm379_vm10 = vcmp.eq.s32.totalorder %v3009_v14, %v3436_v35  ;;  %v2648_v6 = vld [vmem:[#allocation5 + $0x40] sm:$0xf0] }
  0x59   : > { %4515 = vst [vmem:[#allocation46_spill] sm:$0xff] %v3300_v52  ;;  %v3427_v52 = vadd.s32 264, %v2971_v1  ;;  %2346 = vmatpush.bf16.msk.msra.mxu1 %vm2345_vm13, %v4525_v44 }
  0x5a   : > { %4516 = vst [vmem:[#allocation47_spill] sm:$0xff] %v3334_v56  ;;  %vm458_vm11 = vcmp.eq.s32.totalorder %v3430_v51, %v3003_v12 }
  0x5b   : > { %4517 = vst [vmem:[#allocation48_spill] sm:$0xff] %v3359_v57  ;;  %vm398_vm9 = vcmp.eq.s32.totalorder %v3427_v52, %v3003_v12  ;;  %vm2377_vm3 = vmpackc.low %vm462_vm12, %vm458_vm11  ;;  %vm383_vm11 = vcmp.eq.s32.totalorder %v3012_v15, %v3436_v35 }
  0x5c   : > { %4518 = vst [vmem:[#allocation49_spill] sm:$0xff] %v3362_v58  ;;  %v3499_v58 = vor.u32 %v2643_v18, %v2285_v19  ;;  %vm2361_vm0 = vmpackc.low %vm398_vm9, %vm394_vm8  ;;  %v3517_v18 = vadd.s32 608, %v2971_v1  ;;  %v3520_v19 = vadd.s32 616, %v2971_v1  ;;  %2378 = vmatpush.bf16.msk.msra.mxu3 %vm2377_vm3, %v4525_v44  ;;  %vm455_vm8 = vcmp.eq.s32.totalorder %v2991_v8, %v3436_v35  ;;  %v2305_v8 = vld [vmem:[#allocation5 + $0x30] sm:$0xf] }
  0x5d   : > { %4519 = vst [vmem:[#allocation50_spill] sm:$0xff] %v3365_v59  ;;  %v2641_v59 = vld [vmem:[#allocation5 + $0xc] sm:$0xf]  ;;  %2362 = vmatpush.bf16.msk.msra.mxu2 %vm2361_vm0, %v4525_v44  ;;  %vm2379_vm9 = vmpackc.low %vm582_vm2, %vm578_vm1  ;;  %vm315_vm0 = vcmp.eq.s32.totalorder %v3000_v11, %v3436_v35  ;;  %vm319_vm1 = vcmp.eq.s32.totalorder %v3006_v13, %v3436_v35  ;;  %vm443_vm3 = vcmp.eq.s32.totalorder %v3015_v16, %v3436_v35 }
  0x5e   : > { %4520 = vst [vmem:[#allocation51_spill] sm:$0xff] %v3368_v60  ;;  %v3488_v60 = vor.u32 %v2642_v36, %v2277_v20  ;;  %v3529_v20 = vor.u32 %v2641_v59, %v2287_v7  ;;  %2380 = vmatpush.bf16.msk.msrb.mxu0 %vm2379_vm9, %v4525_v44  ;;  %vm2395_vm12 = vmpackc.low %vm327_vm5, %vm323_vm4  ;;  %vm570_vm13 = vcmp.eq.s32.totalorder %v3517_v18, %v3003_v12  ;;  %v3563_v7 = vadd.s32 592, %v2971_v1  ;;  %v2297_v59 = vld [vmem:[#allocation5 + $0x28] sm:$0xf]  ;;  %v2645_v16 = vld [vmem:[#allocation5 + $0x2c] sm:$0xf] }
  0x5f   : > { %4521 = vst [vmem:[#allocation52_spill] sm:$0xff] %v3382_v61  ;;  %v3497_v61 = vor.u32 %v2640_v28, %v2279_v27  ;;  %vm574_vm14 = vcmp.eq.s32.totalorder %v3520_v19, %v3003_v12  ;;  %v3566_v27 = vadd.s32 600, %v2971_v1  ;;  %2396 = vmatpush.bf16.msk.msrb.mxu1 %vm2395_vm12, %v4525_v44  ;;  %vm2427_vm15 = vmpackc.low %vm455_vm8, %vm451_vm7  ;;  %vm447_vm4 = vcmp.eq.s32.totalorder %v3018_v17, %v3436_v35  ;;  %v2647_v17 = vld [vmem:[#allocation5 + $0x38] sm:$0xf0] }
  0x60   : > { %4522 = vst [vmem:[#allocation53_spill] sm:$0xff] %v3396_v62  ;;  %1458 = vmatmul.bf16.vlgmr.msra.gmra.mxu0 %v3488_v60  ;;  %1496 = vmatmul.bf16.vlgmr.msra.gmra.mxu2 %v3499_v58  ;;  %vm2413_vm2 = vmpackc.low %vm383_vm11, %vm379_vm10  ;;  %vm375_vm7 = vcmp.eq.s32.totalorder %v3062_v24, %v3436_v35  ;;  %vm562_vm9 = vcmp.eq.s32.totalorder %v3563_v7, %v3003_v12  ;;  %v3599_v28 = vadd.s32 576, %v2971_v1  ;;  %v3602_v36 = vadd.s32 584, %v2971_v1  ;;  %v2307_v24 = vld [vmem:[#allocation5 + $0x44] sm:$0xf0] }
  0x61   : > { %4523 = vst [vmem:[#allocation54_spill] sm:$0xff] %v3399_v63  ;;  %1477 = vmatmul.bf16.vlgmr.msra.gmra.mxu1 %v3497_v61  ;;  %2412 = vmatpush.bf16.msk.msrb.mxu2 %vm2411_vm6, %v4525_v44  ;;  %vm2381_vm5 = vmpackc.low %vm574_vm14, %vm570_vm13  ;;  %vm371_vm6 = vcmp.eq.s32.totalorder %v3059_v23, %v3436_v35  ;;  %vm566_vm10 = vcmp.eq.s32.totalorder %v3566_v27, %v3003_v12 }
  0x62   : > { %4524 = vst [vmem:[#allocation55_spill] sm:$0xff] %v3415_v0  ;;  %1515 = vmatmul.bf16.vlgmr.msra.gmra.mxu3 %v3529_v20  ;;  %2382 = vmatpush.bf16.msk.msrb.mxu0 %vm2381_vm5, %v4525_v44  ;;  %vm2397_vm8 = vmpackc.low %vm319_vm1, %vm315_vm0  ;;  %vm307_vm12 = vcmp.eq.s32.totalorder %v3048_v21, %v3436_v35  ;;  %vm311_vm13 = vcmp.eq.s32.totalorder %v3051_v22, %v3436_v35 }
  0x63   : > { %4526 = vst [vmem:[#allocation56_spill] sm:$0xff] %v3427_v52  ;;  %2428 = vmatpush.bf16.msk.msrb.mxu3 %vm2427_vm15, %v4525_v44  ;;  %2398 = vmatpush.bf16.msk.msrb.mxu1 %vm2397_vm8, %v4525_v44  ;;  %vm2429_vm11 = vmpackc.low %vm447_vm4, %vm443_vm3  ;;  %vm435_vm15 = vcmp.eq.s32.totalorder %v3087_v25, %v3436_v35  ;;  %vm439_vm0 = vcmp.eq.s32.totalorder %v3090_v26, %v3436_v35  ;;  %v2646_v25 = vld [vmem:[#allocation5 + $0x34] sm:$0xf] }
  0x64   : > { %4527 = vst [vmem:[#allocation57_spill] sm:$0xff] %v3430_v51  ;;  %vm2415_vm14 = vmpackc.low %vm375_vm7, %vm371_vm6  ;;  %vm367_vm3 = vcmp.eq.s32.totalorder %v3130_v32, %v3436_v35  ;;  %vm554_vm5 = vcmp.eq.s32.totalorder %v3599_v28, %v3003_v12  ;;  %vm558_vm6 = vcmp.eq.s32.totalorder %v3602_v36, %v3003_v12  ;;  %v3634_v51 = vadd.s32 568, %v2971_v1 }
  0x65   : > { %4528 = vst [vmem:[#allocation58_spill] sm:$0xff] %v3433_v43  ;;  %2414 = vmatpush.bf16.msk.msrb.mxu2 %vm2413_vm2, %v4525_v44  ;;  %vm2383_vm1 = vmpackc.low %vm566_vm10, %vm562_vm9  ;;  %vm363_vm2 = vcmp.eq.s32.totalorder %v3127_v31, %v3436_v35  ;;  %v3631_v43 = vadd.s32 560, %v2971_v1  ;;  %vm299_vm8 = vcmp.eq.s32.totalorder %v3110_v29, %v3436_v35  ;;  %vm303_vm9 = vcmp.eq.s32.totalorder %v3113_v30, %v3436_v35 }
  0x66   : > { %4529 = vst [vmem:[#allocation59_spill] sm:$0xff] %v3499_v58  ;;  %2384 = vmatpush.bf16.msk.msrb.mxu0 %vm2383_vm1, %v4525_v44  ;;  %vm2399_vm4 = vmpackc.low %vm311_vm13, %vm307_vm12  ;;  %vm431_vm12 = vcmp.eq.s32.totalorder %v3158_v34, %v3436_v35  ;;  %v3658_v26 = vor.u32 %v2647_v17, %v2297_v59  ;;  %v3669_v31 = vor.u32 %v2648_v6, %v2305_v8  ;;  %v3687_v6 = vadd.s32 544, %v2971_v1  ;;  %v4534_v59 = vld [vmem:[#allocation49_spill] sm:$0xff] }
  0x67   : > { %4530 = vst [vmem:[#allocation60_spill] sm:$0xff] %v3529_v20  ;;  %2430 = vmatpush.bf16.msk.msrb.mxu3 %vm2429_vm11, %v4525_v44  ;;  %v2299_v20 = vld [vmem:[#allocation5 + $0x3c] sm:$0xf0]  ;;  %2400 = vmatpush.bf16.msk.msrb.mxu1 %vm2399_vm4, %v4525_v44  ;;  %vm2431_vm7 = vmpackc.low %vm439_vm0, %vm435_vm15  ;;  %vm427_vm11 = vcmp.eq.s32.totalorder %v3155_v33, %v3436_v35  ;;  %vm359_vm15 = vcmp.eq.s32.totalorder %v3198_v40, %v3436_v35  ;;  %v3690_v8 = vadd.s32 552, %v2971_v1  ;;  %v3733_v17 = vadd.s32 528, %v2971_v1 }
  0x68   : > { %vm2417_vm10 = vmpackc.low %vm367_vm3, %vm363_vm2  ;;  %v3667_v32 = vor.u32 %v2645_v16, %v2299_v20  ;;  %4532 = vst [vmem:[#allocation62_spill] sm:$0xff] %v3669_v31  ;;  %vm546_vm1 = vcmp.eq.s32.totalorder %v3631_v43, %v3003_v12  ;;  %vm550_vm2 = vcmp.eq.s32.totalorder %v3634_v51, %v3003_v12  ;;  %v3699_v16 = vor.u32 %v2646_v25, %v2307_v24 }
  0x69   : > { %2416 = vmatpush.bf16.msk.msrb.mxu2 %vm2415_vm14, %v4525_v44  ;;  %vm2385_vm13 = vmpackc.low %vm558_vm6, %vm554_vm5  ;;  %vm355_vm14 = vcmp.eq.s32.totalorder %v3195_v39, %v3436_v35  ;;  %vm291_vm4 = vcmp.eq.s32.totalorder %v3178_v37, %v3436_v35  ;;  %vm295_vm5 = vcmp.eq.s32.totalorder %v3181_v38, %v3436_v35  ;;  %v3736_v24 = vadd.s32 536, %v2971_v1 }
  0x6a   : > { %4531 = vst [vmem:[#allocation61_spill] sm:$0xff] %v3667_v32  ;;  %2386 = vmatpush.bf16.msk.msrb.mxu0 %vm2385_vm13, %v4525_v44  ;;  %vm2401_vm0 = vmpackc.low %vm303_vm9, %vm299_vm8  ;;  %vm423_vm8 = vcmp.eq.s32.totalorder %v3226_v42, %v3436_v35  ;;  %vm538_vm13 = vcmp.eq.s32.totalorder %v3687_v6, %v3003_v12  ;;  %v3769_v25 = vadd.s32 512, %v2971_v1  ;;  %v3772_v20 = vadd.s32 520, %v2971_v1  ;;  %v4537_v42 = vld [vmem:[#allocation16_spill] sm:$0xff] }
  0x6b   : > { %2432 = vmatpush.bf16.msk.msrb.mxu3 %vm2431_vm7, %v4525_v44  ;;  %2402 = vmatpush.bf16.msk.msrb.mxu1 %vm2401_vm0, %v4525_v44  ;;  %vm2433_vm3 = vmpackc.low %vm431_vm12, %vm427_vm11  ;;  %4533 = vst [vmem:[#allocation63_spill] sm:$0xff] %v3699_v16  ;;  %vm419_vm7 = vcmp.eq.s32.totalorder %v3223_v41, %v3436_v35  ;;  %vm351_vm11 = vcmp.eq.s32.totalorder %v3266_v48, %v3436_v35  ;;  %v4547_v41 = vld [vmem:[#allocation33_spill] sm:$0xff] }
  0x6c   : > { %vm2419_vm6 = vmpackc.low %vm359_vm15, %vm355_vm14  ;;  %vm542_vm14 = vcmp.eq.s32.totalorder %v3690_v8, %v3003_v12  ;;  %vm283_vm0 = vcmp.eq.s32.totalorder %v3246_v45, %v3436_v35 }
  0x6d   : > { %2418 = vmatpush.bf16.msk.msrb.mxu2 %vm2417_vm10, %v4525_v44  ;;  %vm2387_vm9 = vmpackc.low %vm550_vm2, %vm546_vm1  ;;  %vm347_vm10 = vcmp.eq.s32.totalorder %v3263_v47, %v3436_v35  ;;  %vm287_vm1 = vcmp.eq.s32.totalorder %v3249_v46, %v3436_v35 }
  0x6e   : > { %2388 = vmatpush.bf16.msk.msrb.mxu0 %vm2387_vm9, %v4525_v44  ;;  %vm2403_vm12 = vmpackc.low %vm295_vm5, %vm291_vm4  ;;  %vm415_vm4 = vcmp.eq.s32.totalorder %v3294_v50, %v3436_v35  ;;  %vm530_vm9 = vcmp.eq.s32.totalorder %v3733_v17, %v3003_v12  ;;  %v4535_v50 = vld [vmem:[#allocation14_spill] sm:$0xff] }
  0x6f   : > { %2434 = vmatpush.bf16.msk.msrb.mxu3 %vm2433_vm3, %v4525_v44  ;;  %2404 = vmatpush.bf16.msk.msrb.mxu1 %vm2403_vm12, %v4525_v44  ;;  %vm2435_vm15 = vmpackc.low %vm423_vm8, %vm419_vm7  ;;  %vm411_vm3 = vcmp.eq.s32.totalorder %v3291_v49, %v3436_v35  ;;  %vm343_vm7 = vcmp.eq.s32.totalorder %v3334_v56, %v3436_v35  ;;  %vm275_vm12 = vcmp.eq.s32.totalorder %v3314_v53, %v3436_v35  ;;  %v3785_v49 = vperm.slane %v4535_v50, 2 }
  0x70   : > { %1463 = vmatmul.bf16.gmra.mxu0 %v3658_v26  ;;  %1501 = vmatmul.bf16.gmra.mxu2 %v3669_v31  ;;  %vm2421_vm2 = vmpackc.low %vm351_vm11, %vm347_vm10  ;;  %vm534_vm10 = vcmp.eq.s32.totalorder %v3736_v24, %v3003_v12 }
  0x71   : > { %1482 = vmatmul.bf16.gmra.mxu1 %v3667_v32  ;;  %2420 = vmatpush.bf16.msk.msrb.mxu2 %vm2419_vm6, %v4525_v44  ;;  %vm2389_vm5 = vmpackc.low %vm542_vm14, %vm538_vm13  ;;  %vm339_vm6 = vcmp.eq.s32.totalorder %v3331_v55, %v3436_v35  ;;  %vm279_vm13 = vcmp.eq.s32.totalorder %v3317_v54, %v3436_v35 }
  0x72   : > { %1520 = vmatmul.bf16.gmra.mxu3 %v3699_v16  ;;  %2390 = vmatpush.bf16.msk.msrb.mxu0 %vm2389_vm5, %v4525_v44  ;;  %vm2405_vm8 = vmpackc.low %vm287_vm1, %vm283_vm0  ;;  %vm407_vm0 = vcmp.eq.s32.totalorder %v4534_v59, %v3436_v35  ;;  %vm522_vm5 = vcmp.eq.s32.totalorder %v3769_v25, %v3003_v12  ;;  %v2293_v59 = vld [vmem:[#allocation5 + $0x10] sm:$0xf]  ;;  %v4536_v16 = vld [vmem:[#allocation52_spill] sm:$0xff] }
  0x73   : > { %2436 = vmatpush.bf16.msk.msrb.mxu3 %vm2435_vm15, %v4525_v44  ;;  %2406 = vmatpush.bf16.msk.msrb.mxu1 %vm2405_vm8, %v4525_v44  ;;  %vm2437_vm11 = vmpackc.low %vm415_vm4, %vm411_vm3  ;;  %vm403_vm15 = vcmp.eq.s32.totalorder %v3359_v57, %v3436_v35  ;;  %vm335_vm3 = vcmp.eq.s32.totalorder %v3399_v63, %v3436_v35  ;;  %v2644_v57 = vld [vmem:[#allocation5 + $0x20] sm:$0xf0]  ;;  %vm267_vm8 = vcmp.eq.s32.totalorder %v2971_v1, %v3436_v35 }
  0x74   : > { %vm2423_vm14 = vmpackc.low %vm343_vm7, %vm339_vm6  ;;  %vm526_vm6 = vcmp.eq.s32.totalorder %v3772_v20, %v3003_v12  ;;  %v3808_v12 = vor.u32 %v2644_v57, %v2293_v59  ;;  %v4539_v57 = vld [vmem:[#allocation22_spill] sm:$0xff]  ;;  %v4540_v59 = vld [vmem:[#allocation23_spill] sm:$0xff] }
  0x75   : > { %2422 = vmatpush.bf16.msk.msrb.mxu2 %vm2421_vm2, %v4525_v44  ;;  %vm2391_vm1 = vmpackc.low %vm534_vm10, %vm530_vm9  ;;  %vm331_vm2 = vcmp.eq.s32.totalorder %v3396_v62, %v3436_v35  ;;  %vm271_vm9 = vcmp.eq.s32.totalorder %v4536_v16, %v3436_v35 }
  0x76   : > { %2392 = vmatpush.bf16.msk.msrb.mxu0 %vm2391_vm1, %v4525_v44  ;;  %vm2407_vm4 = vmpackc.low %vm279_vm13, %vm275_vm12  ;;  %vm399_vm12 = vcmp.eq.s32.totalorder %v3427_v52, %v3436_v35  ;;  %vm515_vm1 = vcmp.eq.s32.totalorder %v4537_v42, %v3436_v35  ;;  %v2649_v52 = vld [vmem:[#allocation5 + $0x48] sm:$0xf0] }
  0x77   : > { %2438 = vmatpush.bf16.msk.msrb.mxu3 %vm2437_vm11, %v4525_v44  ;;  %2408 = vmatpush.bf16.msk.msrb.mxu1 %vm2407_vm4, %v4525_v44  ;;  %vm2439_vm7 = vmpackc.low %vm407_vm0, %vm403_vm15  ;;  %vm395_vm11 = vcmp.eq.s32.totalorder %v3415_v0, %v3436_v35  ;;  %vm328_vm15 = vcmp.eq.s32.totalorder %v2977_v3, %v3785_v49  ;;  %v4538_v0 = vld [vmem:[#allocation17_spill] sm:$0xff]  ;;  %vm579_vm4 = vcmp.eq.s32.totalorder %v3472_v10, %v3436_v35 }
  0x78   : > { %vm2425_vm10 = vmpackc.low %vm335_vm3, %vm331_vm2  ;;  %vm519_vm2 = vcmp.eq.s32.totalorder %v4538_v0, %v3436_v35 }
  0x79   : > { %2424 = vmatpush.bf16.msk.msrb.mxu2 %vm2423_vm14, %v4525_v44  ;;  %vm2393_vm13 = vmpackc.low %vm526_vm6, %vm522_vm5  ;;  %vm324_vm14 = vcmp.eq.s32.totalorder %v2974_v2, %v3785_v49  ;;  %vm583_vm5 = vcmp.eq.s32.totalorder %v3475_v9, %v3436_v35 }
  0x7a   : > { %2394 = vmatpush.bf16.msk.msrb.mxu0 %vm2393_vm13, %v4525_v44  ;;  %vm2409_vm0 = vmpackc.low %vm271_vm9, %vm267_vm8  ;;  %vm392_vm8 = vcmp.eq.s32.totalorder %v2983_v5, %v3785_v49  ;;  %vm507_vm13 = vcmp.eq.s32.totalorder %v4539_v57, %v3436_v35  ;;  %v4542_v5 = vld [vmem:[#allocation29_spill] sm:$0xff] }
  0x7b   : > { %2440 = vmatpush.bf16.msk.msrb.mxu3 %vm2439_vm7, %v4525_v44  ;;  %2410 = vmatpush.bf16.msk.msrb.mxu1 %vm2409_vm0, %v4525_v44  ;;  %vm2441_vm3 = vmpackc.low %vm399_vm12, %vm395_vm11  ;;  %vm388_vm7 = vcmp.eq.s32.totalorder %v2980_v4, %v3785_v49  ;;  %vm320_vm11 = vcmp.eq.s32.totalorder %v3006_v13, %v3785_v49  ;;  %vm571_vm0 = vcmp.eq.s32.totalorder %v3517_v18, %v3436_v35  ;;  %v4545_v4 = vld [vmem:[#allocation35_spill] sm:$0xff] }
  0x7c   : > { %vm2475_vm6 = vmpackc.low %vm328_vm15, %vm324_vm14  ;;  %vm511_vm14 = vcmp.eq.s32.totalorder %v4540_v59, %v3436_v35 }
  0x7d   : > { %2426 = vmatpush.bf16.msk.msrb.mxu2 %vm2425_vm10, %v4525_v44  ;;  %vm2443_vm9 = vmpackc.low %vm519_vm2, %vm515_vm1  ;;  %vm316_vm10 = vcmp.eq.s32.totalorder %v3000_v11, %v3785_v49  ;;  %vm575_vm1 = vcmp.eq.s32.totalorder %v3520_v19, %v3436_v35 }
  0x7e   : > { %vm2459_vm12 = vmpackc.low %vm583_vm5, %vm579_vm4  ;;  %2444 = vmatpush.bf16.msk.msra.mxu0 %vm2443_vm9, %v4525_v44  ;;  %vm384_vm4 = vcmp.eq.s32.totalorder %v3012_v15, %v3785_v49  ;;  %v4543_v15 = vld [vmem:[#allocation25_spill] sm:$0xff] }
  0x7f   : > { %2442 = vmatpush.bf16.msk.msrb.mxu3 %vm2441_vm3, %v4525_v44  ;;  %vm2491_vm15 = vmpackc.low %vm392_vm8, %vm388_vm7  ;;  %2460 = vmatpush.bf16.msk.msra.mxu1 %vm2459_vm12, %v4525_v44  ;;  %vm380_vm3 = vcmp.eq.s32.totalorder %v3009_v14, %v3785_v49  ;;  %vm312_vm7 = vcmp.eq.s32.totalorder %v3051_v22, %v3785_v49  ;;  %vm563_vm12 = vcmp.eq.s32.totalorder %v3563_v7, %v3436_v35  ;;  %v4544_v14 = vld [vmem:[#allocation34_spill] sm:$0xff] }
  0x80   : > { %1534 = vmatmul.bf16.vlgmr.msrb.gmra.mxu0 %v3808_v12  ;;  %1572 = vmatmul.bf16.vlgmr.msrb.gmra.mxu2 %v3497_v61  ;;  %vm2477_vm2 = vmpackc.low %vm320_vm11, %vm316_vm10  ;;  %vm503_vm10 = vcmp.eq.s32.totalorder %v4542_v5, %v3436_v35 }
  0x81   : > { %2476 = vmatpush.bf16.msk.msra.mxu2 %vm2475_vm6, %v4525_v44  ;;  %1553 = vmatmul.bf16.vlgmr.msrb.gmra.mxu1 %v3488_v60  ;;  %vm2445_vm5 = vmpackc.low %vm511_vm14, %vm507_vm13  ;;  %vm308_vm6 = vcmp.eq.s32.totalorder %v3048_v21, %v3785_v49  ;;  %vm567_vm13 = vcmp.eq.s32.totalorder %v3566_v27, %v3436_v35 }
  0x82   : > { %1591 = vmatmul.bf16.vlgmr.msrb.gmra.mxu3 %v3499_v58  ;;  %vm2461_vm8 = vmpackc.low %vm575_vm1, %vm571_vm0  ;;  %v4541_v58 = vld [vmem:[#allocation28_spill] sm:$0xff]  ;;  %2446 = vmatpush.bf16.msk.msra.mxu0 %vm2445_vm5, %v4525_v44  ;;  %vm376_vm0 = vcmp.eq.s32.totalorder %v4543_v15, %v3785_v49  ;;  %vm491_vm5 = vcmp.eq.s32.totalorder %v4544_v14, %v3436_v35 }
  0x83   : > { %2492 = vmatpush.bf16.msk.msra.mxu3 %vm2491_vm15, %v4525_v44  ;;  %vm499_vm9 = vcmp.eq.s32.totalorder %v4541_v58, %v3436_v35  ;;  %vm2493_vm11 = vmpackc.low %vm384_vm4, %vm380_vm3  ;;  %2462 = vmatpush.bf16.msk.msra.mxu1 %vm2461_vm8, %v4525_v44  ;;  %vm372_vm15 = vcmp.eq.s32.totalorder %v3059_v23, %v3785_v49  ;;  %vm304_vm3 = vcmp.eq.s32.totalorder %v3113_v30, %v3785_v49  ;;  %v2313_v23 = vld [vmem:[#allocation5 + $0x38] sm:$0xf] }
  0x84   : > { %vm2479_vm14 = vmpackc.low %vm312_vm7, %vm308_vm6  ;;  %vm495_vm6 = vcmp.eq.s32.totalorder %v4545_v4, %v3436_v35  ;;  %vm555_vm8 = vcmp.eq.s32.totalorder %v3599_v28, %v3436_v35  ;;  %v4546_v15 = vld [vmem:[#allocation32_spill] sm:$0xff]  ;;  %v3894_v30 = vor.u32 %v2649_v52, %v2313_v23  ;;  %v4550_v23 = vld [vmem:[#allocation45_spill] sm:$0xff] }
  0x85   : > { %2478 = vmatpush.bf16.msk.msra.mxu2 %vm2477_vm2, %v4525_v44  ;;  %vm2447_vm1 = vmpackc.low %vm503_vm10, %vm499_vm9  ;;  %vm300_vm2 = vcmp.eq.s32.totalorder %v3110_v29, %v3785_v49  ;;  %vm559_vm9 = vcmp.eq.s32.totalorder %v3602_v36, %v3436_v35  ;;  %v4548_v29 = vld [vmem:[#allocation39_spill] sm:$0xff]  ;;  %v4551_v52 = vld [vmem:[#allocation46_spill] sm:$0xff] }
  0x86   : > { %vm2463_vm4 = vmpackc.low %vm567_vm13, %vm563_vm12  ;;  %2448 = vmatpush.bf16.msk.msra.mxu0 %vm2447_vm1, %v4525_v44  ;;  %vm368_vm12 = vcmp.eq.s32.totalorder %v4547_v41, %v3785_v49  ;;  %vm483_vm1 = vcmp.eq.s32.totalorder %v4548_v29, %v3436_v35 }
  0x87   : > { %2494 = vmatpush.bf16.msk.msra.mxu3 %vm2493_vm11, %v4525_v44  ;;  %vm2495_vm7 = vmpackc.low %vm376_vm0, %vm372_vm15  ;;  %2464 = vmatpush.bf16.msk.msra.mxu1 %vm2463_vm4, %v4525_v44  ;;  %vm364_vm11 = vcmp.eq.s32.totalorder %v4546_v15, %v3785_v49  ;;  %vm296_vm15 = vcmp.eq.s32.totalorder %v3181_v38, %v3785_v49  ;;  %v4549_v15 = vld [vmem:[#allocation40_spill] sm:$0xff]  ;;  %vm547_vm4 = vcmp.eq.s32.totalorder %v3631_v43, %v3436_v35 }
  0x88   : > { %vm2481_vm10 = vmpackc.low %vm304_vm3, %vm300_vm2  ;;  %vm487_vm2 = vcmp.eq.s32.totalorder %v4549_v15, %v3436_v35 }
  0x89   : > { %2480 = vmatpush.bf16.msk.msra.mxu2 %vm2479_vm14, %v4525_v44  ;;  %vm2449_vm13 = vmpackc.low %vm495_vm6, %vm491_vm5  ;;  %vm292_vm14 = vcmp.eq.s32.totalorder %v3178_v37, %v3785_v49  ;;  %vm551_vm5 = vcmp.eq.s32.totalorder %v3634_v51, %v3436_v35 }
  0x8a   : > { %vm2465_vm0 = vmpackc.low %vm559_vm9, %vm555_vm8  ;;  %2450 = vmatpush.bf16.msk.msra.mxu0 %vm2449_vm13, %v4525_v44  ;;  %vm360_vm8 = vcmp.eq.s32.totalorder %v3198_v40, %v3785_v49  ;;  %vm475_vm13 = vcmp.eq.s32.totalorder %v4550_v23, %v3436_v35  ;;  %v4553_v40 = vld [vmem:[#allocation51_spill] sm:$0xff] }
  0x8b   : > { %2496 = vmatpush.bf16.msk.msra.mxu3 %vm2495_vm7, %v4525_v44  ;;  %vm2497_vm3 = vmpackc.low %vm368_vm12, %vm364_vm11  ;;  %2466 = vmatpush.bf16.msk.msra.mxu1 %vm2465_vm0, %v4525_v44  ;;  %vm356_vm7 = vcmp.eq.s32.totalorder %v3195_v39, %v3785_v49  ;;  %vm288_vm11 = vcmp.eq.s32.totalorder %v3249_v46, %v3785_v49  ;;  %vm539_vm0 = vcmp.eq.s32.totalorder %v3687_v6, %v3436_v35 }
  0x8c   : > { %vm2483_vm6 = vmpackc.low %vm296_vm15, %vm292_vm14  ;;  %vm479_vm14 = vcmp.eq.s32.totalorder %v4551_v52, %v3436_v35 }
  0x8d   : > { %2482 = vmatpush.bf16.msk.msra.mxu2 %vm2481_vm10, %v4525_v44  ;;  %vm2451_vm9 = vmpackc.low %vm487_vm2, %vm483_vm1  ;;  %vm284_vm10 = vcmp.eq.s32.totalorder %v3246_v45, %v3785_v49  ;;  %vm543_vm1 = vcmp.eq.s32.totalorder %v3690_v8, %v3436_v35 }
  0x8e   : > { %vm2467_vm12 = vmpackc.low %vm551_vm5, %vm547_vm4  ;;  %2452 = vmatpush.bf16.msk.msra.mxu0 %vm2451_vm9, %v4525_v44  ;;  %vm352_vm4 = vcmp.eq.s32.totalorder %v3266_v48, %v3785_v49  ;;  %v4554_v48 = vld [vmem:[#allocation57_spill] sm:$0xff] }
  0x8f   : > { %2498 = vmatpush.bf16.msk.msra.mxu3 %vm2497_vm3, %v4525_v44  ;;  %vm2499_vm15 = vmpackc.low %vm360_vm8, %vm356_vm7  ;;  %2468 = vmatpush.bf16.msk.msra.mxu1 %vm2467_vm12, %v4525_v44  ;;  %vm348_vm3 = vcmp.eq.s32.totalorder %v3263_v47, %v3785_v49  ;;  %vm280_vm7 = vcmp.eq.s32.totalorder %v3317_v54, %v3785_v49  ;;  %vm531_vm12 = vcmp.eq.s32.totalorder %v3733_v17, %v3436_v35  ;;  %v4555_v47 = vld [vmem:[#allocation58_spill] sm:$0xff] }
  0x90   : > { %1539 = vmatmul.bf16.gmra.mxu0 %v3894_v30  ;;  %1577 = vmatmul.bf16.gmra.mxu2 %v3667_v32  ;;  %vm2485_vm2 = vmpackc.low %vm288_vm11, %vm284_vm10  ;;  %vm471_vm10 = vcmp.eq.s32.totalorder %v4553_v40, %v3436_v35 }
  0x91   : > { %2484 = vmatpush.bf16.msk.msra.mxu2 %vm2483_vm6, %v4525_v44  ;;  %1558 = vmatmul.bf16.gmra.mxu1 %v3658_v26  ;;  %vm2453_vm5 = vmpackc.low %vm479_vm14, %vm475_vm13  ;;  %vm276_vm6 = vcmp.eq.s32.totalorder %v3314_v53, %v3785_v49  ;;  %vm535_vm13 = vcmp.eq.s32.totalorder %v3736_v24, %v3436_v35 }
  0x92   : > { %1596 = vmatmul.bf16.gmra.mxu3 %v3669_v31  ;;  %vm2469_vm8 = vmpackc.low %vm543_vm1, %vm539_vm0  ;;  %v4552_v31 = vld [vmem:[#allocation50_spill] sm:$0xff]  ;;  %2454 = vmatpush.bf16.msk.msra.mxu0 %vm2453_vm5, %v4525_v44  ;;  %vm344_vm0 = vcmp.eq.s32.totalorder %v3334_v56, %v3785_v49  ;;  %vm459_vm5 = vcmp.eq.s32.totalorder %v4554_v48, %v3436_v35  ;;  %v3974_v56 = vperm.slane %v4535_v50, 3  ;;  %v4557_v50 = vld [vmem:[#allocation15_spill] sm:$0xff] }
  0x93   : > { %2500 = vmatpush.bf16.msk.msra.mxu3 %vm2499_vm15, %v4525_v44  ;;  %vm467_vm9 = vcmp.eq.s32.totalorder %v4552_v31, %v3436_v35  ;;  %vm2501_vm11 = vmpackc.low %vm352_vm4, %vm348_vm3  ;;  %2470 = vmatpush.bf16.msk.msra.mxu1 %vm2469_vm8, %v4525_v44  ;;  %vm340_vm15 = vcmp.eq.s32.totalorder %v3331_v55, %v3785_v49  ;;  %vm272_vm3 = vcmp.eq.s32.totalorder %v4536_v16, %v3785_v49 }
  0x94   : > { %vm2487_vm14 = vmpackc.low %vm280_vm7, %vm276_vm6  ;;  %vm463_vm6 = vcmp.eq.s32.totalorder %v4555_v47, %v3436_v35  ;;  %vm523_vm8 = vcmp.eq.s32.totalorder %v3769_v25, %v3436_v35 }
  0x95   : > { %2486 = vmatpush.bf16.msk.msra.mxu2 %vm2485_vm2, %v4525_v44  ;;  %vm2455_vm1 = vmpackc.low %vm471_vm10, %vm467_vm9  ;;  %vm268_vm2 = vcmp.eq.s32.totalorder %v2971_v1, %v3785_v49  ;;  %vm527_vm9 = vcmp.eq.s32.totalorder %v3772_v20, %v3436_v35  ;;  %v4556_v35 = vld [vmem:[#allocation13_spill] sm:$0xff] }
  0x96   : > { %vm2471_vm4 = vmpackc.low %vm535_vm13, %vm531_vm12  ;;  %2456 = vmatpush.bf16.msk.msra.mxu0 %vm2455_vm1, %v4525_v44  ;;  %vm336_vm12 = vcmp.eq.s32.totalorder %v3399_v63, %v3785_v49  ;;  %vm452_vm1 = vcmp.eq.s32.totalorder %v4556_v35, %v3785_v49  ;;  %v4558_v63 = vld [vmem:[#allocation60_spill] sm:$0xff] }
  0x97   : > { %2502 = vmatpush.bf16.msk.msra.mxu3 %vm2501_vm11, %v4525_v44  ;;  %vm2503_vm7 = vmpackc.low %vm344_vm0, %vm340_vm15  ;;  %2472 = vmatpush.bf16.msk.msra.mxu1 %vm2471_vm4, %v4525_v44  ;;  %vm332_vm11 = vcmp.eq.s32.totalorder %v3396_v62, %v3785_v49  ;;  %vm584_vm15 = vcmp.eq.s32.totalorder %v3475_v9, %v3785_v49  ;;  %vm516_vm4 = vcmp.eq.s32.totalorder %v4537_v42, %v3785_v49  ;;  %v4559_v62 = vld [vmem:[#allocation20_spill] sm:$0xff] }
  0x98   : > { %vm2489_vm10 = vmpackc.low %vm272_vm3, %vm268_vm2  ;;  %vm456_vm2 = vcmp.eq.s32.totalorder %v4557_v50, %v3785_v49 }
  0x99   : > { %2488 = vmatpush.bf16.msk.msra.mxu2 %vm2487_vm14, %v4525_v44  ;;  %vm2457_vm13 = vmpackc.low %vm463_vm6, %vm459_vm5  ;;  %vm580_vm14 = vcmp.eq.s32.totalorder %v3472_v10, %v3785_v49  ;;  %vm520_vm5 = vcmp.eq.s32.totalorder %v4538_v0, %v3785_v49 }
  0x9a   : > { %vm2473_vm0 = vmpackc.low %vm527_vm9, %vm523_vm8  ;;  %2458 = vmatpush.bf16.msk.msra.mxu0 %vm2457_vm13, %v4525_v44  ;;  %vm329_vm8 = vcmp.eq.s32.totalorder %v2977_v3, %v3974_v56  ;;  %vm444_vm13 = vcmp.eq.s32.totalorder %v4559_v62, %v3785_v49  ;;  %v4561_v3 = vld [vmem:[#allocation26_spill] sm:$0xff] }
  0x9b   : > { %2504 = vmatpush.bf16.msk.msra.mxu3 %vm2503_vm7, %v4525_v44  ;;  %vm2505_vm3 = vmpackc.low %vm336_vm12, %vm332_vm11  ;;  %2474 = vmatpush.bf16.msk.msra.mxu1 %vm2473_vm0, %v4525_v44  ;;  %vm325_vm7 = vcmp.eq.s32.totalorder %v2974_v2, %v3974_v56  ;;  %vm576_vm11 = vcmp.eq.s32.totalorder %v3520_v19, %v3785_v49  ;;  %v4560_v2 = vld [vmem:[#allocation21_spill] sm:$0xff]  ;;  %vm508_vm0 = vcmp.eq.s32.totalorder %v4539_v57, %v3785_v49 }
  0x9c   : > { %vm2539_vm6 = vmpackc.low %vm584_vm15, %vm580_vm14  ;;  %vm448_vm14 = vcmp.eq.s32.totalorder %v4560_v2, %v3785_v49 }
  0x9d   : > { %2490 = vmatpush.bf16.msk.msra.mxu2 %vm2489_vm10, %v4525_v44  ;;  %vm2507_vm9 = vmpackc.low %vm456_vm2, %vm452_vm1  ;;  %vm572_vm10 = vcmp.eq.s32.totalorder %v3517_v18, %v3785_v49  ;;  %vm512_vm1 = vcmp.eq.s32.totalorder %v4540_v59, %v3785_v49 }
  0x9e   : > { %vm2523_vm12 = vmpackc.low %vm520_vm5, %vm516_vm4  ;;  %2508 = vmatpush.bf16.msk.msrb.mxu0 %vm2507_vm9, %v4525_v44  ;;  %vm321_vm4 = vcmp.eq.s32.totalorder %v3006_v13, %v3974_v56  ;;  %vm436_vm9 = vcmp.eq.s32.totalorder %v4561_v3, %v3785_v49  ;;  %v4563_v13 = vld [vmem:[#allocation30_spill] sm:$0xff] }
  0x9f   : > { %2506 = vmatpush.bf16.msk.msra.mxu3 %vm2505_vm3, %v4525_v44  ;;  %vm2555_vm15 = vmpackc.low %vm329_vm8, %vm325_vm7  ;;  %2524 = vmatpush.bf16.msk.msrb.mxu1 %vm2523_vm12, %v4525_v44  ;;  %vm317_vm3 = vcmp.eq.s32.totalorder %v3000_v11, %v3974_v56  ;;  %vm568_vm7 = vcmp.eq.s32.totalorder %v3566_v27, %v3785_v49  ;;  %v4562_v11 = vld [vmem:[#allocation27_spill] sm:$0xff]  ;;  %vm500_vm12 = vcmp.eq.s32.totalorder %v4541_v58, %v3785_v49 }
  0xa0   : > { %1610 = vmatmul.bf16.vlgmr.msra.gmra.mxu0 %v4558_v63  ;;  %1648 = vmatmul.bf16.vlgmr.msra.gmra.mxu2 %v3488_v60  ;;  %vm2541_vm2 = vmpackc.low %vm576_vm11, %vm572_vm10  ;;  %vm440_vm10 = vcmp.eq.s32.totalorder %v4562_v11, %v3785_v49 }
  0xa1   : > { %2540 = vmatpush.bf16.msk.msrb.mxu2 %vm2539_vm6, %v4525_v44  ;;  %1629 = vmatmul.bf16.vlgmr.msra.gmra.mxu1 %v3808_v12  ;;  %vm2509_vm5 = vmpackc.low %vm448_vm14, %vm444_vm13  ;;  %vm564_vm6 = vcmp.eq.s32.totalorder %v3563_v7, %v3785_v49  ;;  %vm504_vm13 = vcmp.eq.s32.totalorder %v4542_v5, %v3785_v49 }
  0xa2   : > { %1667 = vmatmul.bf16.vlgmr.msra.gmra.mxu3 %v3497_v61  ;;  %vm2525_vm8 = vmpackc.low %vm512_vm1, %vm508_vm0  ;;  %2510 = vmatpush.bf16.msk.msrb.mxu0 %vm2509_vm5, %v4525_v44  ;;  %vm313_vm0 = vcmp.eq.s32.totalorder %v3051_v22, %v3974_v56  ;;  %vm428_vm5 = vcmp.eq.s32.totalorder %v3155_v33, %v3785_v49  ;;  %v4565_v22 = vld [vmem:[#allocation37_spill] sm:$0xff] }
  0xa3   : > { %2556 = vmatpush.bf16.msk.msrb.mxu3 %vm2555_vm15, %v4525_v44  ;;  %vm2557_vm11 = vmpackc.low %vm321_vm4, %vm317_vm3  ;;  %2526 = vmatpush.bf16.msk.msrb.mxu1 %vm2525_vm8, %v4525_v44  ;;  %vm309_vm15 = vcmp.eq.s32.totalorder %v3048_v21, %v3974_v56  ;;  %vm560_vm3 = vcmp.eq.s32.totalorder %v3602_v36, %v3785_v49  ;;  %vm492_vm8 = vcmp.eq.s32.totalorder %v4544_v14, %v3785_v49  ;;  %v4564_v21 = vld [vmem:[#allocation31_spill] sm:$0xff] }
  0xa4   : > { %vm2543_vm14 = vmpackc.low %vm568_vm7, %vm564_vm6  ;;  %vm432_vm6 = vcmp.eq.s32.totalorder %v3158_v34, %v3785_v49 }
  0xa5   : > { %2542 = vmatpush.bf16.msk.msrb.mxu2 %vm2541_vm2, %v4525_v44  ;;  %vm2511_vm1 = vmpackc.low %vm440_vm10, %vm436_vm9  ;;  %vm556_vm2 = vcmp.eq.s32.totalorder %v3599_v28, %v3785_v49  ;;  %vm496_vm9 = vcmp.eq.s32.totalorder %v4545_v4, %v3785_v49 }
  0xa6   : > { %vm2527_vm4 = vmpackc.low %vm504_vm13, %vm500_vm12  ;;  %2512 = vmatpush.bf16.msk.msrb.mxu0 %vm2511_vm1, %v4525_v44  ;;  %vm305_vm12 = vcmp.eq.s32.totalorder %v4564_v21, %v3974_v56  ;;  %vm420_vm1 = vcmp.eq.s32.totalorder %v4565_v22, %v3785_v49  ;;  %v4567_v21 = vld [vmem:[#allocation63_spill] sm:$0xff] }
  0xa7   : > { %2558 = vmatpush.bf16.msk.msrb.mxu3 %vm2557_vm11, %v4525_v44  ;;  %vm2559_vm7 = vmpackc.low %vm313_vm0, %vm309_vm15  ;;  %2528 = vmatpush.bf16.msk.msrb.mxu1 %vm2527_vm4, %v4525_v44  ;;  %vm301_vm11 = vcmp.eq.s32.totalorder %v4563_v13, %v3974_v56  ;;  %vm552_vm15 = vcmp.eq.s32.totalorder %v3634_v51, %v3785_v49  ;;  %v4566_v13 = vld [vmem:[#allocation38_spill] sm:$0xff]  ;;  %vm484_vm4 = vcmp.eq.s32.totalorder %v4548_v29, %v3785_v49 }
  0xa8   : > { %vm2545_vm10 = vmpackc.low %vm560_vm3, %vm556_vm2  ;;  %vm424_vm2 = vcmp.eq.s32.totalorder %v4566_v13, %v3785_v49 }
  0xa9   : > { %2544 = vmatpush.bf16.msk.msrb.mxu2 %vm2543_vm14, %v4525_v44  ;;  %vm2513_vm13 = vmpackc.low %vm432_vm6, %vm428_vm5  ;;  %vm548_vm14 = vcmp.eq.s32.totalorder %v3631_v43, %v3785_v49  ;;  %vm488_vm5 = vcmp.eq.s32.totalorder %v4549_v15, %v3785_v49 }
  0xaa   : > { %vm2529_vm0 = vmpackc.low %vm496_vm9, %vm492_vm8  ;;  %2514 = vmatpush.bf16.msk.msrb.mxu0 %vm2513_vm13, %v4525_v44  ;;  %vm297_vm8 = vcmp.eq.s32.totalorder %v3181_v38, %v3974_v56  ;;  %v4569_v38 = vld [vmem:[#allocation44_spill] sm:$0xff] }
  0xab   : > { %2560 = vmatpush.bf16.msk.msrb.mxu3 %vm2559_vm7, %v4525_v44  ;;  %vm2561_vm3 = vmpackc.low %vm305_vm12, %vm301_vm11  ;;  %2530 = vmatpush.bf16.msk.msrb.mxu1 %vm2529_vm0, %v4525_v44  ;;  %vm293_vm7 = vcmp.eq.s32.totalorder %v3178_v37, %v3974_v56  ;;  %vm544_vm11 = vcmp.eq.s32.totalorder %v3690_v8, %v3785_v49  ;;  %v4568_v37 = vld [vmem:[#allocation43_spill] sm:$0xff]  ;;  %vm476_vm0 = vcmp.eq.s32.totalorder %v4550_v23, %v3785_v49 }
  0xac   : > { %vm2547_vm6 = vmpackc.low %vm552_vm15, %vm548_vm14  ;;  %vm412_vm13 = vcmp.eq.s32.totalorder %v4568_v37, %v3785_v49  ;;  %vm416_vm14 = vcmp.eq.s32.totalorder %v4569_v38, %v3785_v49 }
  0xad   : > { %2546 = vmatpush.bf16.msk.msrb.mxu2 %vm2545_vm10, %v4525_v44  ;;  %vm2515_vm9 = vmpackc.low %vm424_vm2, %vm420_vm1  ;;  %vm540_vm10 = vcmp.eq.s32.totalorder %v3687_v6, %v3785_v49  ;;  %vm480_vm1 = vcmp.eq.s32.totalorder %v4551_v52, %v3785_v49 }
  0xae   : > { %vm2531_vm12 = vmpackc.low %vm488_vm5, %vm484_vm4  ;;  %2516 = vmatpush.bf16.msk.msrb.mxu0 %vm2515_vm9, %v4525_v44  ;;  %vm289_vm4 = vcmp.eq.s32.totalorder %v3249_v46, %v3974_v56  ;;  %v4572_v46 = vld [vmem:[#allocation55_spill] sm:$0xff] }
  0xaf   : > { %2562 = vmatpush.bf16.msk.msrb.mxu3 %vm2561_vm3, %v4525_v44  ;;  %vm2563_vm15 = vmpackc.low %vm297_vm8, %vm293_vm7  ;;  %2532 = vmatpush.bf16.msk.msrb.mxu1 %vm2531_vm12, %v4525_v44  ;;  %vm285_vm3 = vcmp.eq.s32.totalorder %v3246_v45, %v3974_v56  ;;  %vm536_vm7 = vcmp.eq.s32.totalorder %v3736_v24, %v3785_v49  ;;  %v4571_v45 = vld [vmem:[#allocation49_spill] sm:$0xff]  ;;  %vm468_vm12 = vcmp.eq.s32.totalorder %v4552_v31, %v3785_v49 }
  0xb0   : > { %1615 = vmatmul.bf16.gmra.mxu0 %v4567_v21  ;;  %1653 = vmatmul.bf16.gmra.mxu2 %v3658_v26  ;;  %vm2549_vm2 = vmpackc.low %vm544_vm11, %vm540_vm10  ;;  %vm408_vm10 = vcmp.eq.s32.totalorder %v4571_v45, %v3785_v49 }
  0xb1   : > { %2548 = vmatpush.bf16.msk.msrb.mxu2 %vm2547_vm6, %v4525_v44  ;;  %1634 = vmatmul.bf16.gmra.mxu1 %v3894_v30  ;;  %vm2517_vm5 = vmpackc.low %vm416_vm14, %vm412_vm13  ;;  %vm532_vm6 = vcmp.eq.s32.totalorder %v3733_v17, %v3785_v49  ;;  %vm472_vm13 = vcmp.eq.s32.totalorder %v4553_v40, %v3785_v49 }
  0xb2   : > { %1672 = vmatmul.bf16.gmra.mxu3 %v3667_v32  ;;  %vm2533_vm8 = vmpackc.low %vm480_vm1, %vm476_vm0  ;;  %v4570_v32 = vld [vmem:[#allocation48_spill] sm:$0xff]  ;;  %2518 = vmatpush.bf16.msk.msrb.mxu0 %vm2517_vm5, %v4525_v44  ;;  %vm281_vm0 = vcmp.eq.s32.totalorder %v3317_v54, %v3974_v56  ;;  %vm396_vm5 = vcmp.eq.s32.totalorder %v4572_v46, %v3785_v49 }
  0xb3   : > { %2564 = vmatpush.bf16.msk.msrb.mxu3 %vm2563_vm15, %v4525_v44  ;;  %vm404_vm9 = vcmp.eq.s32.totalorder %v4570_v32, %v3785_v49  ;;  %vm2565_vm11 = vmpackc.low %vm289_vm4, %vm285_vm3  ;;  %2534 = vmatpush.bf16.msk.msrb.mxu1 %vm2533_vm8, %v4525_v44  ;;  %vm277_vm15 = vcmp.eq.s32.totalorder %v3314_v53, %v3974_v56  ;;  %vm528_vm3 = vcmp.eq.s32.totalorder %v3772_v20, %v3785_v49  ;;  %v4573_v53 = vld [vmem:[#allocation56_spill] sm:$0xff] }
  0xb4   : > { %vm2551_vm14 = vmpackc.low %vm536_vm7, %vm532_vm6  ;;  %vm400_vm6 = vcmp.eq.s32.totalorder %v4573_v53, %v3785_v49  ;;  %vm460_vm8 = vcmp.eq.s32.totalorder %v4554_v48, %v3785_v49  ;;  %v4579_v54 = vld [vmem:[#allocation24_spill] sm:$0xff] }
  0xb5   : > { %2550 = vmatpush.bf16.msk.msrb.mxu2 %vm2549_vm2, %v4525_v44  ;;  %vm2519_vm1 = vmpackc.low %vm408_vm10, %vm404_vm9  ;;  %vm524_vm2 = vcmp.eq.s32.totalorder %v3769_v25, %v3785_v49  ;;  %vm464_vm9 = vcmp.eq.s32.totalorder %v4555_v47, %v3785_v49  ;;  %v4574_v49 = vld [vmem:[#allocation11_spill] sm:$0xff] }
  0xb6   : > { %vm2535_vm4 = vmpackc.low %vm472_vm13, %vm468_vm12  ;;  %2520 = vmatpush.bf16.msk.msrb.mxu0 %vm2519_vm1, %v4525_v44  ;;  %vm273_vm12 = vcmp.eq.s32.totalorder %v4536_v16, %v3974_v56  ;;  %vm389_vm1 = vcmp.eq.s32.totalorder %v4574_v49, %v3974_v56 }
  0xb7   : > { %2566 = vmatpush.bf16.msk.msrb.mxu3 %vm2565_vm11, %v4525_v44  ;;  %vm2567_vm7 = vmpackc.low %vm281_vm0, %vm277_vm15  ;;  %2536 = vmatpush.bf16.msk.msrb.mxu1 %vm2535_vm4, %v4525_v44  ;;  %vm269_vm11 = vcmp.eq.s32.totalorder %v2971_v1, %v3974_v56  ;;  %vm521_vm15 = vcmp.eq.s32.totalorder %v4538_v0, %v3974_v56  ;;  %v4575_v1 = vld [vmem:[#allocation12_spill] sm:$0xff]  ;;  %vm453_vm4 = vcmp.eq.s32.totalorder %v4556_v35, %v3974_v56 }
  0xb8   : > { %vm2553_vm10 = vmpackc.low %vm528_vm3, %vm524_vm2  ;;  %vm393_vm2 = vcmp.eq.s32.totalorder %v4575_v1, %v3974_v56 }
  0xb9   : > { %2552 = vmatpush.bf16.msk.msrb.mxu2 %vm2551_vm14, %v4525_v44  ;;  %vm2521_vm13 = vmpackc.low %vm400_vm6, %vm396_vm5  ;;  %vm517_vm14 = vcmp.eq.s32.totalorder %v4537_v42, %v3974_v56  ;;  %vm457_vm5 = vcmp.eq.s32.totalorder %v4557_v50, %v3974_v56  ;;  %v4578_v42 = vld [vmem:[#allocation59_spill] sm:$0xff] }
  0xba   : > { %vm2537_vm0 = vmpackc.low %vm464_vm9, %vm460_vm8  ;;  %2522 = vmatpush.bf16.msk.msrb.mxu0 %vm2521_vm13, %v4525_v44  ;;  %vm585_vm8 = vcmp.eq.s32.totalorder %v3475_v9, %v3974_v56  ;;  %v4577_v9 = vld [vmem:[#allocation19_spill] sm:$0xff] }
  0xbb   : > { %2568 = vmatpush.bf16.msk.msrb.mxu3 %vm2567_vm7, %v4525_v44  ;;  %vm2569_vm3 = vmpackc.low %vm273_vm12, %vm269_vm11  ;;  %2538 = vmatpush.bf16.msk.msrb.mxu1 %vm2537_vm0, %v4525_v44  ;;  %vm581_vm7 = vcmp.eq.s32.totalorder %v3472_v10, %v3974_v56  ;;  %vm513_vm11 = vcmp.eq.s32.totalorder %v4540_v59, %v3974_v56  ;;  %v4576_v10 = vld [vmem:[#allocation18_spill] sm:$0xff]  ;;  %vm445_vm0 = vcmp.eq.s32.totalorder %v4559_v62, %v3974_v56 }
  0xbc   : > { %vm2603_vm6 = vmpackc.low %vm521_vm15, %vm517_vm14  ;;  %vm381_vm13 = vcmp.eq.s32.totalorder %v4576_v10, %v3974_v56  ;;  %vm385_vm14 = vcmp.eq.s32.totalorder %v4577_v9, %v3974_v56 }
  0xbd   : > { %2554 = vmatpush.bf16.msk.msrb.mxu2 %vm2553_vm10, %v4525_v44  ;;  %vm2571_vm9 = vmpackc.low %vm393_vm2, %vm389_vm1  ;;  %vm509_vm10 = vcmp.eq.s32.totalorder %v4539_v57, %v3974_v56  ;;  %vm449_vm1 = vcmp.eq.s32.totalorder %v4560_v2, %v3974_v56 }
  0xbe   : > { %2572 = vmatpush.bf16.msk.msra.mxu0 %vm2571_vm9, %v4525_v44  ;;  %vm2587_vm12 = vmpackc.low %vm457_vm5, %vm453_vm4  ;;  %vm577_vm4 = vcmp.eq.s32.totalorder %v3520_v19, %v3974_v56  ;;  %vm373_vm9 = vcmp.eq.s32.totalorder %v4579_v54, %v3974_v56 }
  0xbf   : > { %2570 = vmatpush.bf16.msk.msrb.mxu3 %vm2569_vm3, %v4525_v44  ;;  %vm2619_vm15 = vmpackc.low %vm585_vm8, %vm581_vm7  ;;  %2588 = vmatpush.bf16.msk.msra.mxu1 %vm2587_vm12, %v4525_v44  ;;  %vm573_vm3 = vcmp.eq.s32.totalorder %v3517_v18, %v3974_v56  ;;  %vm505_vm7 = vcmp.eq.s32.totalorder %v4542_v5, %v3974_v56  ;;  %vm437_vm12 = vcmp.eq.s32.totalorder %v4561_v3, %v3974_v56  ;;  %v4581_v5 = vld [vmem:[#allocation32_spill] sm:$0xff] }
  0xc0   : > { %1724 = vmatmul.bf16.vlgmr.msrb.gmra.mxu2 %v3808_v12  ;;  %1686 = vmatmul.bf16.vlgmr.msrb.gmra.mxu0 %v4578_v42  ;;  %vm2605_vm2 = vmpackc.low %vm513_vm11, %vm509_vm10 }
  0xc1   : > { %2604 = vmatpush.bf16.msk.msra.mxu2 %vm2603_vm6, %v4525_v44  ;;  %1705 = vmatmul.bf16.vlgmr.msrb.gmra.mxu1 %v4558_v63  ;;  %vm2573_vm5 = vmpackc.low %vm385_vm14, %vm381_vm13  ;;  %vm501_vm6 = vcmp.eq.s32.totalorder %v4541_v58, %v3974_v56  ;;  %vm441_vm13 = vcmp.eq.s32.totalorder %v4562_v11, %v3974_v56 }
  0xc2   : > { %1743 = vmatmul.bf16.vlgmr.msrb.gmra.mxu3 %v3488_v60  ;;  %2574 = vmatpush.bf16.msk.msra.mxu0 %vm2573_vm5, %v4525_v44  ;;  %vm2589_vm8 = vmpackc.low %vm449_vm1, %vm445_vm0  ;;  %v4580_v60 = vld [vmem:[#allocation25_spill] sm:$0xff]  ;;  %vm569_vm0 = vcmp.eq.s32.totalorder %v3566_v27, %v3974_v56  ;;  %vm365_vm5 = vcmp.eq.s32.totalorder %v4581_v5, %v3974_v56 }
  0xc3   : > { %2620 = vmatpush.bf16.msk.msra.mxu3 %vm2619_vm15, %v4525_v44  ;;  %vm377_vm10 = vcmp.eq.s32.totalorder %v4580_v60, %v3974_v56  ;;  %vm2621_vm11 = vmpackc.low %vm577_vm4, %vm573_vm3  ;;  %2590 = vmatpush.bf16.msk.msra.mxu1 %vm2589_vm8, %v4525_v44  ;;  %vm565_vm15 = vcmp.eq.s32.totalorder %v3563_v7, %v3974_v56  ;;  %vm497_vm3 = vcmp.eq.s32.totalorder %v4545_v4, %v3974_v56  ;;  %v4582_v4 = vld [vmem:[#allocation36_spill] sm:$0xff] }
  0xc4   : > { %vm2607_vm14 = vmpackc.low %vm505_vm7, %vm501_vm6  ;;  %vm369_vm6 = vcmp.eq.s32.totalorder %v4547_v41, %v3974_v56  ;;  %vm429_vm8 = vcmp.eq.s32.totalorder %v3155_v33, %v3974_v56 }
  0xc5   : > { %2606 = vmatpush.bf16.msk.msra.mxu2 %vm2605_vm2, %v4525_v44  ;;  %vm2575_vm1 = vmpackc.low %vm377_vm10, %vm373_vm9  ;;  %vm493_vm2 = vcmp.eq.s32.totalorder %v4544_v14, %v3974_v56  ;;  %vm433_vm9 = vcmp.eq.s32.totalorder %v3158_v34, %v3974_v56  ;;  %v4583_v14 = vld [vmem:[#allocation41_spill] sm:$0xff] }
  0xc6   : > { %2576 = vmatpush.bf16.msk.msra.mxu0 %vm2575_vm1, %v4525_v44  ;;  %vm2591_vm4 = vmpackc.low %vm441_vm13, %vm437_vm12  ;;  %vm561_vm12 = vcmp.eq.s32.totalorder %v3602_v36, %v3974_v56  ;;  %vm357_vm1 = vcmp.eq.s32.totalorder %v3195_v39, %v3974_v56 }
  0xc7   : > { %2622 = vmatpush.bf16.msk.msra.mxu3 %vm2621_vm11, %v4525_v44  ;;  %vm2623_vm7 = vmpackc.low %vm569_vm0, %vm565_vm15  ;;  %2592 = vmatpush.bf16.msk.msra.mxu1 %vm2591_vm4, %v4525_v44  ;;  %vm557_vm11 = vcmp.eq.s32.totalorder %v3599_v28, %v3974_v56  ;;  %vm489_vm15 = vcmp.eq.s32.totalorder %v4549_v15, %v3974_v56  ;;  %vm421_vm4 = vcmp.eq.s32.totalorder %v4565_v22, %v3974_v56  ;;  %v4584_v15 = vld [vmem:[#allocation42_spill] sm:$0xff] }
  0xc8   : > { %vm2609_vm10 = vmpackc.low %vm497_vm3, %vm493_vm2  ;;  %vm361_vm2 = vcmp.eq.s32.totalorder %v4582_v4, %v3974_v56 }
  0xc9   : > { %2608 = vmatpush.bf16.msk.msra.mxu2 %vm2607_vm14, %v4525_v44  ;;  %vm2577_vm13 = vmpackc.low %vm369_vm6, %vm365_vm5  ;;  %vm485_vm14 = vcmp.eq.s32.totalorder %v4548_v29, %v3974_v56  ;;  %vm425_vm5 = vcmp.eq.s32.totalorder %v4566_v13, %v3974_v56  ;;  %v4585_v29 = vld [vmem:[#allocation62_spill] sm:$0xff] }
  0xca   : > { %2578 = vmatpush.bf16.msk.msra.mxu0 %vm2577_vm13, %v4525_v44  ;;  %vm2593_vm0 = vmpackc.low %vm433_vm9, %vm429_vm8  ;;  %vm553_vm8 = vcmp.eq.s32.totalorder %v3634_v51, %v3974_v56  ;;  %vm349_vm13 = vcmp.eq.s32.totalorder %v4583_v14, %v3974_v56 }
  0xcb   : > { %2624 = vmatpush.bf16.msk.msra.mxu3 %vm2623_vm7, %v4525_v44  ;;  %vm2625_vm3 = vmpackc.low %vm561_vm12, %vm557_vm11  ;;  %2594 = vmatpush.bf16.msk.msra.mxu1 %vm2593_vm0, %v4525_v44  ;;  %vm549_vm7 = vcmp.eq.s32.totalorder %v3631_v43, %v3974_v56  ;;  %vm481_vm11 = vcmp.eq.s32.totalorder %v4551_v52, %v3974_v56  ;;  %vm413_vm0 = vcmp.eq.s32.totalorder %v4568_v37, %v3974_v56 }
  0xcc   : > { %vm2611_vm6 = vmpackc.low %vm489_vm15, %vm485_vm14  ;;  %vm353_vm14 = vcmp.eq.s32.totalorder %v4584_v15, %v3974_v56 }
  0xcd   : > { %2610 = vmatpush.bf16.msk.msra.mxu2 %vm2609_vm10, %v4525_v44  ;;  %vm2579_vm9 = vmpackc.low %vm361_vm2, %vm357_vm1  ;;  %vm477_vm10 = vcmp.eq.s32.totalorder %v4550_v23, %v3974_v56  ;;  %vm417_vm1 = vcmp.eq.s32.totalorder %v4569_v38, %v3974_v56 }
  0xce   : > { %2580 = vmatpush.bf16.msk.msra.mxu0 %vm2579_vm9, %v4525_v44  ;;  %vm2595_vm12 = vmpackc.low %vm425_vm5, %vm421_vm4  ;;  %vm545_vm4 = vcmp.eq.s32.totalorder %v3690_v8, %v3974_v56  ;;  %vm341_vm9 = vcmp.eq.s32.totalorder %v3331_v55, %v3974_v56 }
  0xcf   : > { %2626 = vmatpush.bf16.msk.msra.mxu3 %vm2625_vm3, %v4525_v44  ;;  %vm2627_vm15 = vmpackc.low %vm553_vm8, %vm549_vm7  ;;  %2596 = vmatpush.bf16.msk.msra.mxu1 %vm2595_vm12, %v4525_v44  ;;  %vm541_vm3 = vcmp.eq.s32.totalorder %v3687_v6, %v3974_v56  ;;  %vm473_vm7 = vcmp.eq.s32.totalorder %v4553_v40, %v3974_v56  ;;  %vm405_vm12 = vcmp.eq.s32.totalorder %v4570_v32, %v3974_v56  ;;  %v4588_v32 = vld [vmem:[#allocation54_spill] sm:$0xff] }
  0xd0   : > { %1729 = vmatmul.bf16.gmra.mxu2 %v3894_v30  ;;  %1691 = vmatmul.bf16.gmra.mxu0 %v4585_v29  ;;  %vm2613_vm2 = vmpackc.low %vm481_vm11, %vm477_vm10 }
  0xd1   : > { %2612 = vmatpush.bf16.msk.msra.mxu2 %vm2611_vm6, %v4525_v44  ;;  %1710 = vmatmul.bf16.gmra.mxu1 %v4567_v21  ;;  %vm2581_vm5 = vmpackc.low %vm353_vm14, %vm349_vm13  ;;  %vm469_vm6 = vcmp.eq.s32.totalorder %v4552_v31, %v3974_v56  ;;  %vm409_vm13 = vcmp.eq.s32.totalorder %v4571_v45, %v3974_v56  ;;  %v4587_v31 = vld [vmem:[#allocation53_spill] sm:$0xff] }
  0xd2   : > { %1748 = vmatmul.bf16.gmra.mxu3 %v3658_v26  ;;  %2582 = vmatpush.bf16.msk.msra.mxu0 %vm2581_vm5, %v4525_v44  ;;  %vm2597_vm8 = vmpackc.low %vm417_vm1, %vm413_vm0  ;;  %v4586_v26 = vld [vmem:[#allocation47_spill] sm:$0xff]  ;;  %vm537_vm0 = vcmp.eq.s32.totalorder %v3736_v24, %v3974_v56  ;;  %vm333_vm5 = vcmp.eq.s32.totalorder %v4587_v31, %v3974_v56 }
  0xd3   : > { %2628 = vmatpush.bf16.msk.msra.mxu3 %vm2627_vm15, %v4525_v44  ;;  %vm345_vm10 = vcmp.eq.s32.totalorder %v4586_v26, %v3974_v56  ;;  %vm2629_vm11 = vmpackc.low %vm545_vm4, %vm541_vm3  ;;  %2598 = vmatpush.bf16.msk.msra.mxu1 %vm2597_vm8, %v4525_v44  ;;  %vm533_vm15 = vcmp.eq.s32.totalorder %v3733_v17, %v3974_v56  ;;  %vm465_vm3 = vcmp.eq.s32.totalorder %v4555_v47, %v3974_v56 }
  0xd4   : > { %vm2615_vm14 = vmpackc.low %vm473_vm7, %vm469_vm6  ;;  %vm337_vm6 = vcmp.eq.s32.totalorder %v4588_v32, %v3974_v56  ;;  %vm397_vm8 = vcmp.eq.s32.totalorder %v4572_v46, %v3974_v56 }
  0xd5   : > { %2614 = vmatpush.bf16.msk.msra.mxu2 %vm2613_vm2, %v4525_v44  ;;  %vm2583_vm1 = vmpackc.low %vm345_vm10, %vm341_vm9  ;;  %vm461_vm2 = vcmp.eq.s32.totalorder %v4554_v48, %v3974_v56  ;;  %vm401_vm9 = vcmp.eq.s32.totalorder %v4573_v53, %v3974_v56 }
  0xd6   : > { %2584 = vmatpush.bf16.msk.msra.mxu0 %vm2583_vm1, %v4525_v44  ;;  %vm2599_vm4 = vmpackc.low %vm409_vm13, %vm405_vm12  ;;  %vm529_vm12 = vcmp.eq.s32.totalorder %v3772_v20, %v3974_v56 }
  0xd7   : > { %2630 = vmatpush.bf16.msk.msra.mxu3 %vm2629_vm11, %v4525_v44  ;;  %vm2631_vm7 = vmpackc.low %vm537_vm0, %vm533_vm15  ;;  %2600 = vmatpush.bf16.msk.msra.mxu1 %vm2599_vm4, %v4525_v44  ;;  %vm525_vm11 = vcmp.eq.s32.totalorder %v3769_v25, %v3974_v56  ;;  %v4589_v56 = vld [vmem:[#allocation61_spill] sm:$0xff] }
  0xd8   : > { %vm2617_vm10 = vmpackc.low %vm465_vm3, %vm461_vm2 }
  0xd9   : > { %2616 = vmatpush.bf16.msk.msra.mxu2 %vm2615_vm14, %v4525_v44  ;;  %vm2585_vm13 = vmpackc.low %vm337_vm6, %vm333_vm5 }
  0xda   : > { %2586 = vmatpush.bf16.msk.msra.mxu0 %vm2585_vm13, %v4525_v44  ;;  %vm2601_vm14 = vmpackc.low %vm401_vm9, %vm397_vm8 }
  0xdb   : > { %2632 = vmatpush.bf16.msk.msra.mxu3 %vm2631_vm7, %v4525_v44  ;;  %vm2633_vm15 = vmpackc.low %vm529_vm12, %vm525_vm11  ;;  %2602 = vmatpush.bf16.msk.msra.mxu1 %vm2601_vm14, %v4525_v44 }
  0xdd   : > { %2618 = vmatpush.bf16.msk.msra.mxu2 %vm2617_vm10, %v4525_v44  ;;  %v1459_v33 = vpop.f32.mrf.mxu0 }
  0xde   : > { %v1478_v34 = vpop.f32.mrf.mxu1 }
  0xdf   : > { %2634 = vmatpush.bf16.msk.msra.mxu3 %vm2633_vm15, %v4525_v44 }
  0xe0   : > { %1800 = vmatmul.bf16.vlgmr.msra.gmra.mxu2 %v4558_v63  ;;  %1762 = vmatmul.bf16.vlgmr.msra.gmra.mxu0 %v3497_v61 }
  0xe1   : > { %1781 = vmatmul.bf16.vlgmr.msra.gmra.mxu1 %v4578_v42 }
  0xe2   : > { %1819 = vmatmul.bf16.vlgmr.msra.gmra.mxu3 %v3808_v12  ;;  %v1479_v12 = vadd.f32 %v1478_v34, %v1459_v33 }
  0xe3   : > { %v1497_v39 = vpop.f32.mrf.mxu2 }
  0xe4   : > { %v1498_v59 = vadd.f32 %v1497_v39, %v1479_v12 }
  0xe5   : > { %v1461_v40 = vpop.f32.mrf.mxu0  ;;  %v1516_v41 = vpop.f32.mrf.mxu3 }
  0xe6   : > { %v1480_v43 = vpop.f32.mrf.mxu1  ;;  %v1517_v2 = vadd.f32 %v1516_v41, %v1498_v59 }
  0xe7   : > { %v1481_v22 = vadd.f32 %v1480_v43, %v1461_v40 }
  0xeb   : > { %v1499_v47 = vpop.f32.mrf.mxu2 }
  0xec   : > { %v1500_v38 = vadd.f32 %v1499_v47, %v1481_v22 }
  0xed   : > { %v1464_v48 = vpop.f32.mrf.mxu0  ;;  %v1518_v51 = vpop.f32.mrf.mxu3 }
  0xee   : > { %v1483_v55 = vpop.f32.mrf.mxu1  ;;  %v1519_v10 = vadd.f32 %v1518_v51, %v1500_v38 }
  0xef   : > { %v1484_v54 = vadd.f32 %v1483_v55, %v1464_v48 }
  0xf0   : > { %1805 = vmatmul.bf16.gmra.mxu2 %v4567_v21  ;;  %1767 = vmatmul.bf16.gmra.mxu0 %v4589_v56 }
  0xf1   : > { %1786 = vmatmul.bf16.gmra.mxu1 %v4585_v29 }
  0xf2   : > { %1824 = vmatmul.bf16.gmra.mxu3 %v3894_v30 }
  0xf3   : > { %v1502_v44 = vpop.f32.mrf.mxu2 }
  0xf4   : > { %v1503_v14 = vadd.f32 %v1502_v44, %v1484_v54 }
  0xf5   : > { %v1466_v58 = vpop.f32.mrf.mxu0  ;;  %v1521_v61 = vpop.f32.mrf.mxu3 }
  0xf6   : > { %v1485_v62 = vpop.f32.mrf.mxu1  ;;  %v1522_v33 = vadd.f32 %v1521_v61, %v1503_v14 }
  0xf7   : > { %v1486_v40 = vadd.f32 %v1485_v62, %v1466_v58 }
  0xfb   : > { %v1504_v63 = vpop.f32.mrf.mxu2 }
  0xfc   : > { %v1505_v48 = vadd.f32 %v1504_v63, %v1486_v40 }
  0xfd   : > { %v4330_v0 = vpop.f32.mrf.mxu3  ;;  %v1535_v18 = vpop.f32.mrf.mxu0 }
  0xfe   : > { %v1554_v19 = vpop.f32.mrf.mxu1  ;;  %v1536_v13 = vadd.f32 %v1535_v18, %v1517_v2 }
 0x103   : > { %v1573_v7 = vpop.f32.mrf.mxu2 }
 0x104   : > { %v1574_v57 = vadd.f32 %v1573_v7, %v1554_v19  ;;  %v1524_v19 = vadd.f32 %v4330_v0, %v1505_v48 }
 0x105   : > { %v1592_v27 = vpop.f32.mrf.mxu3  ;;  %v1537_v28 = vpop.f32.mrf.mxu0 }
 0x106   : > { %v1556_v36 = vpop.f32.mrf.mxu1  ;;  %v1593_v52 = vadd.f32 %v1592_v27, %v1574_v57  ;;  %v1538_v60 = vadd.f32 %v1537_v28, %v1519_v10 }
 0x10b   : > { %v1575_v6 = vpop.f32.mrf.mxu2 }
 0x10c   : > { %v1576_v21 = vadd.f32 %v1575_v6, %v1556_v36 }
 0x10d   : > { %v1594_v8 = vpop.f32.mrf.mxu3  ;;  %v1540_v16 = vpop.f32.mrf.mxu0 }
 0x10e   : > { %v1559_v17 = vpop.f32.mrf.mxu1  ;;  %v1595_v53 = vadd.f32 %v1594_v8, %v1576_v21  ;;  %v1541_v41 = vadd.f32 %v1540_v16, %v1522_v33 }
 0x113   : > { %v1578_v24 = vpop.f32.mrf.mxu2 }
 0x114   : > { %v1579_v5 = vadd.f32 %v1578_v24, %v1559_v17 }
 0x115   : > { %v1597_v30 = vpop.f32.mrf.mxu3  ;;  %v1542_v25 = vpop.f32.mrf.mxu0 }
 0x116   : > { %v1561_v20 = vpop.f32.mrf.mxu1  ;;  %v1598_v26 = vadd.f32 %v1597_v30, %v1579_v5  ;;  %v1543_v28 = vadd.f32 %v1542_v25, %v1524_v19 }
 0x11b   : > { %v1580_v23 = vpop.f32.mrf.mxu2 }
 0x11c   : > { %v1581_v43 = vadd.f32 %v1580_v23, %v1561_v20 }
 0x11d   : > { %v1599_v35 = vpop.f32.mrf.mxu3  ;;  %v1611_v50 = vpop.f32.mrf.mxu0 }
 0x11e   : > { %v1612_v3 = vadd.f32 %v1611_v50, %v1593_v52  ;;  %v1630_v11 = vpop.f32.mrf.mxu1  ;;  %v1600_v56 = vadd.f32 %v1599_v35, %v1581_v43 }
 0x120   : > { %v1631_v37 = vadd.f32 %v1630_v11, %v1612_v3 }
 0x122   : > { %v1830_v45 = vpack.c.bf16 %v1631_v37, %v1536_v13 }
 0x123   : > { %v1649_v46 = vpop.f32.mrf.mxu2 }
 0x124   : > { %1838 = vst [vmem:[%s4333_s27] sm:$0xff] %v1830_v45 }
 0x125   : > { %v1668_v49 = vpop.f32.mrf.mxu3  ;;  %v1613_v1 = vpop.f32.mrf.mxu0 }
 0x126   : > { %v1614_v9 = vadd.f32 %v1613_v1, %v1595_v53  ;;  %v1632_v42 = vpop.f32.mrf.mxu1  ;;  %v1669_v50 = vadd.f32 %v1668_v49, %v1649_v46 }
 0x128   : > { %v1633_v4 = vadd.f32 %v1632_v42, %v1614_v9 }
 0x12a   : > { %v1832_v15 = vpack.c.bf16 %v1633_v4, %v1538_v60 }
 0x12b   : > { %v1651_v29 = vpop.f32.mrf.mxu2 }
 0x12c   : > { %1840 = vst [vmem:[%s4333_s27 + $0x10] sm:$0xff] %v1832_v15 }
 0x12d   : > { %v1670_v31 = vpop.f32.mrf.mxu3  ;;  %v1616_v32 = vpop.f32.mrf.mxu0 }
 0x12e   : > { %v1617_v34 = vadd.f32 %v1616_v32, %v1598_v26  ;;  %v1635_v39 = vpop.f32.mrf.mxu1  ;;  %v1671_v53 = vadd.f32 %v1670_v31, %v1651_v29 }
 0x130   : > { %v1636_v47 = vadd.f32 %v1635_v39, %v1617_v34 }
 0x132   : > { %v1834_v51 = vpack.c.bf16 %v1636_v47, %v1541_v41 }
 0x133   : > { %v1654_v55 = vpop.f32.mrf.mxu2 }
 0x134   : > { %1842 = vst [vmem:[%s4333_s27 + $0x20] sm:$0xff] %v1834_v51 }
 0x135   : > { %v1673_v44 = vpop.f32.mrf.mxu3  ;;  %v1618_v18 = vpop.f32.mrf.mxu0 }
 0x136   : > { %v1619_v7 = vadd.f32 %v1618_v18, %v1600_v56  ;;  %v1637_v27 = vpop.f32.mrf.mxu1  ;;  %v1674_v26 = vadd.f32 %v1673_v44, %v1654_v55 }
 0x138   : > { %v1638_v61 = vadd.f32 %v1637_v27, %v1619_v7 }
 0x13a   : > { %v1836_v36 = vpack.c.bf16 %v1638_v61, %v1543_v28 }
 0x13b   : > { %v1656_v6 = vpop.f32.mrf.mxu2 }
 0x13c   : > { %1844 = vst [vmem:[%s4333_s27 + $0x30] sm:$0xff] %v1836_v36 }
 0x13d   : > { %v1675_v58 = vpop.f32.mrf.mxu3  ;;  %v1687_v62 = vpop.f32.mrf.mxu0 }
 0x13e   : > { %v1706_v8 = vpop.f32.mrf.mxu1  ;;  %v1688_v22 = vadd.f32 %v1687_v62, %v1669_v50  ;;  %v1676_v56 = vadd.f32 %v1675_v58, %v1656_v6 }
 0x140   : > { %v1707_v37 = vadd.f32 %v1706_v8, %v1688_v22 }
 0x143   : > { %v1725_v16 = vpop.f32.mrf.mxu2 }
 0x144   : > { %v1726_v1 = vadd.f32 %v1725_v16, %v1707_v37 }
 0x145   : > { %v1744_v63 = vpop.f32.mrf.mxu3  ;;  %v1689_v17 = vpop.f32.mrf.mxu0 }
 0x146   : > { %v1708_v24 = vpop.f32.mrf.mxu1  ;;  %v1690_v60 = vadd.f32 %v1689_v17, %v1671_v53 }
 0x148   : > { %v1709_v4 = vadd.f32 %v1708_v24, %v1690_v60 }
 0x14b   : > { %v1727_v30 = vpop.f32.mrf.mxu2 }
 0x14c   : > { %v1728_v32 = vadd.f32 %v1727_v30, %v1709_v4 }
 0x14d   : > { %v1746_v20 = vpop.f32.mrf.mxu3  ;;  %v1692_v12 = vpop.f32.mrf.mxu0 }
 0x14e   : > { %v1711_v57 = vpop.f32.mrf.mxu1  ;;  %v1693_v39 = vadd.f32 %v1692_v12, %v1674_v26 }
 0x150   : > { %v1712_v47 = vadd.f32 %v1711_v57, %v1693_v39 }
 0x153   : > { %v1730_v59 = vpop.f32.mrf.mxu2 }
 0x154   : > { %v1731_v18 = vadd.f32 %v1730_v59, %v1712_v47 }
 0x155   : > { %v1749_v0 = vpop.f32.mrf.mxu3  ;;  %v1694_v23 = vpop.f32.mrf.mxu0 }
 0x156   : > { %v1713_v52 = vpop.f32.mrf.mxu1  ;;  %v1695_v7 = vadd.f32 %v1694_v23, %v1676_v56 }
 0x158   : > { %v1714_v6 = vadd.f32 %v1713_v52, %v1695_v7 }
 0x15b   : > { %v1732_v25 = vpop.f32.mrf.mxu2 }
 0x15c   : > { %v1733_v8 = vadd.f32 %v1732_v25, %v1714_v6 }
 0x15d   : > { %v1751_v35 = vpop.f32.mrf.mxu3  ;;  %v1763_v2 = vpop.f32.mrf.mxu0 }
 0x15e   : > { %v1782_v3 = vpop.f32.mrf.mxu1  ;;  %v1764_v11 = vadd.f32 %v1763_v2, %v1744_v63 }
 0x160   : > { %v1783_v13 = vadd.f32 %v1782_v3, %v1764_v11 }
 0x163   : > { %v1801_v21 = vpop.f32.mrf.mxu2 }
 0x164   : > { %v1802_v38 = vadd.f32 %v1801_v21, %v1783_v13 }
 0x165   : > { %v1820_v45 = vpop.f32.mrf.mxu3  ;;  %v1765_v9 = vpop.f32.mrf.mxu0 }
 0x166   : > { %v1821_v10 = vadd.f32 %v1820_v45, %v1802_v38  ;;  %v1784_v42 = vpop.f32.mrf.mxu1  ;;  %v1766_v54 = vadd.f32 %v1765_v9, %v1746_v20 }
 0x168   : > { %v1831_v5 = vpack.c.bf16 %v1821_v10, %v1726_v1  ;;  %v1785_v46 = vadd.f32 %v1784_v42, %v1766_v54 }
 0x16a   : > { %1839 = vst [vmem:[%s4333_s27 + $0x8] sm:$0xff] %v1831_v5 }
 0x16b   : > { %v1803_v49 = vpop.f32.mrf.mxu2 }
 0x16c   : > { %v1804_v14 = vadd.f32 %v1803_v49, %v1785_v46 }
 0x16d   : > { %v1822_v15 = vpop.f32.mrf.mxu3  ;;  %v1768_v34 = vpop.f32.mrf.mxu0 }
 0x16e   : > { %v1823_v33 = vadd.f32 %v1822_v15, %v1804_v14  ;;  %v1769_v29 = vadd.f32 %v1768_v34, %v1749_v0  ;;  %v1787_v31 = vpop.f32.mrf.mxu1 }
 0x170   : > { %v1833_v40 = vpack.c.bf16 %v1823_v33, %v1728_v32  ;;  %v1788_v41 = vadd.f32 %v1787_v31, %v1769_v29 }
 0x172   : > { %1841 = vst [vmem:[%s4333_s27 + $0x18] sm:$0xff] %v1833_v40 }
 0x173   : > { %v1806_v43 = vpop.f32.mrf.mxu2 }
 0x174   : > { %v1807_v48 = vadd.f32 %v1806_v43, %v1788_v41 }
 0x175   : > { %v1825_v51 = vpop.f32.mrf.mxu3  ;;  %v1770_v55 = vpop.f32.mrf.mxu0 }
 0x176   : > { %v1826_v19 = vadd.f32 %v1825_v51, %v1807_v48  ;;  %v1771_v44 = vadd.f32 %v1770_v55, %v1751_v35  ;;  %v1789_v28 = vpop.f32.mrf.mxu1 }
 0x178   : > { %v1835_v27 = vpack.c.bf16 %v1826_v19, %v1731_v18  ;;  %v1790_v61 = vadd.f32 %v1789_v28, %v1771_v44 }
 0x17a   : > { %1843 = vst [vmem:[%s4333_s27 + $0x28] sm:$0xff] %v1835_v27 }
 0x17b   : > { %v1808_v36 = vpop.f32.mrf.mxu2 }
 0x17c   : > { %v1809_v58 = vadd.f32 %v1808_v36, %v1790_v61 }
 0x17d   : > { %v1827_v62 = vpop.f32.mrf.mxu3 }
 0x17e   : > { %v1828_v16 = vadd.f32 %v1827_v62, %v1809_v58 }
 0x180   : > { %v1837_v63 = vpack.c.bf16 %v1828_v16, %v1733_v8 }
 0x182   : > { %1845 = vst [vmem:[%s4333_s27 + $0x38] sm:$0xff] %v1837_v63 }
 0x183   : > { %2801 = shalt.err (!%p2798_p9)
}
 0x184   : > { %s2850_s29 = smov 256   ;;  %s2851_s4 = smov 512  }
 0x185   : > { %s2852_s5 = smov 16  }
 0x186   : > { %2657 = dma.vmem_to_hbm [thread:$0]  (%p2928_p13), %s1860_s15, 1024, %s1862_s18, %s1847_s16, %s2850_s29, %s2851_s4, %s2852_s5  }
 0x187 PF: > { %s1876_s6 = sand.u32 1, %s2832_s9   ;;  %p4590_p10 = scmp.ge.s32.totalorder %s2844_s12, 2 }
 0x188   : > { %s1877_s17 = scalar_lea.sflag [#allocation4], %s1876_s6 }
 0x189   : > { %p2668_p11 = pnand %p4590_p10, %p2933_p4 }
 0x18b   : > { %p2669_p0 = pneg %p2668_p11 }
 0x18d   : > { %2827 = dma.done.wait (%p2669_p0), %s1877_s17, 1024  }
 0x18e   : > { %2829 = vsyncadd (%p2669_p0), %s1877_s17, 4294966272  ;;  %p16_p2 = scmp.ge.s32.totalorder %s2908_s23, 4   ;;  %s4591_s9 = smov %s2836_s10 }
 0x18f   : > { %s4592_s10 = smov %s2840_s11  ;;  %s4593_s11 = smov %s2920_s26 }
 0x190   : > { %s4594_s12 = smov %s2908_s23  ;;  %18 = sbr.rel (!%p16_p2) target bundleno = 6 (0x6), region = 77 }
 0x195   :  { %1883 = vsyncpa [#allocation3], 1 }
 0x196   :  { %1885 = vsyncpa [#allocation3 + $0x1], 1 }
 0x197   :  { %1886 = vsyncpa [#allocation6], 1 }
 0x198   :  { %1887 = vsyncpa [#allocation4], 1 }
 0x199   :  { %1889 = vsyncpa [#allocation4 + $0x1], 1 }

</bundles_post_ra>
